<compile_context>
chip_gen: v7x
topology: tpu7x:2x2x1
jax: 0.10.0
libtpu: 0.0.40
codegen_flags: <defaults>
</compile_context>

<pallas_src>
import jax
import jax.numpy as jnp
from jax.experimental import pallas as pl
from jax.experimental.pallas import tpu as pltpu


# ----------------------------------------------------------------------------
# packed-parameter bookkeeping
# ----------------------------------------------------------------------------
PACKED_KEYS = (
    "w_ode", "b_ode",            # encoder ODE func, stacked (2,H,H) / (2,H)
    "w1x", "b1",                 # fused gate first-layer x-path (Dx,3Ng)/(1,3Ng)
    "w1h",                       # gate first-layer h-paths, stacked (3,H,Ng)
    "w2", "b2",                  # gate second layers, stacked (3,Ng,H)/(3,H)
    "wlat", "blat",              # h -> dec_h latent projection
    "wd", "bd",                  # decoder ODE func, stacked (2,Hd,Hd)/(2,Hd)
    "wy1", "by1", "wy2", "by2",  # output net: Linear-Tanh-Linear
)


def pack_params(params):
    """One-time packing of the per-gate weights into fused/stacked arrays."""
    e, d = params["enc"], params["dec"]
    return {
        "w_ode": jnp.stack([e["wo1"], e["wo2"]]),                       # (2,H,H)
        "b_ode": jnp.concatenate([e["bo1"], e["bo2"]], axis=0),         # (2,H)
        "w1x": jnp.concatenate([e["wz1x"], e["wr1x"], e["wn1x"]], 1),   # (Dx,3Ng)
        "b1": jnp.concatenate([e["bz1"], e["br1"], e["bn1"]], 1),       # (1,3Ng)
        "w1h": jnp.stack([e["wz1h"], e["wr1h"], e["wn1h"]]),            # (3,H,Ng)
        "w2": jnp.stack([e["wz2"], e["wr2"], e["wn2"]]),                # (3,Ng,H)
        "b2": jnp.concatenate([e["bz2"], e["br2"], e["bn2"]], 0),       # (3,H)
        "wlat": e["wlat"], "blat": e["blat"],
        "wd": jnp.stack([d["wd1"], d["wd2"]]),                          # (2,Hd,Hd)
        "bd": jnp.concatenate([d["bd1"], d["bd2"]], 0),                 # (2,Hd)
        "wy1": d["wy1"], "by1": d["by1"],
        "wy2": d["wy2"], "by2": d["by2"],
    }


# ----------------------------------------------------------------------------
# fused encoder + decoder kernel
# ----------------------------------------------------------------------------
def _seq2seq_kernel(dt_enc_ref, dt_dec_ref, x_ref,
                    w_ode_ref, b_ode_ref, w1x_ref, b1_ref, w1h_ref,
                    w2_ref, b2_ref, wlat_ref, blat_ref,
                    wd_ref, bd_ref, wy1_ref, by1_ref, wy2_ref, by2_ref,
                    y_ref,
                    xpz_s, xpr_s, xpn_s, hdec_s):
    T, Bb, Dx = x_ref.shape
    Ty, _, Dy = y_ref.shape
    H = w_ode_ref.shape[1]
    Ng = w1h_ref.shape[2]
    Hd = wd_ref.shape[1]
    f32 = jnp.float32

    def mm(a, b):
        return jnp.dot(a, b, preferred_element_type=f32)

    # ---- hoist all weight loads out of the recurrent loops (load once) ------
    wo1, wo2 = w_ode_ref[0], w_ode_ref[1]
    w1h_z, w1h_r, w1h_n = w1h_ref[0], w1h_ref[1], w1h_ref[2]
    wz2, wr2, wn2 = w2_ref[0], w2_ref[1], w2_ref[2]
    wlat = wlat_ref[...]
    wd1, wd2 = wd_ref[0], wd_ref[1]
    wy1, wy2 = wy1_ref[...], wy2_ref[...]

    # ---- pre-broadcast loop-resident biases to (Bb, N) once ------------------
    bo1 = jnp.broadcast_to(b_ode_ref[0][None, :], (Bb, H))
    bo2 = jnp.broadcast_to(b_ode_ref[1][None, :], (Bb, H))
    bz2 = jnp.broadcast_to(b2_ref[0][None, :], (Bb, H))
    br2 = jnp.broadcast_to(b2_ref[1][None, :], (Bb, H))
    bn2 = jnp.broadcast_to(b2_ref[2][None, :], (Bb, H))
    blat = jnp.broadcast_to(blat_ref[...], (Bb, Hd))
    bd1 = jnp.broadcast_to(bd_ref[0][None, :], (Bb, Hd))
    bd2 = jnp.broadcast_to(bd_ref[1][None, :], (Bb, Hd))

    # ---- x-projection hoisted out of the loop: one (T*Bb, Dx) matmul ---------
    x_flat = x_ref[...].reshape(T * Bb, Dx)
    xp = mm(x_flat, w1x_ref[...]) + b1_ref[...]            # (T*Bb, 3Ng)
    xpz_s[...] = xp[:, :Ng].reshape(T, Bb, Ng)
    xpr_s[...] = xp[:, Ng:2 * Ng].reshape(T, Bb, Ng)
    xpn_s[...] = xp[:, 2 * Ng:].reshape(T, Bb, Ng)

    # -------------------- encoder: ODE-GRU over T observations ---------------
    def enc_step(t, h):
        dt = dt_enc_ref[t]
        # ODE Euler step between observations: h <- h + dt * f(h)
        f = mm(jnp.tanh(mm(h, wo1) + bo1), wo2) + bo2
        h = h + dt * f
        # GRU gate nets (2-layer); x-paths precomputed, all lane-aligned.
        pre_z = jnp.tanh(mm(h, w1h_z) + xpz_s[t])
        pre_r = jnp.tanh(mm(h, w1h_r) + xpr_s[t])
        z = jax.nn.sigmoid(mm(pre_z, wz2) + bz2)
        r = jax.nn.sigmoid(mm(pre_r, wr2) + br2)
        pre_n = jnp.tanh(mm(h * r, w1h_n) + xpn_s[t])
        n = jnp.tanh(mm(pre_n, wn2) + bn2)
        return (1.0 - z) * n + z * h

    enc_unroll = True if T <= 16 else 8
    h_enc = jax.lax.fori_loop(0, T, enc_step, jnp.zeros((Bb, H), f32),
                              unroll=enc_unroll)

    # Only the final latent is consumed downstream (hs[:, -1, :]).
    h0 = jnp.tanh(mm(h_enc, wlat) + blat)                  # (Bb, Hd)

    # -------------------- decoder: ODE rollout over Ty points ----------------
    def dec_step(k, h):
        dt = dt_dec_ref[k]
        f = mm(jnp.tanh(mm(h, wd1) + bd1), wd2) + bd2
        h = h + dt * f
        hdec_s[k] = h
        return h

    dec_unroll = True if Ty <= 16 else 8
    jax.lax.fori_loop(0, Ty, dec_step, h0, unroll=dec_unroll)

    # Output MLP applied ONCE on the whole (Ty*Bb, Hd) slab, single store.
    h_all = hdec_s[...].reshape(Ty * Bb, Hd)
    y = mm(jnp.tanh(mm(h_all, wy1) + by1_ref[...]), wy2) + by2_ref[...]
    y_ref[...] = y.reshape(Ty, Bb, Dy).astype(y_ref.dtype)


# ----------------------------------------------------------------------------
# Seq2Seq.forward equivalent (thin JAX wrapper)
# ----------------------------------------------------------------------------
def seq2seq_forward(packed, y_time, x_data, x_time, x_mask=None):
    x = x_data * x_mask if x_mask is not None else x_data
    if y_time.ndim < 1:
        y_time = y_time[None]

    B, T, Dx = x.shape
    Ty = y_time.shape[0]
    Dy = packed["wy2"].shape[1]
    H = packed["w_ode"].shape[1]
    Ng = packed["w1h"].shape[2]
    Hd = packed["wd"].shape[1]
    Do = packed["wy1"].shape[1]

    # Pad batch to the f32 sublane tile (8).
    B_pad = ((B + 7) // 8) * 8
    x_tm = jnp.transpose(x, (1, 0, 2))                       # (T, B, Dx)
    if B_pad != B:
        x_tm = jnp.pad(x_tm, ((0, 0), (0, B_pad - B), (0, 0)))

    dt_enc = jnp.concatenate(
        [jnp.zeros((1,), x_time.dtype), x_time[1:] - x_time[:-1]])   # (T,)
    # Reference: y_time = cat((x_time[-1:], y_time)); decode; drop first point.
    y_time_full = jnp.concatenate([x_time[-1:], y_time])
    dt_dec = y_time_full[1:] - y_time_full[:-1]                       # (Ty,)

    # Megacore: split padded batch across TensorCores when it is big enough.
    nb = 2 if (B_pad % 16 == 0) else 1
    B_blk = B_pad // nb

    weights = [packed[k] for k in PACKED_KEYS]

    smem = pl.BlockSpec(memory_space=pltpu.MemorySpace.SMEM)
    vmem = pl.BlockSpec(memory_space=pltpu.MemorySpace.VMEM)
    in_specs = (
        [smem, smem]                                               # dt_enc, dt_dec
        + [pl.BlockSpec((T, B_blk, Dx), lambda i: (0, i, 0))]      # x (T,B,Dx)
        + [vmem] * len(weights)
    )
    out_specs = pl.BlockSpec((Ty, B_blk, Dy), lambda i: (0, i, 0))

    scratch_shapes = [
        pltpu.VMEM((T, B_blk, Ng), jnp.float32),   # xpz
        pltpu.VMEM((T, B_blk, Ng), jnp.float32),   # xpr
        pltpu.VMEM((T, B_blk, Ng), jnp.float32),   # xpn
        pltpu.VMEM((Ty, B_blk, Hd), jnp.float32),  # decoder hidden rollout
    ]

    # Advisory cost estimate (tiny latency-bound kernel).
    flops = 2 * B_pad * (
        T * (2 * H * H + 3 * H * Ng + 3 * Ng * H)
        + T * Dx * 3 * Ng
        + H * Hd
        + Ty * 2 * Hd * Hd
        + Ty * (Hd * Do + Do * Dy))
    transcendentals = B_pad * (T * (4 * H + 3 * Ng) + Hd + Ty * (Hd + Do))
    bytes_accessed = 4 * (int(x_tm.size) + int(dt_enc.size) + int(dt_dec.size)
                          + sum(int(w.size) for w in weights)
                          + Ty * B_pad * Dy)

    y_tm = pl.pallas_call(
        _seq2seq_kernel,
        out_shape=jax.ShapeDtypeStruct((Ty, B_pad, Dy), jnp.float32),
        grid=(nb,),
        in_specs=in_specs,
        out_specs=out_specs,
        scratch_shapes=scratch_shapes,
        compiler_params=pltpu.CompilerParams(
            dimension_semantics=("parallel",),
            vmem_limit_bytes=32 * 1024 * 1024),
        cost_estimate=pl.CostEstimate(
            flops=flops, transcendentals=transcendentals,
            bytes_accessed=bytes_accessed),
    )(dt_enc, dt_dec, x_tm, *weights)

    return jnp.transpose(y_tm, (1, 0, 2))[:B]                 # (B, Ty, Dy)


# ----------------------------------------------------------------------------
# deterministic parameter init (shapes implied by Seq2Seq.__init__)
# ----------------------------------------------------------------------------
def init_params(key, x_dims, y_dims, enc_h, dec_h, n_gru_units, n_out_units):
    keys = iter(jax.random.split(key, 64))

    def w(shape, scale=0.1):
        return (scale * jax.random.normal(next(keys), shape)).astype(jnp.float32)

    def b(shape):
        return jnp.zeros(shape, jnp.float32)

    enc = dict(
        wo1=w((enc_h, enc_h)), bo1=b((1, enc_h)),
        wo2=w((enc_h, enc_h)), bo2=b((1, enc_h)),
        wz1h=w((enc_h, n_gru_units)), wz1x=w((x_dims, n_gru_units)),
        bz1=b((1, n_gru_units)), wz2=w((n_gru_units, enc_h)), bz2=b((1, enc_h)),
        wr1h=w((enc_h, n_gru_units)), wr1x=w((x_dims, n_gru_units)),
        br1=b((1, n_gru_units)), wr2=w((n_gru_units, enc_h)), br2=b((1, enc_h)),
        wn1h=w((enc_h, n_gru_units)), wn1x=w((x_dims, n_gru_units)),
        bn1=b((1, n_gru_units)), wn2=w((n_gru_units, enc_h)), bn2=b((1, enc_h)),
        wlat=w((enc_h, dec_h)), blat=b((1, dec_h)),
    )
    dec = dict(
        wd1=w((dec_h, dec_h)), bd1=b((1, dec_h)),
        wd2=w((dec_h, dec_h)), bd2=b((1, dec_h)),
        wy1=w((dec_h, n_out_units)), by1=b((1, n_out_units)),
        wy2=w((n_out_units, y_dims)), by2=b((1, y_dims)),
    )
    return {"enc": enc, "dec": dec}


if __name__ == "__main__":
    B, Tx, Ty = 4, 8, 6
    x_dims, y_dims = 8, 8
    enc_h = dec_h = 32
    n_gru_units = n_out_units = 32

    key = jax.random.PRNGKey(0)
    kp, kx, km = jax.random.split(key, 3)

    params = init_params(kp, x_dims, y_dims, enc_h, dec_h,
                         n_gru_units, n_out_units)
    packed = jax.tree_util.tree_map(jax.device_put, pack_params(params))

    x_data = jax.random.normal(kx, (B, Tx, x_dims), dtype=jnp.float32)
    x_mask = (jax.random.uniform(km, (B, Tx, x_dims)) > 0.2).astype(jnp.float32)
    x_time = jnp.linspace(0.0, 1.0, Tx).astype(jnp.float32)
    y_time = jnp.linspace(1.2, 2.0, Ty).astype(jnp.float32)

    fwd = jax.jit(seq2seq_forward)
    y_pred = fwd(packed, y_time, x_data, x_time, x_mask)
    y_pred = jax.block_until_ready(y_pred)

    assert y_pred.shape == (B, Ty, y_dims), y_pred.shape
    assert jnp.all(jnp.isfinite(y_pred))
    print("KERNEL_OK")
</pallas_src>

<mosaic_0001>
module attributes {stable_mosaic.version = 11 : i64} {
  func.func @_seq2seq_kernel(%arg0: i32, %arg1: memref<8xf32, #tpu.memory_space<smem>>, %arg2: memref<6xf32, #tpu.memory_space<smem>>, %arg3: memref<8x8x8xf32, #tpu.memory_space<vmem>>, %arg4: memref<2x32x32xf32, #tpu.memory_space<vmem>>, %arg5: memref<2x32xf32, #tpu.memory_space<vmem>>, %arg6: memref<8x96xf32, #tpu.memory_space<vmem>>, %arg7: memref<1x96xf32, #tpu.memory_space<vmem>>, %arg8: memref<3x32x32xf32, #tpu.memory_space<vmem>>, %arg9: memref<3x32x32xf32, #tpu.memory_space<vmem>>, %arg10: memref<3x32xf32, #tpu.memory_space<vmem>>, %arg11: memref<32x32xf32, #tpu.memory_space<vmem>>, %arg12: memref<1x32xf32, #tpu.memory_space<vmem>>, %arg13: memref<2x32x32xf32, #tpu.memory_space<vmem>>, %arg14: memref<2x32xf32, #tpu.memory_space<vmem>>, %arg15: memref<32x32xf32, #tpu.memory_space<vmem>>, %arg16: memref<1x32xf32, #tpu.memory_space<vmem>>, %arg17: memref<32x8xf32, #tpu.memory_space<vmem>>, %arg18: memref<1x8xf32, #tpu.memory_space<vmem>>, %arg19: memref<6x8x8xf32, #tpu.memory_space<vmem>>, %arg20: memref<8x8x32xf32, #tpu.memory_space<vmem>>, %arg21: memref<8x8x32xf32, #tpu.memory_space<vmem>>, %arg22: memref<8x8x32xf32, #tpu.memory_space<vmem>>, %arg23: memref<6x8x32xf32, #tpu.memory_space<vmem>>) attributes {dimension_semantics = [#tpu.dimension_semantics<parallel>], iteration_bounds = array<i64: 1>, scalar_prefetch = 0 : i64, scratch_operands = 4 : i64, tpu.core_type = #tpu.core_type<tc>, window_params = [{transform_indices = @transform_0, window_bounds = array<i64: 8>}, {transform_indices = @transform_1, window_bounds = array<i64: 6>}, {transform_indices = @transform_2, window_bounds = array<i64: 8, 8, 8>}, {pipeline_mode = #tpu.pipeline_mode<synchronous>, transform_indices = @transform_3, window_bounds = array<i64: 2, 32, 32>}, {pipeline_mode = #tpu.pipeline_mode<synchronous>, transform_indices = @transform_4, window_bounds = array<i64: 2, 32>}, {pipeline_mode = #tpu.pipeline_mode<synchronous>, transform_indices = @transform_5, window_bounds = array<i64: 8, 96>}, {pipeline_mode = #tpu.pipeline_mode<synchronous>, transform_indices = @transform_6, window_bounds = array<i64: 1, 96>}, {pipeline_mode = #tpu.pipeline_mode<synchronous>, transform_indices = @transform_7, window_bounds = array<i64: 3, 32, 32>}, {pipeline_mode = #tpu.pipeline_mode<synchronous>, transform_indices = @transform_8, window_bounds = array<i64: 3, 32, 32>}, {pipeline_mode = #tpu.pipeline_mode<synchronous>, transform_indices = @transform_9, window_bounds = array<i64: 3, 32>}, {pipeline_mode = #tpu.pipeline_mode<synchronous>, transform_indices = @transform_10, window_bounds = array<i64: 32, 32>}, {pipeline_mode = #tpu.pipeline_mode<synchronous>, transform_indices = @transform_11, window_bounds = array<i64: 1, 32>}, {pipeline_mode = #tpu.pipeline_mode<synchronous>, transform_indices = @transform_12, window_bounds = array<i64: 2, 32, 32>}, {pipeline_mode = #tpu.pipeline_mode<synchronous>, transform_indices = @transform_13, window_bounds = array<i64: 2, 32>}, {pipeline_mode = #tpu.pipeline_mode<synchronous>, transform_indices = @transform_14, window_bounds = array<i64: 32, 32>}, {pipeline_mode = #tpu.pipeline_mode<synchronous>, transform_indices = @transform_15, window_bounds = array<i64: 1, 32>}, {pipeline_mode = #tpu.pipeline_mode<synchronous>, transform_indices = @transform_16, window_bounds = array<i64: 32, 8>}, {pipeline_mode = #tpu.pipeline_mode<synchronous>, transform_indices = @transform_17, window_bounds = array<i64: 1, 8>}, {transform_indices = @transform_18, window_bounds = array<i64: 6, 8, 8>}]} {
    %c0 = arith.constant 0 : index
    %c0_0 = arith.constant 0 : index
    %c0_1 = arith.constant 0 : index
    %0 = vector.load %arg4[%c0, %c0_0, %c0_1] : memref<2x32x32xf32, #tpu.memory_space<vmem>>, vector<1x32x32xf32>
    %1 = vector.shape_cast %0 : vector<1x32x32xf32> to vector<32x32xf32>
    %c1 = arith.constant 1 : index
    %c0_2 = arith.constant 0 : index
    %c0_3 = arith.constant 0 : index
    %2 = vector.load %arg4[%c1, %c0_2, %c0_3] : memref<2x32x32xf32, #tpu.memory_space<vmem>>, vector<1x32x32xf32>
    %3 = vector.shape_cast %2 : vector<1x32x32xf32> to vector<32x32xf32>
    %c0_4 = arith.constant 0 : index
    %c0_5 = arith.constant 0 : index
    %c0_6 = arith.constant 0 : index
    %4 = vector.load %arg8[%c0_4, %c0_5, %c0_6] : memref<3x32x32xf32, #tpu.memory_space<vmem>>, vector<1x32x32xf32>
    %5 = vector.shape_cast %4 : vector<1x32x32xf32> to vector<32x32xf32>
    %c1_7 = arith.constant 1 : index
    %c0_8 = arith.constant 0 : index
    %c0_9 = arith.constant 0 : index
    %6 = vector.load %arg8[%c1_7, %c0_8, %c0_9] : memref<3x32x32xf32, #tpu.memory_space<vmem>>, vector<1x32x32xf32>
    %7 = vector.shape_cast %6 : vector<1x32x32xf32> to vector<32x32xf32>
    %c2 = arith.constant 2 : index
    %c0_10 = arith.constant 0 : index
    %c0_11 = arith.constant 0 : index
    %8 = vector.load %arg8[%c2, %c0_10, %c0_11] : memref<3x32x32xf32, #tpu.memory_space<vmem>>, vector<1x32x32xf32>
    %9 = vector.shape_cast %8 : vector<1x32x32xf32> to vector<32x32xf32>
    %c0_12 = arith.constant 0 : index
    %c0_13 = arith.constant 0 : index
    %c0_14 = arith.constant 0 : index
    %10 = vector.load %arg9[%c0_12, %c0_13, %c0_14] : memref<3x32x32xf32, #tpu.memory_space<vmem>>, vector<1x32x32xf32>
    %11 = vector.shape_cast %10 : vector<1x32x32xf32> to vector<32x32xf32>
    %c1_15 = arith.constant 1 : index
    %c0_16 = arith.constant 0 : index
    %c0_17 = arith.constant 0 : index
    %12 = vector.load %arg9[%c1_15, %c0_16, %c0_17] : memref<3x32x32xf32, #tpu.memory_space<vmem>>, vector<1x32x32xf32>
    %13 = vector.shape_cast %12 : vector<1x32x32xf32> to vector<32x32xf32>
    %c2_18 = arith.constant 2 : index
    %c0_19 = arith.constant 0 : index
    %c0_20 = arith.constant 0 : index
    %14 = vector.load %arg9[%c2_18, %c0_19, %c0_20] : memref<3x32x32xf32, #tpu.memory_space<vmem>>, vector<1x32x32xf32>
    %15 = vector.shape_cast %14 : vector<1x32x32xf32> to vector<32x32xf32>
    %c0_21 = arith.constant 0 : index
    %c0_22 = arith.constant 0 : index
    %16 = vector.load %arg11[%c0_21, %c0_22] : memref<32x32xf32, #tpu.memory_space<vmem>>, vector<32x32xf32>
    %c0_23 = arith.constant 0 : index
    %c0_24 = arith.constant 0 : index
    %c0_25 = arith.constant 0 : index
    %17 = vector.load %arg13[%c0_23, %c0_24, %c0_25] : memref<2x32x32xf32, #tpu.memory_space<vmem>>, vector<1x32x32xf32>
    %18 = vector.shape_cast %17 : vector<1x32x32xf32> to vector<32x32xf32>
    %c1_26 = arith.constant 1 : index
    %c0_27 = arith.constant 0 : index
    %c0_28 = arith.constant 0 : index
    %19 = vector.load %arg13[%c1_26, %c0_27, %c0_28] : memref<2x32x32xf32, #tpu.memory_space<vmem>>, vector<1x32x32xf32>
    %20 = vector.shape_cast %19 : vector<1x32x32xf32> to vector<32x32xf32>
    %c0_29 = arith.constant 0 : index
    %c0_30 = arith.constant 0 : index
    %21 = vector.load %arg15[%c0_29, %c0_30] : memref<32x32xf32, #tpu.memory_space<vmem>>, vector<32x32xf32>
    %c0_31 = arith.constant 0 : index
    %c0_32 = arith.constant 0 : index
    %22 = vector.load %arg17[%c0_31, %c0_32] : memref<32x8xf32, #tpu.memory_space<vmem>>, vector<32x8xf32>
    %c0_33 = arith.constant 0 : index
    %c0_34 = arith.constant 0 : index
    %23 = vector.load %arg5[%c0_33, %c0_34] : memref<2x32xf32, #tpu.memory_space<vmem>>, vector<1x32xf32>
    %24 = vector.shape_cast %23 : vector<1x32xf32> to vector<32xf32>
    %25 = vector.shape_cast %24 : vector<32xf32> to vector<1x32xf32>
    %26 = vector.shape_cast %25 : vector<1x32xf32> to vector<1x32xf32>
    %27 = vector.broadcast %26 : vector<1x32xf32> to vector<8x32xf32>
    %c1_35 = arith.constant 1 : index
    %c0_36 = arith.constant 0 : index
    %28 = vector.load %arg5[%c1_35, %c0_36] : memref<2x32xf32, #tpu.memory_space<vmem>>, vector<1x32xf32>
    %29 = vector.shape_cast %28 : vector<1x32xf32> to vector<32xf32>
    %30 = vector.shape_cast %29 : vector<32xf32> to vector<1x32xf32>
    %31 = vector.shape_cast %30 : vector<1x32xf32> to vector<1x32xf32>
    %32 = vector.broadcast %31 : vector<1x32xf32> to vector<8x32xf32>
    %c0_37 = arith.constant 0 : index
    %c0_38 = arith.constant 0 : index
    %33 = vector.load %arg10[%c0_37, %c0_38] : memref<3x32xf32, #tpu.memory_space<vmem>>, vector<1x32xf32>
    %34 = vector.shape_cast %33 : vector<1x32xf32> to vector<32xf32>
    %35 = vector.shape_cast %34 : vector<32xf32> to vector<1x32xf32>
    %36 = vector.shape_cast %35 : vector<1x32xf32> to vector<1x32xf32>
    %37 = vector.broadcast %36 : vector<1x32xf32> to vector<8x32xf32>
    %c1_39 = arith.constant 1 : index
    %c0_40 = arith.constant 0 : index
    %38 = vector.load %arg10[%c1_39, %c0_40] : memref<3x32xf32, #tpu.memory_space<vmem>>, vector<1x32xf32>
    %39 = vector.shape_cast %38 : vector<1x32xf32> to vector<32xf32>
    %40 = vector.shape_cast %39 : vector<32xf32> to vector<1x32xf32>
    %41 = vector.shape_cast %40 : vector<1x32xf32> to vector<1x32xf32>
    %42 = vector.broadcast %41 : vector<1x32xf32> to vector<8x32xf32>
    %c2_41 = arith.constant 2 : index
    %c0_42 = arith.constant 0 : index
    %43 = vector.load %arg10[%c2_41, %c0_42] : memref<3x32xf32, #tpu.memory_space<vmem>>, vector<1x32xf32>
    %44 = vector.shape_cast %43 : vector<1x32xf32> to vector<32xf32>
    %45 = vector.shape_cast %44 : vector<32xf32> to vector<1x32xf32>
    %46 = vector.shape_cast %45 : vector<1x32xf32> to vector<1x32xf32>
    %47 = vector.broadcast %46 : vector<1x32xf32> to vector<8x32xf32>
    %c0_43 = arith.constant 0 : index
    %c0_44 = arith.constant 0 : index
    %48 = vector.load %arg12[%c0_43, %c0_44] : memref<1x32xf32, #tpu.memory_space<vmem>>, vector<1x32xf32>
    %49 = vector.shape_cast %48 : vector<1x32xf32> to vector<1x32xf32>
    %50 = vector.broadcast %49 : vector<1x32xf32> to vector<8x32xf32>
    %c0_45 = arith.constant 0 : index
    %c0_46 = arith.constant 0 : index
    %51 = vector.load %arg14[%c0_45, %c0_46] : memref<2x32xf32, #tpu.memory_space<vmem>>, vector<1x32xf32>
    %52 = vector.shape_cast %51 : vector<1x32xf32> to vector<32xf32>
    %53 = vector.shape_cast %52 : vector<32xf32> to vector<1x32xf32>
    %54 = vector.shape_cast %53 : vector<1x32xf32> to vector<1x32xf32>
    %55 = vector.broadcast %54 : vector<1x32xf32> to vector<8x32xf32>
    %c1_47 = arith.constant 1 : index
    %c0_48 = arith.constant 0 : index
    %56 = vector.load %arg14[%c1_47, %c0_48] : memref<2x32xf32, #tpu.memory_space<vmem>>, vector<1x32xf32>
    %57 = vector.shape_cast %56 : vector<1x32xf32> to vector<32xf32>
    %58 = vector.shape_cast %57 : vector<32xf32> to vector<1x32xf32>
    %59 = vector.shape_cast %58 : vector<1x32xf32> to vector<1x32xf32>
    %60 = vector.broadcast %59 : vector<1x32xf32> to vector<8x32xf32>
    %c0_49 = arith.constant 0 : index
    %c0_50 = arith.constant 0 : index
    %c0_51 = arith.constant 0 : index
    %61 = vector.load %arg3[%c0_49, %c0_50, %c0_51] : memref<8x8x8xf32, #tpu.memory_space<vmem>>, vector<8x8x8xf32>
    %62 = vector.shape_cast %61 : vector<8x8x8xf32> to vector<64x8xf32>
    %c0_52 = arith.constant 0 : index
    %c0_53 = arith.constant 0 : index
    %63 = vector.load %arg6[%c0_52, %c0_53] : memref<8x96xf32, #tpu.memory_space<vmem>>, vector<8x96xf32>
    %cst = arith.constant dense<0.000000e+00> : vector<64x96xf32>
    %64 = tpu.matmul %62, %63, %cst {dimension_numbers = #tpu.dot_dimension_numbers<[1], [0], [0], [1], [0, 0, 1, 1], [], []>} : vector<64x8xf32>, vector<8x96xf32>, vector<64x96xf32> -> vector<64x96xf32>
    %c0_54 = arith.constant 0 : index
    %c0_55 = arith.constant 0 : index
    %65 = vector.load %arg7[%c0_54, %c0_55] : memref<1x96xf32, #tpu.memory_space<vmem>>, vector<1x96xf32>
    %66 = vector.broadcast %65 : vector<1x96xf32> to vector<64x96xf32>
    %67 = arith.addf %64, %66 : vector<64x96xf32>
    %68 = vector.extract_strided_slice %67 {offsets = [0, 0], sizes = [64, 32], strides = [1, 1]} : vector<64x96xf32> to vector<64x32xf32>
    %69 = vector.shape_cast %68 : vector<64x32xf32> to vector<8x8x32xf32>
    %c0_56 = arith.constant 0 : index
    %c0_57 = arith.constant 0 : index
    %c0_58 = arith.constant 0 : index
    %70 = vector.load %arg20[%c0_56, %c0_57, %c0_58] : memref<8x8x32xf32, #tpu.memory_space<vmem>>, vector<8x8x32xf32>
    tpu.vector_store %arg20[%c0_56, %c0_57, %c0_58], %69 {strides = array<i32>} : memref<8x8x32xf32, #tpu.memory_space<vmem>>, vector<8x8x32xf32>,
    %71 = vector.extract_strided_slice %67 {offsets = [0, 32], sizes = [64, 32], strides = [1, 1]} : vector<64x96xf32> to vector<64x32xf32>
    %72 = vector.shape_cast %71 : vector<64x32xf32> to vector<8x8x32xf32>
    %c0_59 = arith.constant 0 : index
    %c0_60 = arith.constant 0 : index
    %c0_61 = arith.constant 0 : index
    %73 = vector.load %arg21[%c0_59, %c0_60, %c0_61] : memref<8x8x32xf32, #tpu.memory_space<vmem>>, vector<8x8x32xf32>
    tpu.vector_store %arg21[%c0_59, %c0_60, %c0_61], %72 {strides = array<i32>} : memref<8x8x32xf32, #tpu.memory_space<vmem>>, vector<8x8x32xf32>,
    %74 = vector.extract_strided_slice %67 {offsets = [0, 64], sizes = [64, 32], strides = [1, 1]} : vector<64x96xf32> to vector<64x32xf32>
    %75 = vector.shape_cast %74 : vector<64x32xf32> to vector<8x8x32xf32>
    %c0_62 = arith.constant 0 : index
    %c0_63 = arith.constant 0 : index
    %c0_64 = arith.constant 0 : index
    %76 = vector.load %arg22[%c0_62, %c0_63, %c0_64] : memref<8x8x32xf32, #tpu.memory_space<vmem>>, vector<8x8x32xf32>
    tpu.vector_store %arg22[%c0_62, %c0_63, %c0_64], %75 {strides = array<i32>} : memref<8x8x32xf32, #tpu.memory_space<vmem>>, vector<8x8x32xf32>,
    %cst_65 = arith.constant 0.000000e+00 : f32
    %77 = vector.broadcast %cst_65 : f32 to vector<8x32xf32>
    %c0_i32 = arith.constant 0 : i32
    %78 = arith.index_cast %c0_i32 : i32 to index
    %79 = memref.load %arg1[%78] : memref<8xf32, #tpu.memory_space<smem>>
    %cst_66 = arith.constant dense<0.000000e+00> : vector<8x32xf32>
    %80 = tpu.matmul %77, %1, %cst_66 {dimension_numbers = #tpu.dot_dimension_numbers<[1], [0], [0], [1], [0, 0, 1, 1], [], []>} : vector<8x32xf32>, vector<32x32xf32>, vector<8x32xf32> -> vector<8x32xf32>
    %81 = arith.addf %80, %27 : vector<8x32xf32>
    %82 = math.tanh %81 : vector<8x32xf32>
    %cst_67 = arith.constant dense<0.000000e+00> : vector<8x32xf32>
    %83 = tpu.matmul %82, %3, %cst_67 {dimension_numbers = #tpu.dot_dimension_numbers<[1], [0], [0], [1], [0, 0, 1, 1], [], []>} : vector<8x32xf32>, vector<32x32xf32>, vector<8x32xf32> -> vector<8x32xf32>
    %84 = arith.addf %83, %32 : vector<8x32xf32>
    %85 = vector.broadcast %79 : f32 to vector<8x32xf32>
    %86 = arith.mulf %85, %84 : vector<8x32xf32>
    %87 = arith.addf %77, %86 : vector<8x32xf32>
    %cst_68 = arith.constant dense<0.000000e+00> : vector<8x32xf32>
    %88 = tpu.matmul %87, %5, %cst_68 {dimension_numbers = #tpu.dot_dimension_numbers<[1], [0], [0], [1], [0, 0, 1, 1], [], []>} : vector<8x32xf32>, vector<32x32xf32>, vector<8x32xf32> -> vector<8x32xf32>
    %89 = arith.index_cast %c0_i32 : i32 to index
    %c0_69 = arith.constant 0 : index
    %c0_70 = arith.constant 0 : index
    %90 = vector.load %arg20[%89, %c0_69, %c0_70] : memref<8x8x32xf32, #tpu.memory_space<vmem>>, vector<1x8x32xf32>
    %91 = vector.shape_cast %90 : vector<1x8x32xf32> to vector<8x32xf32>
    %92 = arith.addf %88, %91 : vector<8x32xf32>
    %93 = math.tanh %92 : vector<8x32xf32>
    %cst_71 = arith.constant dense<0.000000e+00> : vector<8x32xf32>
    %94 = tpu.matmul %87, %7, %cst_71 {dimension_numbers = #tpu.dot_dimension_numbers<[1], [0], [0], [1], [0, 0, 1, 1], [], []>} : vector<8x32xf32>, vector<32x32xf32>, vector<8x32xf32> -> vector<8x32xf32>
    %95 = arith.index_cast %c0_i32 : i32 to index
    %c0_72 = arith.constant 0 : index
    %c0_73 = arith.constant 0 : index
    %96 = vector.load %arg21[%95, %c0_72, %c0_73] : memref<8x8x32xf32, #tpu.memory_space<vmem>>, vector<1x8x32xf32>
    %97 = vector.shape_cast %96 : vector<1x8x32xf32> to vector<8x32xf32>
    %98 = arith.addf %94, %97 : vector<8x32xf32>
    %99 = math.tanh %98 : vector<8x32xf32>
    %cst_74 = arith.constant dense<0.000000e+00> : vector<8x32xf32>
    %100 = tpu.matmul %93, %11, %cst_74 {dimension_numbers = #tpu.dot_dimension_numbers<[1], [0], [0], [1], [0, 0, 1, 1], [], []>} : vector<8x32xf32>, vector<32x32xf32>, vector<8x32xf32> -> vector<8x32xf32>
    %101 = arith.addf %100, %37 : vector<8x32xf32>
    %102 = arith.negf %101 : vector<8x32xf32>
    %103 = math.exp %102 : vector<8x32xf32>
    %cst_75 = arith.constant 1.000000e+00 : f32
    %104 = vector.broadcast %cst_75 : f32 to vector<8x32xf32>
    %105 = arith.addf %104, %103 : vector<8x32xf32>
    %106 = arith.divf %104, %105 : vector<8x32xf32>
    %cst_76 = arith.constant dense<0.000000e+00> : vector<8x32xf32>
    %107 = tpu.matmul %99, %13, %cst_76 {dimension_numbers = #tpu.dot_dimension_numbers<[1], [0], [0], [1], [0, 0, 1, 1], [], []>} : vector<8x32xf32>, vector<32x32xf32>, vector<8x32xf32> -> vector<8x32xf32>
    %108 = arith.addf %107, %42 : vector<8x32xf32>
    %109 = arith.negf %108 : vector<8x32xf32>
    %110 = math.exp %109 : vector<8x32xf32>
    %cst_77 = arith.constant 1.000000e+00 : f32
    %111 = vector.broadcast %cst_77 : f32 to vector<8x32xf32>
    %112 = arith.addf %111, %110 : vector<8x32xf32>
    %113 = arith.divf %111, %112 : vector<8x32xf32>
    %114 = arith.mulf %87, %113 : vector<8x32xf32>
    %cst_78 = arith.constant dense<0.000000e+00> : vector<8x32xf32>
    %115 = tpu.matmul %114, %9, %cst_78 {dimension_numbers = #tpu.dot_dimension_numbers<[1], [0], [0], [1], [0, 0, 1, 1], [], []>} : vector<8x32xf32>, vector<32x32xf32>, vector<8x32xf32> -> vector<8x32xf32>
    %116 = arith.index_cast %c0_i32 : i32 to index
    %c0_79 = arith.constant 0 : index
    %c0_80 = arith.constant 0 : index
    %117 = vector.load %arg22[%116, %c0_79, %c0_80] : memref<8x8x32xf32, #tpu.memory_space<vmem>>, vector<1x8x32xf32>
    %118 = vector.shape_cast %117 : vector<1x8x32xf32> to vector<8x32xf32>
    %119 = arith.addf %115, %118 : vector<8x32xf32>
    %120 = math.tanh %119 : vector<8x32xf32>
    %cst_81 = arith.constant dense<0.000000e+00> : vector<8x32xf32>
    %121 = tpu.matmul %120, %15, %cst_81 {dimension_numbers = #tpu.dot_dimension_numbers<[1], [0], [0], [1], [0, 0, 1, 1], [], []>} : vector<8x32xf32>, vector<32x32xf32>, vector<8x32xf32> -> vector<8x32xf32>
    %122 = arith.addf %121, %47 : vector<8x32xf32>
    %123 = math.tanh %122 : vector<8x32xf32>
    %cst_82 = arith.constant 1.000000e+00 : f32
    %124 = vector.broadcast %cst_82 : f32 to vector<8x32xf32>
    %125 = arith.subf %124, %106 : vector<8x32xf32>
    %126 = arith.mulf %125, %123 : vector<8x32xf32>
    %127 = arith.mulf %106, %87 : vector<8x32xf32>
    %128 = arith.addf %126, %127 : vector<8x32xf32>
    %c1_i32 = arith.constant 1 : i32
    %129 = arith.index_cast %c1_i32 : i32 to index
    %130 = memref.load %arg1[%129] : memref<8xf32, #tpu.memory_space<smem>>
    %cst_83 = arith.constant dense<0.000000e+00> : vector<8x32xf32>
    %131 = tpu.matmul %128, %1, %cst_83 {dimension_numbers = #tpu.dot_dimension_numbers<[1], [0], [0], [1], [0, 0, 1, 1], [], []>} : vector<8x32xf32>, vector<32x32xf32>, vector<8x32xf32> -> vector<8x32xf32>
    %132 = arith.addf %131, %27 : vector<8x32xf32>
    %133 = math.tanh %132 : vector<8x32xf32>
    %cst_84 = arith.constant dense<0.000000e+00> : vector<8x32xf32>
    %134 = tpu.matmul %133, %3, %cst_84 {dimension_numbers = #tpu.dot_dimension_numbers<[1], [0], [0], [1], [0, 0, 1, 1], [], []>} : vector<8x32xf32>, vector<32x32xf32>, vector<8x32xf32> -> vector<8x32xf32>
    %135 = arith.addf %134, %32 : vector<8x32xf32>
    %136 = vector.broadcast %130 : f32 to vector<8x32xf32>
    %137 = arith.mulf %136, %135 : vector<8x32xf32>
    %138 = arith.addf %128, %137 : vector<8x32xf32>
    %cst_85 = arith.constant dense<0.000000e+00> : vector<8x32xf32>
    %139 = tpu.matmul %138, %5, %cst_85 {dimension_numbers = #tpu.dot_dimension_numbers<[1], [0], [0], [1], [0, 0, 1, 1], [], []>} : vector<8x32xf32>, vector<32x32xf32>, vector<8x32xf32> -> vector<8x32xf32>
    %140 = arith.index_cast %c1_i32 : i32 to index
    %c0_86 = arith.constant 0 : index
    %c0_87 = arith.constant 0 : index
    %141 = vector.load %arg20[%140, %c0_86, %c0_87] : memref<8x8x32xf32, #tpu.memory_space<vmem>>, vector<1x8x32xf32>
    %142 = vector.shape_cast %141 : vector<1x8x32xf32> to vector<8x32xf32>
    %143 = arith.addf %139, %142 : vector<8x32xf32>
    %144 = math.tanh %143 : vector<8x32xf32>
    %cst_88 = arith.constant dense<0.000000e+00> : vector<8x32xf32>
    %145 = tpu.matmul %138, %7, %cst_88 {dimension_numbers = #tpu.dot_dimension_numbers<[1], [0], [0], [1], [0, 0, 1, 1], [], []>} : vector<8x32xf32>, vector<32x32xf32>, vector<8x32xf32> -> vector<8x32xf32>
    %146 = arith.index_cast %c1_i32 : i32 to index
    %c0_89 = arith.constant 0 : index
    %c0_90 = arith.constant 0 : index
    %147 = vector.load %arg21[%146, %c0_89, %c0_90] : memref<8x8x32xf32, #tpu.memory_space<vmem>>, vector<1x8x32xf32>
    %148 = vector.shape_cast %147 : vector<1x8x32xf32> to vector<8x32xf32>
    %149 = arith.addf %145, %148 : vector<8x32xf32>
    %150 = math.tanh %149 : vector<8x32xf32>
    %cst_91 = arith.constant dense<0.000000e+00> : vector<8x32xf32>
    %151 = tpu.matmul %144, %11, %cst_91 {dimension_numbers = #tpu.dot_dimension_numbers<[1], [0], [0], [1], [0, 0, 1, 1], [], []>} : vector<8x32xf32>, vector<32x32xf32>, vector<8x32xf32> -> vector<8x32xf32>
    %152 = arith.addf %151, %37 : vector<8x32xf32>
    %153 = arith.negf %152 : vector<8x32xf32>
    %154 = math.exp %153 : vector<8x32xf32>
    %cst_92 = arith.constant 1.000000e+00 : f32
    %155 = vector.broadcast %cst_92 : f32 to vector<8x32xf32>
    %156 = arith.addf %155, %154 : vector<8x32xf32>
    %157 = arith.divf %155, %156 : vector<8x32xf32>
    %cst_93 = arith.constant dense<0.000000e+00> : vector<8x32xf32>
    %158 = tpu.matmul %150, %13, %cst_93 {dimension_numbers = #tpu.dot_dimension_numbers<[1], [0], [0], [1], [0, 0, 1, 1], [], []>} : vector<8x32xf32>, vector<32x32xf32>, vector<8x32xf32> -> vector<8x32xf32>
    %159 = arith.addf %158, %42 : vector<8x32xf32>
    %160 = arith.negf %159 : vector<8x32xf32>
    %161 = math.exp %160 : vector<8x32xf32>
    %cst_94 = arith.constant 1.000000e+00 : f32
    %162 = vector.broadcast %cst_94 : f32 to vector<8x32xf32>
    %163 = arith.addf %162, %161 : vector<8x32xf32>
    %164 = arith.divf %162, %163 : vector<8x32xf32>
    %165 = arith.mulf %138, %164 : vector<8x32xf32>
    %cst_95 = arith.constant dense<0.000000e+00> : vector<8x32xf32>
    %166 = tpu.matmul %165, %9, %cst_95 {dimension_numbers = #tpu.dot_dimension_numbers<[1], [0], [0], [1], [0, 0, 1, 1], [], []>} : vector<8x32xf32>, vector<32x32xf32>, vector<8x32xf32> -> vector<8x32xf32>
    %167 = arith.index_cast %c1_i32 : i32 to index
    %c0_96 = arith.constant 0 : index
    %c0_97 = arith.constant 0 : index
    %168 = vector.load %arg22[%167, %c0_96, %c0_97] : memref<8x8x32xf32, #tpu.memory_space<vmem>>, vector<1x8x32xf32>
    %169 = vector.shape_cast %168 : vector<1x8x32xf32> to vector<8x32xf32>
    %170 = arith.addf %166, %169 : vector<8x32xf32>
    %171 = math.tanh %170 : vector<8x32xf32>
    %cst_98 = arith.constant dense<0.000000e+00> : vector<8x32xf32>
    %172 = tpu.matmul %171, %15, %cst_98 {dimension_numbers = #tpu.dot_dimension_numbers<[1], [0], [0], [1], [0, 0, 1, 1], [], []>} : vector<8x32xf32>, vector<32x32xf32>, vector<8x32xf32> -> vector<8x32xf32>
    %173 = arith.addf %172, %47 : vector<8x32xf32>
    %174 = math.tanh %173 : vector<8x32xf32>
    %cst_99 = arith.constant 1.000000e+00 : f32
    %175 = vector.broadcast %cst_99 : f32 to vector<8x32xf32>
    %176 = arith.subf %175, %157 : vector<8x32xf32>
    %177 = arith.mulf %176, %174 : vector<8x32xf32>
    %178 = arith.mulf %157, %138 : vector<8x32xf32>
    %179 = arith.addf %177, %178 : vector<8x32xf32>
    %c2_i32 = arith.constant 2 : i32
    %180 = arith.index_cast %c2_i32 : i32 to index
    %181 = memref.load %arg1[%180] : memref<8xf32, #tpu.memory_space<smem>>
    %cst_100 = arith.constant dense<0.000000e+00> : vector<8x32xf32>
    %182 = tpu.matmul %179, %1, %cst_100 {dimension_numbers = #tpu.dot_dimension_numbers<[1], [0], [0], [1], [0, 0, 1, 1], [], []>} : vector<8x32xf32>, vector<32x32xf32>, vector<8x32xf32> -> vector<8x32xf32>
    %183 = arith.addf %182, %27 : vector<8x32xf32>
    %184 = math.tanh %183 : vector<8x32xf32>
    %cst_101 = arith.constant dense<0.000000e+00> : vector<8x32xf32>
    %185 = tpu.matmul %184, %3, %cst_101 {dimension_numbers = #tpu.dot_dimension_numbers<[1], [0], [0], [1], [0, 0, 1, 1], [], []>} : vector<8x32xf32>, vector<32x32xf32>, vector<8x32xf32> -> vector<8x32xf32>
    %186 = arith.addf %185, %32 : vector<8x32xf32>
    %187 = vector.broadcast %181 : f32 to vector<8x32xf32>
    %188 = arith.mulf %187, %186 : vector<8x32xf32>
    %189 = arith.addf %179, %188 : vector<8x32xf32>
    %cst_102 = arith.constant dense<0.000000e+00> : vector<8x32xf32>
    %190 = tpu.matmul %189, %5, %cst_102 {dimension_numbers = #tpu.dot_dimension_numbers<[1], [0], [0], [1], [0, 0, 1, 1], [], []>} : vector<8x32xf32>, vector<32x32xf32>, vector<8x32xf32> -> vector<8x32xf32>
    %191 = arith.index_cast %c2_i32 : i32 to index
    %c0_103 = arith.constant 0 : index
    %c0_104 = arith.constant 0 : index
    %192 = vector.load %arg20[%191, %c0_103, %c0_104] : memref<8x8x32xf32, #tpu.memory_space<vmem>>, vector<1x8x32xf32>
    %193 = vector.shape_cast %192 : vector<1x8x32xf32> to vector<8x32xf32>
    %194 = arith.addf %190, %193 : vector<8x32xf32>
    %195 = math.tanh %194 : vector<8x32xf32>
    %cst_105 = arith.constant dense<0.000000e+00> : vector<8x32xf32>
    %196 = tpu.matmul %189, %7, %cst_105 {dimension_numbers = #tpu.dot_dimension_numbers<[1], [0], [0], [1], [0, 0, 1, 1], [], []>} : vector<8x32xf32>, vector<32x32xf32>, vector<8x32xf32> -> vector<8x32xf32>
    %197 = arith.index_cast %c2_i32 : i32 to index
    %c0_106 = arith.constant 0 : index
    %c0_107 = arith.constant 0 : index
    %198 = vector.load %arg21[%197, %c0_106, %c0_107] : memref<8x8x32xf32, #tpu.memory_space<vmem>>, vector<1x8x32xf32>
    %199 = vector.shape_cast %198 : vector<1x8x32xf32> to vector<8x32xf32>
    %200 = arith.addf %196, %199 : vector<8x32xf32>
    %201 = math.tanh %200 : vector<8x32xf32>
    %cst_108 = arith.constant dense<0.000000e+00> : vector<8x32xf32>
    %202 = tpu.matmul %195, %11, %cst_108 {dimension_numbers = #tpu.dot_dimension_numbers<[1], [0], [0], [1], [0, 0, 1, 1], [], []>} : vector<8x32xf32>, vector<32x32xf32>, vector<8x32xf32> -> vector<8x32xf32>
    %203 = arith.addf %202, %37 : vector<8x32xf32>
    %204 = arith.negf %203 : vector<8x32xf32>
    %205 = math.exp %204 : vector<8x32xf32>
    %cst_109 = arith.constant 1.000000e+00 : f32
    %206 = vector.broadcast %cst_109 : f32 to vector<8x32xf32>
    %207 = arith.addf %206, %205 : vector<8x32xf32>
    %208 = arith.divf %206, %207 : vector<8x32xf32>
    %cst_110 = arith.constant dense<0.000000e+00> : vector<8x32xf32>
    %209 = tpu.matmul %201, %13, %cst_110 {dimension_numbers = #tpu.dot_dimension_numbers<[1], [0], [0], [1], [0, 0, 1, 1], [], []>} : vector<8x32xf32>, vector<32x32xf32>, vector<8x32xf32> -> vector<8x32xf32>
    %210 = arith.addf %209, %42 : vector<8x32xf32>
    %211 = arith.negf %210 : vector<8x32xf32>
    %212 = math.exp %211 : vector<8x32xf32>
    %cst_111 = arith.constant 1.000000e+00 : f32
    %213 = vector.broadcast %cst_111 : f32 to vector<8x32xf32>
    %214 = arith.addf %213, %212 : vector<8x32xf32>
    %215 = arith.divf %213, %214 : vector<8x32xf32>
    %216 = arith.mulf %189, %215 : vector<8x32xf32>
    %cst_112 = arith.constant dense<0.000000e+00> : vector<8x32xf32>
    %217 = tpu.matmul %216, %9, %cst_112 {dimension_numbers = #tpu.dot_dimension_numbers<[1], [0], [0], [1], [0, 0, 1, 1], [], []>} : vector<8x32xf32>, vector<32x32xf32>, vector<8x32xf32> -> vector<8x32xf32>
    %218 = arith.index_cast %c2_i32 : i32 to index
    %c0_113 = arith.constant 0 : index
    %c0_114 = arith.constant 0 : index
    %219 = vector.load %arg22[%218, %c0_113, %c0_114] : memref<8x8x32xf32, #tpu.memory_space<vmem>>, vector<1x8x32xf32>
    %220 = vector.shape_cast %219 : vector<1x8x32xf32> to vector<8x32xf32>
    %221 = arith.addf %217, %220 : vector<8x32xf32>
    %222 = math.tanh %221 : vector<8x32xf32>
    %cst_115 = arith.constant dense<0.000000e+00> : vector<8x32xf32>
    %223 = tpu.matmul %222, %15, %cst_115 {dimension_numbers = #tpu.dot_dimension_numbers<[1], [0], [0], [1], [0, 0, 1, 1], [], []>} : vector<8x32xf32>, vector<32x32xf32>, vector<8x32xf32> -> vector<8x32xf32>
    %224 = arith.addf %223, %47 : vector<8x32xf32>
    %225 = math.tanh %224 : vector<8x32xf32>
    %cst_116 = arith.constant 1.000000e+00 : f32
    %226 = vector.broadcast %cst_116 : f32 to vector<8x32xf32>
    %227 = arith.subf %226, %208 : vector<8x32xf32>
    %228 = arith.mulf %227, %225 : vector<8x32xf32>
    %229 = arith.mulf %208, %189 : vector<8x32xf32>
    %230 = arith.addf %228, %229 : vector<8x32xf32>
    %c3_i32 = arith.constant 3 : i32
    %231 = arith.index_cast %c3_i32 : i32 to index
    %232 = memref.load %arg1[%231] : memref<8xf32, #tpu.memory_space<smem>>
    %cst_117 = arith.constant dense<0.000000e+00> : vector<8x32xf32>
    %233 = tpu.matmul %230, %1, %cst_117 {dimension_numbers = #tpu.dot_dimension_numbers<[1], [0], [0], [1], [0, 0, 1, 1], [], []>} : vector<8x32xf32>, vector<32x32xf32>, vector<8x32xf32> -> vector<8x32xf32>
    %234 = arith.addf %233, %27 : vector<8x32xf32>
    %235 = math.tanh %234 : vector<8x32xf32>
    %cst_118 = arith.constant dense<0.000000e+00> : vector<8x32xf32>
    %236 = tpu.matmul %235, %3, %cst_118 {dimension_numbers = #tpu.dot_dimension_numbers<[1], [0], [0], [1], [0, 0, 1, 1], [], []>} : vector<8x32xf32>, vector<32x32xf32>, vector<8x32xf32> -> vector<8x32xf32>
    %237 = arith.addf %236, %32 : vector<8x32xf32>
    %238 = vector.broadcast %232 : f32 to vector<8x32xf32>
    %239 = arith.mulf %238, %237 : vector<8x32xf32>
    %240 = arith.addf %230, %239 : vector<8x32xf32>
    %cst_119 = arith.constant dense<0.000000e+00> : vector<8x32xf32>
    %241 = tpu.matmul %240, %5, %cst_119 {dimension_numbers = #tpu.dot_dimension_numbers<[1], [0], [0], [1], [0, 0, 1, 1], [], []>} : vector<8x32xf32>, vector<32x32xf32>, vector<8x32xf32> -> vector<8x32xf32>
    %242 = arith.index_cast %c3_i32 : i32 to index
    %c0_120 = arith.constant 0 : index
    %c0_121 = arith.constant 0 : index
    %243 = vector.load %arg20[%242, %c0_120, %c0_121] : memref<8x8x32xf32, #tpu.memory_space<vmem>>, vector<1x8x32xf32>
    %244 = vector.shape_cast %243 : vector<1x8x32xf32> to vector<8x32xf32>
    %245 = arith.addf %241, %244 : vector<8x32xf32>
    %246 = math.tanh %245 : vector<8x32xf32>
    %cst_122 = arith.constant dense<0.000000e+00> : vector<8x32xf32>
    %247 = tpu.matmul %240, %7, %cst_122 {dimension_numbers = #tpu.dot_dimension_numbers<[1], [0], [0], [1], [0, 0, 1, 1], [], []>} : vector<8x32xf32>, vector<32x32xf32>, vector<8x32xf32> -> vector<8x32xf32>
    %248 = arith.index_cast %c3_i32 : i32 to index
    %c0_123 = arith.constant 0 : index
    %c0_124 = arith.constant 0 : index
    %249 = vector.load %arg21[%248, %c0_123, %c0_124] : memref<8x8x32xf32, #tpu.memory_space<vmem>>, vector<1x8x32xf32>
    %250 = vector.shape_cast %249 : vector<1x8x32xf32> to vector<8x32xf32>
    %251 = arith.addf %247, %250 : vector<8x32xf32>
    %252 = math.tanh %251 : vector<8x32xf32>
    %cst_125 = arith.constant dense<0.000000e+00> : vector<8x32xf32>
    %253 = tpu.matmul %246, %11, %cst_125 {dimension_numbers = #tpu.dot_dimension_numbers<[1], [0], [0], [1], [0, 0, 1, 1], [], []>} : vector<8x32xf32>, vector<32x32xf32>, vector<8x32xf32> -> vector<8x32xf32>
    %254 = arith.addf %253, %37 : vector<8x32xf32>
    %255 = arith.negf %254 : vector<8x32xf32>
    %256 = math.exp %255 : vector<8x32xf32>
    %cst_126 = arith.constant 1.000000e+00 : f32
    %257 = vector.broadcast %cst_126 : f32 to vector<8x32xf32>
    %258 = arith.addf %257, %256 : vector<8x32xf32>
    %259 = arith.divf %257, %258 : vector<8x32xf32>
    %cst_127 = arith.constant dense<0.000000e+00> : vector<8x32xf32>
    %260 = tpu.matmul %252, %13, %cst_127 {dimension_numbers = #tpu.dot_dimension_numbers<[1], [0], [0], [1], [0, 0, 1, 1], [], []>} : vector<8x32xf32>, vector<32x32xf32>, vector<8x32xf32> -> vector<8x32xf32>
    %261 = arith.addf %260, %42 : vector<8x32xf32>
    %262 = arith.negf %261 : vector<8x32xf32>
    %263 = math.exp %262 : vector<8x32xf32>
    %cst_128 = arith.constant 1.000000e+00 : f32
    %264 = vector.broadcast %cst_128 : f32 to vector<8x32xf32>
    %265 = arith.addf %264, %263 : vector<8x32xf32>
    %266 = arith.divf %264, %265 : vector<8x32xf32>
    %267 = arith.mulf %240, %266 : vector<8x32xf32>
    %cst_129 = arith.constant dense<0.000000e+00> : vector<8x32xf32>
    %268 = tpu.matmul %267, %9, %cst_129 {dimension_numbers = #tpu.dot_dimension_numbers<[1], [0], [0], [1], [0, 0, 1, 1], [], []>} : vector<8x32xf32>, vector<32x32xf32>, vector<8x32xf32> -> vector<8x32xf32>
    %269 = arith.index_cast %c3_i32 : i32 to index
    %c0_130 = arith.constant 0 : index
    %c0_131 = arith.constant 0 : index
    %270 = vector.load %arg22[%269, %c0_130, %c0_131] : memref<8x8x32xf32, #tpu.memory_space<vmem>>, vector<1x8x32xf32>
    %271 = vector.shape_cast %270 : vector<1x8x32xf32> to vector<8x32xf32>
    %272 = arith.addf %268, %271 : vector<8x32xf32>
    %273 = math.tanh %272 : vector<8x32xf32>
    %cst_132 = arith.constant dense<0.000000e+00> : vector<8x32xf32>
    %274 = tpu.matmul %273, %15, %cst_132 {dimension_numbers = #tpu.dot_dimension_numbers<[1], [0], [0], [1], [0, 0, 1, 1], [], []>} : vector<8x32xf32>, vector<32x32xf32>, vector<8x32xf32> -> vector<8x32xf32>
    %275 = arith.addf %274, %47 : vector<8x32xf32>
    %276 = math.tanh %275 : vector<8x32xf32>
    %cst_133 = arith.constant 1.000000e+00 : f32
    %277 = vector.broadcast %cst_133 : f32 to vector<8x32xf32>
    %278 = arith.subf %277, %259 : vector<8x32xf32>
    %279 = arith.mulf %278, %276 : vector<8x32xf32>
    %280 = arith.mulf %259, %240 : vector<8x32xf32>
    %281 = arith.addf %279, %280 : vector<8x32xf32>
    %c4_i32 = arith.constant 4 : i32
    %282 = arith.index_cast %c4_i32 : i32 to index
    %283 = memref.load %arg1[%282] : memref<8xf32, #tpu.memory_space<smem>>
    %cst_134 = arith.constant dense<0.000000e+00> : vector<8x32xf32>
    %284 = tpu.matmul %281, %1, %cst_134 {dimension_numbers = #tpu.dot_dimension_numbers<[1], [0], [0], [1], [0, 0, 1, 1], [], []>} : vector<8x32xf32>, vector<32x32xf32>, vector<8x32xf32> -> vector<8x32xf32>
    %285 = arith.addf %284, %27 : vector<8x32xf32>
    %286 = math.tanh %285 : vector<8x32xf32>
    %cst_135 = arith.constant dense<0.000000e+00> : vector<8x32xf32>
    %287 = tpu.matmul %286, %3, %cst_135 {dimension_numbers = #tpu.dot_dimension_numbers<[1], [0], [0], [1], [0, 0, 1, 1], [], []>} : vector<8x32xf32>, vector<32x32xf32>, vector<8x32xf32> -> vector<8x32xf32>
    %288 = arith.addf %287, %32 : vector<8x32xf32>
    %289 = vector.broadcast %283 : f32 to vector<8x32xf32>
    %290 = arith.mulf %289, %288 : vector<8x32xf32>
    %291 = arith.addf %281, %290 : vector<8x32xf32>
    %cst_136 = arith.constant dense<0.000000e+00> : vector<8x32xf32>
    %292 = tpu.matmul %291, %5, %cst_136 {dimension_numbers = #tpu.dot_dimension_numbers<[1], [0], [0], [1], [0, 0, 1, 1], [], []>} : vector<8x32xf32>, vector<32x32xf32>, vector<8x32xf32> -> vector<8x32xf32>
    %293 = arith.index_cast %c4_i32 : i32 to index
    %c0_137 = arith.constant 0 : index
    %c0_138 = arith.constant 0 : index
    %294 = vector.load %arg20[%293, %c0_137, %c0_138] : memref<8x8x32xf32, #tpu.memory_space<vmem>>, vector<1x8x32xf32>
    %295 = vector.shape_cast %294 : vector<1x8x32xf32> to vector<8x32xf32>
    %296 = arith.addf %292, %295 : vector<8x32xf32>
    %297 = math.tanh %296 : vector<8x32xf32>
    %cst_139 = arith.constant dense<0.000000e+00> : vector<8x32xf32>
    %298 = tpu.matmul %291, %7, %cst_139 {dimension_numbers = #tpu.dot_dimension_numbers<[1], [0], [0], [1], [0, 0, 1, 1], [], []>} : vector<8x32xf32>, vector<32x32xf32>, vector<8x32xf32> -> vector<8x32xf32>
    %299 = arith.index_cast %c4_i32 : i32 to index
    %c0_140 = arith.constant 0 : index
    %c0_141 = arith.constant 0 : index
    %300 = vector.load %arg21[%299, %c0_140, %c0_141] : memref<8x8x32xf32, #tpu.memory_space<vmem>>, vector<1x8x32xf32>
    %301 = vector.shape_cast %300 : vector<1x8x32xf32> to vector<8x32xf32>
    %302 = arith.addf %298, %301 : vector<8x32xf32>
    %303 = math.tanh %302 : vector<8x32xf32>
    %cst_142 = arith.constant dense<0.000000e+00> : vector<8x32xf32>
    %304 = tpu.matmul %297, %11, %cst_142 {dimension_numbers = #tpu.dot_dimension_numbers<[1], [0], [0], [1], [0, 0, 1, 1], [], []>} : vector<8x32xf32>, vector<32x32xf32>, vector<8x32xf32> -> vector<8x32xf32>
    %305 = arith.addf %304, %37 : vector<8x32xf32>
    %306 = arith.negf %305 : vector<8x32xf32>
    %307 = math.exp %306 : vector<8x32xf32>
    %cst_143 = arith.constant 1.000000e+00 : f32
    %308 = vector.broadcast %cst_143 : f32 to vector<8x32xf32>
    %309 = arith.addf %308, %307 : vector<8x32xf32>
    %310 = arith.divf %308, %309 : vector<8x32xf32>
    %cst_144 = arith.constant dense<0.000000e+00> : vector<8x32xf32>
    %311 = tpu.matmul %303, %13, %cst_144 {dimension_numbers = #tpu.dot_dimension_numbers<[1], [0], [0], [1], [0, 0, 1, 1], [], []>} : vector<8x32xf32>, vector<32x32xf32>, vector<8x32xf32> -> vector<8x32xf32>
    %312 = arith.addf %311, %42 : vector<8x32xf32>
    %313 = arith.negf %312 : vector<8x32xf32>
    %314 = math.exp %313 : vector<8x32xf32>
    %cst_145 = arith.constant 1.000000e+00 : f32
    %315 = vector.broadcast %cst_145 : f32 to vector<8x32xf32>
    %316 = arith.addf %315, %314 : vector<8x32xf32>
    %317 = arith.divf %315, %316 : vector<8x32xf32>
    %318 = arith.mulf %291, %317 : vector<8x32xf32>
    %cst_146 = arith.constant dense<0.000000e+00> : vector<8x32xf32>
    %319 = tpu.matmul %318, %9, %cst_146 {dimension_numbers = #tpu.dot_dimension_numbers<[1], [0], [0], [1], [0, 0, 1, 1], [], []>} : vector<8x32xf32>, vector<32x32xf32>, vector<8x32xf32> -> vector<8x32xf32>
    %320 = arith.index_cast %c4_i32 : i32 to index
    %c0_147 = arith.constant 0 : index
    %c0_148 = arith.constant 0 : index
    %321 = vector.load %arg22[%320, %c0_147, %c0_148] : memref<8x8x32xf32, #tpu.memory_space<vmem>>, vector<1x8x32xf32>
    %322 = vector.shape_cast %321 : vector<1x8x32xf32> to vector<8x32xf32>
    %323 = arith.addf %319, %322 : vector<8x32xf32>
    %324 = math.tanh %323 : vector<8x32xf32>
    %cst_149 = arith.constant dense<0.000000e+00> : vector<8x32xf32>
    %325 = tpu.matmul %324, %15, %cst_149 {dimension_numbers = #tpu.dot_dimension_numbers<[1], [0], [0], [1], [0, 0, 1, 1], [], []>} : vector<8x32xf32>, vector<32x32xf32>, vector<8x32xf32> -> vector<8x32xf32>
    %326 = arith.addf %325, %47 : vector<8x32xf32>
    %327 = math.tanh %326 : vector<8x32xf32>
    %cst_150 = arith.constant 1.000000e+00 : f32
    %328 = vector.broadcast %cst_150 : f32 to vector<8x32xf32>
    %329 = arith.subf %328, %310 : vector<8x32xf32>
    %330 = arith.mulf %329, %327 : vector<8x32xf32>
    %331 = arith.mulf %310, %291 : vector<8x32xf32>
    %332 = arith.addf %330, %331 : vector<8x32xf32>
    %c5_i32 = arith.constant 5 : i32
    %333 = arith.index_cast %c5_i32 : i32 to index
    %334 = memref.load %arg1[%333] : memref<8xf32, #tpu.memory_space<smem>>
    %cst_151 = arith.constant dense<0.000000e+00> : vector<8x32xf32>
    %335 = tpu.matmul %332, %1, %cst_151 {dimension_numbers = #tpu.dot_dimension_numbers<[1], [0], [0], [1], [0, 0, 1, 1], [], []>} : vector<8x32xf32>, vector<32x32xf32>, vector<8x32xf32> -> vector<8x32xf32>
    %336 = arith.addf %335, %27 : vector<8x32xf32>
    %337 = math.tanh %336 : vector<8x32xf32>
    %cst_152 = arith.constant dense<0.000000e+00> : vector<8x32xf32>
    %338 = tpu.matmul %337, %3, %cst_152 {dimension_numbers = #tpu.dot_dimension_numbers<[1], [0], [0], [1], [0, 0, 1, 1], [], []>} : vector<8x32xf32>, vector<32x32xf32>, vector<8x32xf32> -> vector<8x32xf32>
    %339 = arith.addf %338, %32 : vector<8x32xf32>
    %340 = vector.broadcast %334 : f32 to vector<8x32xf32>
    %341 = arith.mulf %340, %339 : vector<8x32xf32>
    %342 = arith.addf %332, %341 : vector<8x32xf32>
    %cst_153 = arith.constant dense<0.000000e+00> : vector<8x32xf32>
    %343 = tpu.matmul %342, %5, %cst_153 {dimension_numbers = #tpu.dot_dimension_numbers<[1], [0], [0], [1], [0, 0, 1, 1], [], []>} : vector<8x32xf32>, vector<32x32xf32>, vector<8x32xf32> -> vector<8x32xf32>
    %344 = arith.index_cast %c5_i32 : i32 to index
    %c0_154 = arith.constant 0 : index
    %c0_155 = arith.constant 0 : index
    %345 = vector.load %arg20[%344, %c0_154, %c0_155] : memref<8x8x32xf32, #tpu.memory_space<vmem>>, vector<1x8x32xf32>
    %346 = vector.shape_cast %345 : vector<1x8x32xf32> to vector<8x32xf32>
    %347 = arith.addf %343, %346 : vector<8x32xf32>
    %348 = math.tanh %347 : vector<8x32xf32>
    %cst_156 = arith.constant dense<0.000000e+00> : vector<8x32xf32>
    %349 = tpu.matmul %342, %7, %cst_156 {dimension_numbers = #tpu.dot_dimension_numbers<[1], [0], [0], [1], [0, 0, 1, 1], [], []>} : vector<8x32xf32>, vector<32x32xf32>, vector<8x32xf32> -> vector<8x32xf32>
    %350 = arith.index_cast %c5_i32 : i32 to index
    %c0_157 = arith.constant 0 : index
    %c0_158 = arith.constant 0 : index
    %351 = vector.load %arg21[%350, %c0_157, %c0_158] : memref<8x8x32xf32, #tpu.memory_space<vmem>>, vector<1x8x32xf32>
    %352 = vector.shape_cast %351 : vector<1x8x32xf32> to vector<8x32xf32>
    %353 = arith.addf %349, %352 : vector<8x32xf32>
    %354 = math.tanh %353 : vector<8x32xf32>
    %cst_159 = arith.constant dense<0.000000e+00> : vector<8x32xf32>
    %355 = tpu.matmul %348, %11, %cst_159 {dimension_numbers = #tpu.dot_dimension_numbers<[1], [0], [0], [1], [0, 0, 1, 1], [], []>} : vector<8x32xf32>, vector<32x32xf32>, vector<8x32xf32> -> vector<8x32xf32>
    %356 = arith.addf %355, %37 : vector<8x32xf32>
    %357 = arith.negf %356 : vector<8x32xf32>
    %358 = math.exp %357 : vector<8x32xf32>
    %cst_160 = arith.constant 1.000000e+00 : f32
    %359 = vector.broadcast %cst_160 : f32 to vector<8x32xf32>
    %360 = arith.addf %359, %358 : vector<8x32xf32>
    %361 = arith.divf %359, %360 : vector<8x32xf32>
    %cst_161 = arith.constant dense<0.000000e+00> : vector<8x32xf32>
    %362 = tpu.matmul %354, %13, %cst_161 {dimension_numbers = #tpu.dot_dimension_numbers<[1], [0], [0], [1], [0, 0, 1, 1], [], []>} : vector<8x32xf32>, vector<32x32xf32>, vector<8x32xf32> -> vector<8x32xf32>
    %363 = arith.addf %362, %42 : vector<8x32xf32>
    %364 = arith.negf %363 : vector<8x32xf32>
    %365 = math.exp %364 : vector<8x32xf32>
    %cst_162 = arith.constant 1.000000e+00 : f32
    %366 = vector.broadcast %cst_162 : f32 to vector<8x32xf32>
    %367 = arith.addf %366, %365 : vector<8x32xf32>
    %368 = arith.divf %366, %367 : vector<8x32xf32>
    %369 = arith.mulf %342, %368 : vector<8x32xf32>
    %cst_163 = arith.constant dense<0.000000e+00> : vector<8x32xf32>
    %370 = tpu.matmul %369, %9, %cst_163 {dimension_numbers = #tpu.dot_dimension_numbers<[1], [0], [0], [1], [0, 0, 1, 1], [], []>} : vector<8x32xf32>, vector<32x32xf32>, vector<8x32xf32> -> vector<8x32xf32>
    %371 = arith.index_cast %c5_i32 : i32 to index
    %c0_164 = arith.constant 0 : index
    %c0_165 = arith.constant 0 : index
    %372 = vector.load %arg22[%371, %c0_164, %c0_165] : memref<8x8x32xf32, #tpu.memory_space<vmem>>, vector<1x8x32xf32>
    %373 = vector.shape_cast %372 : vector<1x8x32xf32> to vector<8x32xf32>
    %374 = arith.addf %370, %373 : vector<8x32xf32>
    %375 = math.tanh %374 : vector<8x32xf32>
    %cst_166 = arith.constant dense<0.000000e+00> : vector<8x32xf32>
    %376 = tpu.matmul %375, %15, %cst_166 {dimension_numbers = #tpu.dot_dimension_numbers<[1], [0], [0], [1], [0, 0, 1, 1], [], []>} : vector<8x32xf32>, vector<32x32xf32>, vector<8x32xf32> -> vector<8x32xf32>
    %377 = arith.addf %376, %47 : vector<8x32xf32>
    %378 = math.tanh %377 : vector<8x32xf32>
    %cst_167 = arith.constant 1.000000e+00 : f32
    %379 = vector.broadcast %cst_167 : f32 to vector<8x32xf32>
    %380 = arith.subf %379, %361 : vector<8x32xf32>
    %381 = arith.mulf %380, %378 : vector<8x32xf32>
    %382 = arith.mulf %361, %342 : vector<8x32xf32>
    %383 = arith.addf %381, %382 : vector<8x32xf32>
    %c6_i32 = arith.constant 6 : i32
    %384 = arith.index_cast %c6_i32 : i32 to index
    %385 = memref.load %arg1[%384] : memref<8xf32, #tpu.memory_space<smem>>
    %cst_168 = arith.constant dense<0.000000e+00> : vector<8x32xf32>
    %386 = tpu.matmul %383, %1, %cst_168 {dimension_numbers = #tpu.dot_dimension_numbers<[1], [0], [0], [1], [0, 0, 1, 1], [], []>} : vector<8x32xf32>, vector<32x32xf32>, vector<8x32xf32> -> vector<8x32xf32>
    %387 = arith.addf %386, %27 : vector<8x32xf32>
    %388 = math.tanh %387 : vector<8x32xf32>
    %cst_169 = arith.constant dense<0.000000e+00> : vector<8x32xf32>
    %389 = tpu.matmul %388, %3, %cst_169 {dimension_numbers = #tpu.dot_dimension_numbers<[1], [0], [0], [1], [0, 0, 1, 1], [], []>} : vector<8x32xf32>, vector<32x32xf32>, vector<8x32xf32> -> vector<8x32xf32>
    %390 = arith.addf %389, %32 : vector<8x32xf32>
    %391 = vector.broadcast %385 : f32 to vector<8x32xf32>
    %392 = arith.mulf %391, %390 : vector<8x32xf32>
    %393 = arith.addf %383, %392 : vector<8x32xf32>
    %cst_170 = arith.constant dense<0.000000e+00> : vector<8x32xf32>
    %394 = tpu.matmul %393, %5, %cst_170 {dimension_numbers = #tpu.dot_dimension_numbers<[1], [0], [0], [1], [0, 0, 1, 1], [], []>} : vector<8x32xf32>, vector<32x32xf32>, vector<8x32xf32> -> vector<8x32xf32>
    %395 = arith.index_cast %c6_i32 : i32 to index
    %c0_171 = arith.constant 0 : index
    %c0_172 = arith.constant 0 : index
    %396 = vector.load %arg20[%395, %c0_171, %c0_172] : memref<8x8x32xf32, #tpu.memory_space<vmem>>, vector<1x8x32xf32>
    %397 = vector.shape_cast %396 : vector<1x8x32xf32> to vector<8x32xf32>
    %398 = arith.addf %394, %397 : vector<8x32xf32>
    %399 = math.tanh %398 : vector<8x32xf32>
    %cst_173 = arith.constant dense<0.000000e+00> : vector<8x32xf32>
    %400 = tpu.matmul %393, %7, %cst_173 {dimension_numbers = #tpu.dot_dimension_numbers<[1], [0], [0], [1], [0, 0, 1, 1], [], []>} : vector<8x32xf32>, vector<32x32xf32>, vector<8x32xf32> -> vector<8x32xf32>
    %401 = arith.index_cast %c6_i32 : i32 to index
    %c0_174 = arith.constant 0 : index
    %c0_175 = arith.constant 0 : index
    %402 = vector.load %arg21[%401, %c0_174, %c0_175] : memref<8x8x32xf32, #tpu.memory_space<vmem>>, vector<1x8x32xf32>
    %403 = vector.shape_cast %402 : vector<1x8x32xf32> to vector<8x32xf32>
    %404 = arith.addf %400, %403 : vector<8x32xf32>
    %405 = math.tanh %404 : vector<8x32xf32>
    %cst_176 = arith.constant dense<0.000000e+00> : vector<8x32xf32>
    %406 = tpu.matmul %399, %11, %cst_176 {dimension_numbers = #tpu.dot_dimension_numbers<[1], [0], [0], [1], [0, 0, 1, 1], [], []>} : vector<8x32xf32>, vector<32x32xf32>, vector<8x32xf32> -> vector<8x32xf32>
    %407 = arith.addf %406, %37 : vector<8x32xf32>
    %408 = arith.negf %407 : vector<8x32xf32>
    %409 = math.exp %408 : vector<8x32xf32>
    %cst_177 = arith.constant 1.000000e+00 : f32
    %410 = vector.broadcast %cst_177 : f32 to vector<8x32xf32>
    %411 = arith.addf %410, %409 : vector<8x32xf32>
    %412 = arith.divf %410, %411 : vector<8x32xf32>
    %cst_178 = arith.constant dense<0.000000e+00> : vector<8x32xf32>
    %413 = tpu.matmul %405, %13, %cst_178 {dimension_numbers = #tpu.dot_dimension_numbers<[1], [0], [0], [1], [0, 0, 1, 1], [], []>} : vector<8x32xf32>, vector<32x32xf32>, vector<8x32xf32> -> vector<8x32xf32>
    %414 = arith.addf %413, %42 : vector<8x32xf32>
    %415 = arith.negf %414 : vector<8x32xf32>
    %416 = math.exp %415 : vector<8x32xf32>
    %cst_179 = arith.constant 1.000000e+00 : f32
    %417 = vector.broadcast %cst_179 : f32 to vector<8x32xf32>
    %418 = arith.addf %417, %416 : vector<8x32xf32>
    %419 = arith.divf %417, %418 : vector<8x32xf32>
    %420 = arith.mulf %393, %419 : vector<8x32xf32>
    %cst_180 = arith.constant dense<0.000000e+00> : vector<8x32xf32>
    %421 = tpu.matmul %420, %9, %cst_180 {dimension_numbers = #tpu.dot_dimension_numbers<[1], [0], [0], [1], [0, 0, 1, 1], [], []>} : vector<8x32xf32>, vector<32x32xf32>, vector<8x32xf32> -> vector<8x32xf32>
    %422 = arith.index_cast %c6_i32 : i32 to index
    %c0_181 = arith.constant 0 : index
    %c0_182 = arith.constant 0 : index
    %423 = vector.load %arg22[%422, %c0_181, %c0_182] : memref<8x8x32xf32, #tpu.memory_space<vmem>>, vector<1x8x32xf32>
    %424 = vector.shape_cast %423 : vector<1x8x32xf32> to vector<8x32xf32>
    %425 = arith.addf %421, %424 : vector<8x32xf32>
    %426 = math.tanh %425 : vector<8x32xf32>
    %cst_183 = arith.constant dense<0.000000e+00> : vector<8x32xf32>
    %427 = tpu.matmul %426, %15, %cst_183 {dimension_numbers = #tpu.dot_dimension_numbers<[1], [0], [0], [1], [0, 0, 1, 1], [], []>} : vector<8x32xf32>, vector<32x32xf32>, vector<8x32xf32> -> vector<8x32xf32>
    %428 = arith.addf %427, %47 : vector<8x32xf32>
    %429 = math.tanh %428 : vector<8x32xf32>
    %cst_184 = arith.constant 1.000000e+00 : f32
    %430 = vector.broadcast %cst_184 : f32 to vector<8x32xf32>
    %431 = arith.subf %430, %412 : vector<8x32xf32>
    %432 = arith.mulf %431, %429 : vector<8x32xf32>
    %433 = arith.mulf %412, %393 : vector<8x32xf32>
    %434 = arith.addf %432, %433 : vector<8x32xf32>
    %c7_i32 = arith.constant 7 : i32
    %435 = arith.index_cast %c7_i32 : i32 to index
    %436 = memref.load %arg1[%435] : memref<8xf32, #tpu.memory_space<smem>>
    %cst_185 = arith.constant dense<0.000000e+00> : vector<8x32xf32>
    %437 = tpu.matmul %434, %1, %cst_185 {dimension_numbers = #tpu.dot_dimension_numbers<[1], [0], [0], [1], [0, 0, 1, 1], [], []>} : vector<8x32xf32>, vector<32x32xf32>, vector<8x32xf32> -> vector<8x32xf32>
    %438 = arith.addf %437, %27 : vector<8x32xf32>
    %439 = math.tanh %438 : vector<8x32xf32>
    %cst_186 = arith.constant dense<0.000000e+00> : vector<8x32xf32>
    %440 = tpu.matmul %439, %3, %cst_186 {dimension_numbers = #tpu.dot_dimension_numbers<[1], [0], [0], [1], [0, 0, 1, 1], [], []>} : vector<8x32xf32>, vector<32x32xf32>, vector<8x32xf32> -> vector<8x32xf32>
    %441 = arith.addf %440, %32 : vector<8x32xf32>
    %442 = vector.broadcast %436 : f32 to vector<8x32xf32>
    %443 = arith.mulf %442, %441 : vector<8x32xf32>
    %444 = arith.addf %434, %443 : vector<8x32xf32>
    %cst_187 = arith.constant dense<0.000000e+00> : vector<8x32xf32>
    %445 = tpu.matmul %444, %5, %cst_187 {dimension_numbers = #tpu.dot_dimension_numbers<[1], [0], [0], [1], [0, 0, 1, 1], [], []>} : vector<8x32xf32>, vector<32x32xf32>, vector<8x32xf32> -> vector<8x32xf32>
    %446 = arith.index_cast %c7_i32 : i32 to index
    %c0_188 = arith.constant 0 : index
    %c0_189 = arith.constant 0 : index
    %447 = vector.load %arg20[%446, %c0_188, %c0_189] : memref<8x8x32xf32, #tpu.memory_space<vmem>>, vector<1x8x32xf32>
    %448 = vector.shape_cast %447 : vector<1x8x32xf32> to vector<8x32xf32>
    %449 = arith.addf %445, %448 : vector<8x32xf32>
    %450 = math.tanh %449 : vector<8x32xf32>
    %cst_190 = arith.constant dense<0.000000e+00> : vector<8x32xf32>
    %451 = tpu.matmul %444, %7, %cst_190 {dimension_numbers = #tpu.dot_dimension_numbers<[1], [0], [0], [1], [0, 0, 1, 1], [], []>} : vector<8x32xf32>, vector<32x32xf32>, vector<8x32xf32> -> vector<8x32xf32>
    %452 = arith.index_cast %c7_i32 : i32 to index
    %c0_191 = arith.constant 0 : index
    %c0_192 = arith.constant 0 : index
    %453 = vector.load %arg21[%452, %c0_191, %c0_192] : memref<8x8x32xf32, #tpu.memory_space<vmem>>, vector<1x8x32xf32>
    %454 = vector.shape_cast %453 : vector<1x8x32xf32> to vector<8x32xf32>
    %455 = arith.addf %451, %454 : vector<8x32xf32>
    %456 = math.tanh %455 : vector<8x32xf32>
    %cst_193 = arith.constant dense<0.000000e+00> : vector<8x32xf32>
    %457 = tpu.matmul %450, %11, %cst_193 {dimension_numbers = #tpu.dot_dimension_numbers<[1], [0], [0], [1], [0, 0, 1, 1], [], []>} : vector<8x32xf32>, vector<32x32xf32>, vector<8x32xf32> -> vector<8x32xf32>
    %458 = arith.addf %457, %37 : vector<8x32xf32>
    %459 = arith.negf %458 : vector<8x32xf32>
    %460 = math.exp %459 : vector<8x32xf32>
    %cst_194 = arith.constant 1.000000e+00 : f32
    %461 = vector.broadcast %cst_194 : f32 to vector<8x32xf32>
    %462 = arith.addf %461, %460 : vector<8x32xf32>
    %463 = arith.divf %461, %462 : vector<8x32xf32>
    %cst_195 = arith.constant dense<0.000000e+00> : vector<8x32xf32>
    %464 = tpu.matmul %456, %13, %cst_195 {dimension_numbers = #tpu.dot_dimension_numbers<[1], [0], [0], [1], [0, 0, 1, 1], [], []>} : vector<8x32xf32>, vector<32x32xf32>, vector<8x32xf32> -> vector<8x32xf32>
    %465 = arith.addf %464, %42 : vector<8x32xf32>
    %466 = arith.negf %465 : vector<8x32xf32>
    %467 = math.exp %466 : vector<8x32xf32>
    %cst_196 = arith.constant 1.000000e+00 : f32
    %468 = vector.broadcast %cst_196 : f32 to vector<8x32xf32>
    %469 = arith.addf %468, %467 : vector<8x32xf32>
    %470 = arith.divf %468, %469 : vector<8x32xf32>
    %471 = arith.mulf %444, %470 : vector<8x32xf32>
    %cst_197 = arith.constant dense<0.000000e+00> : vector<8x32xf32>
    %472 = tpu.matmul %471, %9, %cst_197 {dimension_numbers = #tpu.dot_dimension_numbers<[1], [0], [0], [1], [0, 0, 1, 1], [], []>} : vector<8x32xf32>, vector<32x32xf32>, vector<8x32xf32> -> vector<8x32xf32>
    %473 = arith.index_cast %c7_i32 : i32 to index
    %c0_198 = arith.constant 0 : index
    %c0_199 = arith.constant 0 : index
    %474 = vector.load %arg22[%473, %c0_198, %c0_199] : memref<8x8x32xf32, #tpu.memory_space<vmem>>, vector<1x8x32xf32>
    %475 = vector.shape_cast %474 : vector<1x8x32xf32> to vector<8x32xf32>
    %476 = arith.addf %472, %475 : vector<8x32xf32>
    %477 = math.tanh %476 : vector<8x32xf32>
    %cst_200 = arith.constant dense<0.000000e+00> : vector<8x32xf32>
    %478 = tpu.matmul %477, %15, %cst_200 {dimension_numbers = #tpu.dot_dimension_numbers<[1], [0], [0], [1], [0, 0, 1, 1], [], []>} : vector<8x32xf32>, vector<32x32xf32>, vector<8x32xf32> -> vector<8x32xf32>
    %479 = arith.addf %478, %47 : vector<8x32xf32>
    %480 = math.tanh %479 : vector<8x32xf32>
    %cst_201 = arith.constant 1.000000e+00 : f32
    %481 = vector.broadcast %cst_201 : f32 to vector<8x32xf32>
    %482 = arith.subf %481, %463 : vector<8x32xf32>
    %483 = arith.mulf %482, %480 : vector<8x32xf32>
    %484 = arith.mulf %463, %444 : vector<8x32xf32>
    %485 = arith.addf %483, %484 : vector<8x32xf32>
    %c8_i32 = arith.constant 8 : i32
    %cst_202 = arith.constant dense<0.000000e+00> : vector<8x32xf32>
    %486 = tpu.matmul %485, %16, %cst_202 {dimension_numbers = #tpu.dot_dimension_numbers<[1], [0], [0], [1], [0, 0, 1, 1], [], []>} : vector<8x32xf32>, vector<32x32xf32>, vector<8x32xf32> -> vector<8x32xf32>
    %487 = arith.addf %486, %50 : vector<8x32xf32>
    %488 = math.tanh %487 : vector<8x32xf32>
    %c0_i32_203 = arith.constant 0 : i32
    %489 = arith.index_cast %c0_i32_203 : i32 to index
    %490 = memref.load %arg2[%489] : memref<6xf32, #tpu.memory_space<smem>>
    %cst_204 = arith.constant dense<0.000000e+00> : vector<8x32xf32>
    %491 = tpu.matmul %488, %18, %cst_204 {dimension_numbers = #tpu.dot_dimension_numbers<[1], [0], [0], [1], [0, 0, 1, 1], [], []>} : vector<8x32xf32>, vector<32x32xf32>, vector<8x32xf32> -> vector<8x32xf32>
    %492 = arith.addf %491, %55 : vector<8x32xf32>
    %493 = math.tanh %492 : vector<8x32xf32>
    %cst_205 = arith.constant dense<0.000000e+00> : vector<8x32xf32>
    %494 = tpu.matmul %493, %20, %cst_205 {dimension_numbers = #tpu.dot_dimension_numbers<[1], [0], [0], [1], [0, 0, 1, 1], [], []>} : vector<8x32xf32>, vector<32x32xf32>, vector<8x32xf32> -> vector<8x32xf32>
    %495 = arith.addf %494, %60 : vector<8x32xf32>
    %496 = vector.broadcast %490 : f32 to vector<8x32xf32>
    %497 = arith.mulf %496, %495 : vector<8x32xf32>
    %498 = arith.addf %488, %497 : vector<8x32xf32>
    %499 = arith.index_cast %c0_i32_203 : i32 to index
    %c0_206 = arith.constant 0 : index
    %c0_207 = arith.constant 0 : index
    %500 = vector.load %arg23[%499, %c0_206, %c0_207] : memref<6x8x32xf32, #tpu.memory_space<vmem>>, vector<1x8x32xf32>
    %501 = vector.shape_cast %500 : vector<1x8x32xf32> to vector<8x32xf32>
    %502 = vector.shape_cast %498 : vector<8x32xf32> to vector<1x8x32xf32>
    tpu.vector_store %arg23[%499, %c0_206, %c0_207], %502 {strides = array<i32>} : memref<6x8x32xf32, #tpu.memory_space<vmem>>, vector<1x8x32xf32>,
    %c1_i32_208 = arith.constant 1 : i32
    %503 = arith.index_cast %c1_i32_208 : i32 to index
    %504 = memref.load %arg2[%503] : memref<6xf32, #tpu.memory_space<smem>>
    %cst_209 = arith.constant dense<0.000000e+00> : vector<8x32xf32>
    %505 = tpu.matmul %498, %18, %cst_209 {dimension_numbers = #tpu.dot_dimension_numbers<[1], [0], [0], [1], [0, 0, 1, 1], [], []>} : vector<8x32xf32>, vector<32x32xf32>, vector<8x32xf32> -> vector<8x32xf32>
    %506 = arith.addf %505, %55 : vector<8x32xf32>
    %507 = math.tanh %506 : vector<8x32xf32>
    %cst_210 = arith.constant dense<0.000000e+00> : vector<8x32xf32>
    %508 = tpu.matmul %507, %20, %cst_210 {dimension_numbers = #tpu.dot_dimension_numbers<[1], [0], [0], [1], [0, 0, 1, 1], [], []>} : vector<8x32xf32>, vector<32x32xf32>, vector<8x32xf32> -> vector<8x32xf32>
    %509 = arith.addf %508, %60 : vector<8x32xf32>
    %510 = vector.broadcast %504 : f32 to vector<8x32xf32>
    %511 = arith.mulf %510, %509 : vector<8x32xf32>
    %512 = arith.addf %498, %511 : vector<8x32xf32>
    %513 = arith.index_cast %c1_i32_208 : i32 to index
    %c0_211 = arith.constant 0 : index
    %c0_212 = arith.constant 0 : index
    %514 = vector.load %arg23[%513, %c0_211, %c0_212] : memref<6x8x32xf32, #tpu.memory_space<vmem>>, vector<1x8x32xf32>
    %515 = vector.shape_cast %514 : vector<1x8x32xf32> to vector<8x32xf32>
    %516 = vector.shape_cast %512 : vector<8x32xf32> to vector<1x8x32xf32>
    tpu.vector_store %arg23[%513, %c0_211, %c0_212], %516 {strides = array<i32>} : memref<6x8x32xf32, #tpu.memory_space<vmem>>, vector<1x8x32xf32>,
    %c2_i32_213 = arith.constant 2 : i32
    %517 = arith.index_cast %c2_i32_213 : i32 to index
    %518 = memref.load %arg2[%517] : memref<6xf32, #tpu.memory_space<smem>>
    %cst_214 = arith.constant dense<0.000000e+00> : vector<8x32xf32>
    %519 = tpu.matmul %512, %18, %cst_214 {dimension_numbers = #tpu.dot_dimension_numbers<[1], [0], [0], [1], [0, 0, 1, 1], [], []>} : vector<8x32xf32>, vector<32x32xf32>, vector<8x32xf32> -> vector<8x32xf32>
    %520 = arith.addf %519, %55 : vector<8x32xf32>
    %521 = math.tanh %520 : vector<8x32xf32>
    %cst_215 = arith.constant dense<0.000000e+00> : vector<8x32xf32>
    %522 = tpu.matmul %521, %20, %cst_215 {dimension_numbers = #tpu.dot_dimension_numbers<[1], [0], [0], [1], [0, 0, 1, 1], [], []>} : vector<8x32xf32>, vector<32x32xf32>, vector<8x32xf32> -> vector<8x32xf32>
    %523 = arith.addf %522, %60 : vector<8x32xf32>
    %524 = vector.broadcast %518 : f32 to vector<8x32xf32>
    %525 = arith.mulf %524, %523 : vector<8x32xf32>
    %526 = arith.addf %512, %525 : vector<8x32xf32>
    %527 = arith.index_cast %c2_i32_213 : i32 to index
    %c0_216 = arith.constant 0 : index
    %c0_217 = arith.constant 0 : index
    %528 = vector.load %arg23[%527, %c0_216, %c0_217] : memref<6x8x32xf32, #tpu.memory_space<vmem>>, vector<1x8x32xf32>
    %529 = vector.shape_cast %528 : vector<1x8x32xf32> to vector<8x32xf32>
    %530 = vector.shape_cast %526 : vector<8x32xf32> to vector<1x8x32xf32>
    tpu.vector_store %arg23[%527, %c0_216, %c0_217], %530 {strides = array<i32>} : memref<6x8x32xf32, #tpu.memory_space<vmem>>, vector<1x8x32xf32>,
    %c3_i32_218 = arith.constant 3 : i32
    %531 = arith.index_cast %c3_i32_218 : i32 to index
    %532 = memref.load %arg2[%531] : memref<6xf32, #tpu.memory_space<smem>>
    %cst_219 = arith.constant dense<0.000000e+00> : vector<8x32xf32>
    %533 = tpu.matmul %526, %18, %cst_219 {dimension_numbers = #tpu.dot_dimension_numbers<[1], [0], [0], [1], [0, 0, 1, 1], [], []>} : vector<8x32xf32>, vector<32x32xf32>, vector<8x32xf32> -> vector<8x32xf32>
    %534 = arith.addf %533, %55 : vector<8x32xf32>
    %535 = math.tanh %534 : vector<8x32xf32>
    %cst_220 = arith.constant dense<0.000000e+00> : vector<8x32xf32>
    %536 = tpu.matmul %535, %20, %cst_220 {dimension_numbers = #tpu.dot_dimension_numbers<[1], [0], [0], [1], [0, 0, 1, 1], [], []>} : vector<8x32xf32>, vector<32x32xf32>, vector<8x32xf32> -> vector<8x32xf32>
    %537 = arith.addf %536, %60 : vector<8x32xf32>
    %538 = vector.broadcast %532 : f32 to vector<8x32xf32>
    %539 = arith.mulf %538, %537 : vector<8x32xf32>
    %540 = arith.addf %526, %539 : vector<8x32xf32>
    %541 = arith.index_cast %c3_i32_218 : i32 to index
    %c0_221 = arith.constant 0 : index
    %c0_222 = arith.constant 0 : index
    %542 = vector.load %arg23[%541, %c0_221, %c0_222] : memref<6x8x32xf32, #tpu.memory_space<vmem>>, vector<1x8x32xf32>
    %543 = vector.shape_cast %542 : vector<1x8x32xf32> to vector<8x32xf32>
    %544 = vector.shape_cast %540 : vector<8x32xf32> to vector<1x8x32xf32>
    tpu.vector_store %arg23[%541, %c0_221, %c0_222], %544 {strides = array<i32>} : memref<6x8x32xf32, #tpu.memory_space<vmem>>, vector<1x8x32xf32>,
    %c4_i32_223 = arith.constant 4 : i32
    %545 = arith.index_cast %c4_i32_223 : i32 to index
    %546 = memref.load %arg2[%545] : memref<6xf32, #tpu.memory_space<smem>>
    %cst_224 = arith.constant dense<0.000000e+00> : vector<8x32xf32>
    %547 = tpu.matmul %540, %18, %cst_224 {dimension_numbers = #tpu.dot_dimension_numbers<[1], [0], [0], [1], [0, 0, 1, 1], [], []>} : vector<8x32xf32>, vector<32x32xf32>, vector<8x32xf32> -> vector<8x32xf32>
    %548 = arith.addf %547, %55 : vector<8x32xf32>
    %549 = math.tanh %548 : vector<8x32xf32>
    %cst_225 = arith.constant dense<0.000000e+00> : vector<8x32xf32>
    %550 = tpu.matmul %549, %20, %cst_225 {dimension_numbers = #tpu.dot_dimension_numbers<[1], [0], [0], [1], [0, 0, 1, 1], [], []>} : vector<8x32xf32>, vector<32x32xf32>, vector<8x32xf32> -> vector<8x32xf32>
    %551 = arith.addf %550, %60 : vector<8x32xf32>
    %552 = vector.broadcast %546 : f32 to vector<8x32xf32>
    %553 = arith.mulf %552, %551 : vector<8x32xf32>
    %554 = arith.addf %540, %553 : vector<8x32xf32>
    %555 = arith.index_cast %c4_i32_223 : i32 to index
    %c0_226 = arith.constant 0 : index
    %c0_227 = arith.constant 0 : index
    %556 = vector.load %arg23[%555, %c0_226, %c0_227] : memref<6x8x32xf32, #tpu.memory_space<vmem>>, vector<1x8x32xf32>
    %557 = vector.shape_cast %556 : vector<1x8x32xf32> to vector<8x32xf32>
    %558 = vector.shape_cast %554 : vector<8x32xf32> to vector<1x8x32xf32>
    tpu.vector_store %arg23[%555, %c0_226, %c0_227], %558 {strides = array<i32>} : memref<6x8x32xf32, #tpu.memory_space<vmem>>, vector<1x8x32xf32>,
    %c5_i32_228 = arith.constant 5 : i32
    %559 = arith.index_cast %c5_i32_228 : i32 to index
    %560 = memref.load %arg2[%559] : memref<6xf32, #tpu.memory_space<smem>>
    %cst_229 = arith.constant dense<0.000000e+00> : vector<8x32xf32>
    %561 = tpu.matmul %554, %18, %cst_229 {dimension_numbers = #tpu.dot_dimension_numbers<[1], [0], [0], [1], [0, 0, 1, 1], [], []>} : vector<8x32xf32>, vector<32x32xf32>, vector<8x32xf32> -> vector<8x32xf32>
    %562 = arith.addf %561, %55 : vector<8x32xf32>
    %563 = math.tanh %562 : vector<8x32xf32>
    %cst_230 = arith.constant dense<0.000000e+00> : vector<8x32xf32>
    %564 = tpu.matmul %563, %20, %cst_230 {dimension_numbers = #tpu.dot_dimension_numbers<[1], [0], [0], [1], [0, 0, 1, 1], [], []>} : vector<8x32xf32>, vector<32x32xf32>, vector<8x32xf32> -> vector<8x32xf32>
    %565 = arith.addf %564, %60 : vector<8x32xf32>
    %566 = vector.broadcast %560 : f32 to vector<8x32xf32>
    %567 = arith.mulf %566, %565 : vector<8x32xf32>
    %568 = arith.addf %554, %567 : vector<8x32xf32>
    %569 = arith.index_cast %c5_i32_228 : i32 to index
    %c0_231 = arith.constant 0 : index
    %c0_232 = arith.constant 0 : index
    %570 = vector.load %arg23[%569, %c0_231, %c0_232] : memref<6x8x32xf32, #tpu.memory_space<vmem>>, vector<1x8x32xf32>
    %571 = vector.shape_cast %570 : vector<1x8x32xf32> to vector<8x32xf32>
    %572 = vector.shape_cast %568 : vector<8x32xf32> to vector<1x8x32xf32>
    tpu.vector_store %arg23[%569, %c0_231, %c0_232], %572 {strides = array<i32>} : memref<6x8x32xf32, #tpu.memory_space<vmem>>, vector<1x8x32xf32>,
    %c6_i32_233 = arith.constant 6 : i32
    %c0_234 = arith.constant 0 : index
    %c0_235 = arith.constant 0 : index
    %c0_236 = arith.constant 0 : index
    %573 = vector.load %arg23[%c0_234, %c0_235, %c0_236] : memref<6x8x32xf32, #tpu.memory_space<vmem>>, vector<6x8x32xf32>
    %574 = vector.shape_cast %573 : vector<6x8x32xf32> to vector<48x32xf32>
    %cst_237 = arith.constant dense<0.000000e+00> : vector<48x32xf32>
    %575 = tpu.matmul %574, %21, %cst_237 {dimension_numbers = #tpu.dot_dimension_numbers<[1], [0], [0], [1], [0, 0, 1, 1], [], []>} : vector<48x32xf32>, vector<32x32xf32>, vector<48x32xf32> -> vector<48x32xf32>
    %c0_238 = arith.constant 0 : index
    %c0_239 = arith.constant 0 : index
    %576 = vector.load %arg16[%c0_238, %c0_239] : memref<1x32xf32, #tpu.memory_space<vmem>>, vector<1x32xf32>
    %577 = vector.broadcast %576 : vector<1x32xf32> to vector<48x32xf32>
    %578 = arith.addf %575, %577 : vector<48x32xf32>
    %579 = math.tanh %578 : vector<48x32xf32>
    %cst_240 = arith.constant dense<0.000000e+00> : vector<48x8xf32>
    %580 = tpu.matmul %579, %22, %cst_240 {dimension_numbers = #tpu.dot_dimension_numbers<[1], [0], [0], [1], [0, 0, 1, 1], [], []>} : vector<48x32xf32>, vector<32x8xf32>, vector<48x8xf32> -> vector<48x8xf32>
    %c0_241 = arith.constant 0 : index
    %c0_242 = arith.constant 0 : index
    %581 = vector.load %arg18[%c0_241, %c0_242] : memref<1x8xf32, #tpu.memory_space<vmem>>, vector<1x8xf32>
    %582 = vector.broadcast %581 : vector<1x8xf32> to vector<48x8xf32>
    %583 = arith.addf %580, %582 : vector<48x8xf32>
    %584 = vector.shape_cast %583 : vector<48x8xf32> to vector<6x8x8xf32>
    %c0_243 = arith.constant 0 : index
    %c0_244 = arith.constant 0 : index
    %c0_245 = arith.constant 0 : index
    %585 = vector.load %arg19[%c0_243, %c0_244, %c0_245] : memref<6x8x8xf32, #tpu.memory_space<vmem>>, vector<6x8x8xf32>
    tpu.vector_store %arg19[%c0_243, %c0_244, %c0_245], %584 {strides = array<i32>} : memref<6x8x8xf32, #tpu.memory_space<vmem>>, vector<6x8x8xf32>,
    return
  }
  func.func @transform_0(%arg0: i32) -> i32 {
    %c0_i32 = arith.constant 0 : i32
    %c0_i32_0 = arith.constant 0 : i32
    return %c0_i32 : i32
  }
  func.func @transform_1(%arg0: i32) -> i32 {
    %c0_i32 = arith.constant 0 : i32
    %c0_i32_0 = arith.constant 0 : i32
    return %c0_i32 : i32
  }
  func.func @transform_2(%arg0: i32) -> (i32, i32, i32) {
    %c0_i32 = arith.constant 0 : i32
    %c0_i32_0 = arith.constant 0 : i32
    %c0_i32_1 = arith.constant 0 : i32
    return %c0_i32, %arg0, %c0_i32_0 : i32, i32, i32
  }
  func.func @transform_3(%arg0: i32) -> (i32, i32, i32) {
    %c0_i32 = arith.constant 0 : i32
    %c0_i32_0 = arith.constant 0 : i32
    %c0_i32_1 = arith.constant 0 : i32
    %c0_i32_2 = arith.constant 0 : i32
    return %c0_i32, %c0_i32_0, %c0_i32_1 : i32, i32, i32
  }
  func.func @transform_4(%arg0: i32) -> (i32, i32) {
    %c0_i32 = arith.constant 0 : i32
    %c0_i32_0 = arith.constant 0 : i32
    %c0_i32_1 = arith.constant 0 : i32
    return %c0_i32, %c0_i32_0 : i32, i32
  }
  func.func @transform_5(%arg0: i32) -> (i32, i32) {
    %c0_i32 = arith.constant 0 : i32
    %c0_i32_0 = arith.constant 0 : i32
    %c0_i32_1 = arith.constant 0 : i32
    return %c0_i32, %c0_i32_0 : i32, i32
  }
  func.func @transform_6(%arg0: i32) -> (i32, i32) {
    %c0_i32 = arith.constant 0 : i32
    %c0_i32_0 = arith.constant 0 : i32
    %c0_i32_1 = arith.constant 0 : i32
    return %c0_i32, %c0_i32_0 : i32, i32
  }
  func.func @transform_7(%arg0: i32) -> (i32, i32, i32) {
    %c0_i32 = arith.constant 0 : i32
    %c0_i32_0 = arith.constant 0 : i32
    %c0_i32_1 = arith.constant 0 : i32
    %c0_i32_2 = arith.constant 0 : i32
    return %c0_i32, %c0_i32_0, %c0_i32_1 : i32, i32, i32
  }
  func.func @transform_8(%arg0: i32) -> (i32, i32, i32) {
    %c0_i32 = arith.constant 0 : i32
    %c0_i32_0 = arith.constant 0 : i32
    %c0_i32_1 = arith.constant 0 : i32
    %c0_i32_2 = arith.constant 0 : i32
    return %c0_i32, %c0_i32_0, %c0_i32_1 : i32, i32, i32
  }
  func.func @transform_9(%arg0: i32) -> (i32, i32) {
    %c0_i32 = arith.constant 0 : i32
    %c0_i32_0 = arith.constant 0 : i32
    %c0_i32_1 = arith.constant 0 : i32
    return %c0_i32, %c0_i32_0 : i32, i32
  }
  func.func @transform_10(%arg0: i32) -> (i32, i32) {
    %c0_i32 = arith.constant 0 : i32
    %c0_i32_0 = arith.constant 0 : i32
    %c0_i32_1 = arith.constant 0 : i32
    return %c0_i32, %c0_i32_0 : i32, i32
  }
  func.func @transform_11(%arg0: i32) -> (i32, i32) {
    %c0_i32 = arith.constant 0 : i32
    %c0_i32_0 = arith.constant 0 : i32
    %c0_i32_1 = arith.constant 0 : i32
    return %c0_i32, %c0_i32_0 : i32, i32
  }
  func.func @transform_12(%arg0: i32) -> (i32, i32, i32) {
    %c0_i32 = arith.constant 0 : i32
    %c0_i32_0 = arith.constant 0 : i32
    %c0_i32_1 = arith.constant 0 : i32
    %c0_i32_2 = arith.constant 0 : i32
    return %c0_i32, %c0_i32_0, %c0_i32_1 : i32, i32, i32
  }
  func.func @transform_13(%arg0: i32) -> (i32, i32) {
    %c0_i32 = arith.constant 0 : i32
    %c0_i32_0 = arith.constant 0 : i32
    %c0_i32_1 = arith.constant 0 : i32
    return %c0_i32, %c0_i32_0 : i32, i32
  }
  func.func @transform_14(%arg0: i32) -> (i32, i32) {
    %c0_i32 = arith.constant 0 : i32
    %c0_i32_0 = arith.constant 0 : i32
    %c0_i32_1 = arith.constant 0 : i32
    return %c0_i32, %c0_i32_0 : i32, i32
  }
  func.func @transform_15(%arg0: i32) -> (i32, i32) {
    %c0_i32 = arith.constant 0 : i32
    %c0_i32_0 = arith.constant 0 : i32
    %c0_i32_1 = arith.constant 0 : i32
    return %c0_i32, %c0_i32_0 : i32, i32
  }
  func.func @transform_16(%arg0: i32) -> (i32, i32) {
    %c0_i32 = arith.constant 0 : i32
    %c0_i32_0 = arith.constant 0 : i32
    %c0_i32_1 = arith.constant 0 : i32
    return %c0_i32, %c0_i32_0 : i32, i32
  }
  func.func @transform_17(%arg0: i32) -> (i32, i32) {
    %c0_i32 = arith.constant 0 : i32
    %c0_i32_0 = arith.constant 0 : i32
    %c0_i32_1 = arith.constant 0 : i32
    return %c0_i32, %c0_i32_0 : i32, i32
  }
  func.func @transform_18(%arg0: i32) -> (i32, i32, i32) {
    %c0_i32 = arith.constant 0 : i32
    %c0_i32_0 = arith.constant 0 : i32
    %c0_i32_1 = arith.constant 0 : i32
    return %c0_i32, %arg0, %c0_i32_0 : i32, i32, i32
  }
}

</mosaic_0001>

<bundles_post_ra>
// kernel: mul.1
= control target key start
LH: loop header
LB: loop body
LE: loop exit
PB: predicated region body
PF: predicated region fallthrough
CT: control target
= control target key end

     0   :  { %3 = vsyncpa [#allocation1], 0  ;;  %s86_s9 = smov [#allocation0]   ;;  %s140_s0 = inlined_call_operand.vmem [shape: f32[4,8,8], index: 0, kind: input, shape index: {}]   ;;  %s141_s1 = inlined_call_operand.hbm [shape: f32[4,8,8], index: 1, kind: input, shape index: {}]   ;;  %s142_s2 = inlined_call_operand.vmem [shape: f32[4,8,8], index: 2, kind: output, shape index: {}]  }
   0x1   :  { %s7_s10 = sshll.u32 %s86_s9, 4  ;;  %s62_s13 = scalar_lea.hbm %s141_s1, 512  ;;  %s8_s10 = int_to_ptr.vmem [resolvable:$true] %s7_s10 }
   0x2   :  { %p63_p0 = scmp.ne.s32.totalorder %s141_s1, %s62_s13  ;;  %p66_p1 = scmp.lt.u32.totalorder %s62_s13, %s141_s1 }
   0x4   :  { %p68_p2 = pnand %p66_p1, %p63_p0 }
   0x6   :  { %71 = shalt.err (!%p68_p2)
}
   0x7   :  { %s72_s18 = scalar_lea.vmem %s8_s10, 512  ;;  %p77_p4 = scmp.lt.s32.totalorder %s8_s10, %s8_s10 }
   0x8   :  { %p73_p3 = scmp.ne.s32.totalorder %s8_s10, %s72_s18  ;;  %p78_p5 = scmp.lt.s32.totalorder %s72_s18, %s72_s18 }
   0xa   :  { %p79_p6 = por %p78_p5, %p77_p4 }
   0xc   :  { %p80_p7 = pnand %p79_p6, %p73_p3 }
   0xe   :  { %83 = shalt.err (!%p80_p7)
}
   0xf   :  { %s87_s19 = smov 128   ;;  %s88_s20 = smov 8  }
  0x10   :  { %13 = dma.hbm_to_vmem [thread:$0]  %s141_s1, 512, %s8_s10, [#allocation1], %s87_s19, %s87_s19, %s88_s20  }
  0x11   :  { %84 = dma.done.wait [#allocation1], 512  }
  0x12   :  { %85 = vsyncadd [#allocation1], 4294966784  ;;  %v15_v0 = vld [vmem:[%s140_s0] sm:$0xff]  ;;  %v53_v2 = vld [vmem:[%s140_s0 + $0x8] sm:$0xff] }
  0x13   :  { %v16_v1 = vld [vmem:[#allocation0] sm:$0xff]  ;;  %v25_v4 = vld [vmem:[#allocation0 + $0x8] sm:$0xff]  ;;  %v55_v5 = vld [vmem:[%s140_s0 + $0x10] sm:$0xff] }
  0x14   :  { %v19_v3 = vmul.f32 %v16_v1, %v15_v0  ;;  %v35_v6 = vld [vmem:[#allocation0 + $0x10] sm:$0xff]  ;;  %v28_v7 = vmul.f32 %v53_v2, %v25_v4  ;;  %v57_v9 = vld [vmem:[%s140_s0 + $0x18] sm:$0xff] }
  0x15   :  { %v38_v8 = vmul.f32 %v55_v5, %v35_v6  ;;  %v45_v10 = vld [vmem:[#allocation0 + $0x18] sm:$0xff] }
  0x16   :  { %21 = vst [vmem:[%s142_s2] sm:$0xff] %v19_v3  ;;  %v48_v11 = vmul.f32 %v57_v9, %v45_v10  ;;  %54 = vst [vmem:[%s142_s2 + $0x8] sm:$0xff] %v28_v7 }
  0x17   :  { %56 = vst [vmem:[%s142_s2 + $0x10] sm:$0xff] %v38_v8 }
  0x18   :  { %58 = vst [vmem:[%s142_s2 + $0x18] sm:$0xff] %v48_v11 }
  0x19   :  { %52 = vsyncpa [#allocation1], 1 }

// kernel: seq2seq_forward.1
= control target key start
LH: loop header
LB: loop body
LE: loop exit
PB: predicated region body
PF: predicated region fallthrough
CT: control target
= control target key end

     0   :  { %s10252_s0 = inlined_call_operand.vmem [shape: f32[8], index: 0, kind: input, shape index: {}]   ;;  %s10253_s1 = inlined_call_operand.vmem [shape: f32[6], index: 1, kind: input, shape index: {}]   ;;  %s10254_s2 = inlined_call_operand.vmem [shape: f32[8,8,8], index: 2, kind: input, shape index: {}]   ;;  %s10255_s3 = inlined_call_operand.vmem [shape: f32[2,32,32], index: 3, kind: input, shape index: {}]   ;;  %s10256_s4 = inlined_call_operand.hbm [shape: f32[2,32], index: 4, kind: input, shape index: {}]   ;;  %s10257_s5 = inlined_call_operand.hbm [shape: f32[8,96], index: 5, kind: input, shape index: {}]   ;;  %s10258_s6 = inlined_call_operand.vmem [shape: f32[1,96], index: 6, kind: input, shape index: {}]   ;;  %s10259_s7 = inlined_call_operand.vmem [shape: f32[3,32,32], index: 7, kind: input, shape index: {}]   ;;  %s10260_s8 = inlined_call_operand.vmem [shape: f32[3,32,32], index: 8, kind: input, shape index: {}]   ;;  %s10261_s9 = inlined_call_operand.hbm [shape: f32[3,32], index: 9, kind: input, shape index: {}]   ;;  %s10262_s10 = inlined_call_operand.hbm [shape: f32[32,32], index: 10, kind: input, shape index: {}]   ;;  %s10263_s11 = inlined_call_operand.hbm [shape: f32[1,32], index: 11, kind: input, shape index: {}]   ;;  %s10264_s12 = inlined_call_operand.vmem [shape: f32[2,32,32], index: 12, kind: input, shape index: {}]   ;;  %s10265_s13 = inlined_call_operand.hbm [shape: f32[2,32], index: 13, kind: input, shape index: {}]   ;;  %s10266_s14 = inlined_call_operand.hbm [shape: f32[32,32], index: 14, kind: input, shape index: {}]   ;;  %s10267_s15 = inlined_call_operand.hbm [shape: f32[1,32], index: 15, kind: input, shape index: {}]   ;;  %s10268_s16 = inlined_call_operand.vmem [shape: f32[32,8], index: 16, kind: input, shape index: {}]   ;;  %s10269_s17 = inlined_call_operand.hbm [shape: f32[1,8], index: 17, kind: input, shape index: {}]   ;;  %s10270_s18 = inlined_call_operand.vmem [shape: f32[6,8,8], index: 18, kind: output, shape index: {}]  }
   0x1   :  { %10272 = sst [smem:[#allocation31_spill]] %s10252_s0 }
   0x2   :  { %10273 = sst [smem:[#allocation32_spill]] %s10253_s1 }
   0x3   :  { %10274 = sst [smem:[#allocation33_spill]] %s10254_s2 }
   0x4   :  { %23 = vsyncpa [#allocation8], 0 }
   0x5   :  { %24 = vsyncpa [#allocation10], 0 }
   0x6   :  { %25 = vsyncpa [#allocation7], 0 }
   0x7   :  { %26 = vsyncpa [#allocation13], 0 }
   0x8   :  { %27 = vsyncpa [#allocation16], 0 }
   0x9   :  { %28 = vsyncpa [#allocation19], 0 }
   0xa   :  { %29 = vsyncpa [#allocation22], 0  ;;  %s9055_s27 = smov [#allocation12]   ;;  %s9056_s29 = smov [#allocation15]  }
   0xb   :  { %s70_s28 = sshll.u32 %s9055_s27, 4  ;;  %s95_s30 = sshll.u32 %s9056_s29, 4  ;;  %s71_s28 = int_to_ptr.vmem [resolvable:$true] %s70_s28  ;;  %s9168_s30 = int_to_ptr.vmem [resolvable:$true] %s95_s30 }
   0xc   :  { %s8819_s1 = scalar_lea.hbm %s10257_s5, 128 }
   0xd   :  { %p8820_p0 = scmp.ne.s32.totalorder %s10257_s5, %s8819_s1  ;;  %p8823_p1 = scmp.lt.u32.totalorder %s8819_s1, %s10257_s5 }
   0xf   :  { %p8825_p2 = pnand %p8823_p1, %p8820_p0 }
  0x11   :  { %8828 = shalt.err (!%p8825_p2)
}
  0x12   :  { %s8829_s23 = scalar_lea.vmem %s71_s28, 128  ;;  %p8834_p4 = scmp.lt.s32.totalorder %s71_s28, %s71_s28 }
  0x13   :  { %p8830_p3 = scmp.ne.s32.totalorder %s71_s28, %s8829_s23  ;;  %p8835_p5 = scmp.lt.s32.totalorder %s8829_s23, %s8829_s23 }
  0x15   :  { %p8836_p6 = por %p8835_p5, %p8834_p4 }
  0x17   :  { %p8837_p7 = pnand %p8836_p6, %p8830_p3 }
  0x19   :  { %8840 = shalt.err (!%p8837_p7)
}
  0x1a   :  { %73 = dma.hbm_to_vmem [thread:$0]  %s10257_s5, 128, %s71_s28, [#allocation13]  }
  0x1b   :  { %s8841_s29 = scalar_lea.hbm %s10262_s10, 512 }
  0x1c   :  { %p8842_p8 = scmp.ne.s32.totalorder %s10262_s10, %s8841_s29  ;;  %p8845_p9 = scmp.lt.u32.totalorder %s8841_s29, %s10262_s10 }
  0x1e   :  { %p8847_p10 = pnand %p8845_p9, %p8842_p8 }
  0x20   :  { %8850 = shalt.err (!%p8847_p10)
}
  0x21   :  { %s8851_s21 = scalar_lea.vmem %s9168_s30, 512  ;;  %p8856_p12 = scmp.lt.s32.totalorder %s9168_s30, %s9168_s30 }
  0x22   :  { %p8852_p11 = scmp.ne.s32.totalorder %s9168_s30, %s8851_s21  ;;  %p8857_p13 = scmp.lt.s32.totalorder %s8851_s21, %s8851_s21 }
  0x24   :  { %p8858_p0 = por %p8857_p13, %p8856_p12 }
  0x26   :  { %p8859_p1 = pnand %p8858_p0, %p8852_p11 }
  0x28   :  { %8862 = shalt.err (!%p8859_p1)
}
  0x29   :  { %s9057_s5 = smov 128   ;;  %s9058_s28 = smov 8  }
  0x2a   :  { %101 = dma.hbm_to_vmem [thread:$0]  %s10262_s10, 512, %s9168_s30, [#allocation16], %s9057_s5, %s9057_s5, %s9058_s28  }
  0x2b   :  { %s9059_s23 = smov [#allocation18]   ;;  %s9060_s25 = smov [#allocation21]  }
  0x2c   :  { %s120_s24 = sshll.u32 %s9059_s23, 4  ;;  %s142_s26 = sshll.u32 %s9060_s25, 4  ;;  %s121_s24 = int_to_ptr.vmem [resolvable:$true] %s120_s24  ;;  %s143_s26 = int_to_ptr.vmem [resolvable:$true] %s142_s26 }
  0x2d   :  { %s8863_s0 = scalar_lea.hbm %s10265_s13, 32 }
  0x2e   :  { %p8864_p2 = scmp.ne.s32.totalorder %s10265_s13, %s8863_s0  ;;  %p8867_p3 = scmp.lt.u32.totalorder %s8863_s0, %s10265_s13 }
  0x30   :  { %p8869_p4 = pnand %p8867_p3, %p8864_p2 }
  0x32   :  { %8872 = shalt.err (!%p8869_p4)
}
  0x33   :  { %s8873_s10 = scalar_lea.vmem %s121_s24, 32  ;;  %p8878_p6 = scmp.lt.s32.totalorder %s121_s24, %s121_s24 }
  0x34   :  { %p8874_p5 = scmp.ne.s32.totalorder %s121_s24, %s8873_s10  ;;  %p8879_p7 = scmp.lt.s32.totalorder %s8873_s10, %s8873_s10 }
  0x36   :  { %p8880_p8 = por %p8879_p7, %p8878_p6 }
  0x38   :  { %p8881_p9 = pnand %p8880_p8, %p8874_p5 }
  0x3a   :  { %8884 = shalt.err (!%p8881_p9)
}
  0x3b   :  { %123 = dma.hbm_to_vmem [thread:$0]  %s10265_s13, 32, %s121_s24, [#allocation19]  }
  0x3c   :  { %s8885_s25 = scalar_lea.hbm %s10267_s15, 16 }
  0x3d   :  { %p8886_p10 = scmp.ne.s32.totalorder %s10267_s15, %s8885_s25  ;;  %p8889_p11 = scmp.lt.u32.totalorder %s8885_s25, %s10267_s15 }
  0x3f   :  { %p8891_p12 = pnand %p8889_p11, %p8886_p10 }
  0x41   :  { %8894 = shalt.err (!%p8891_p12)
}
  0x42   :  { %s8895_s1 = scalar_lea.vmem %s143_s26, 16  ;;  %s8899_s20 = scalar_lea.vmem %s143_s26, 32 }
  0x43   :  { %p8896_p13 = scmp.ne.s32.totalorder %s143_s26, %s8895_s1  ;;  %p8900_p0 = scmp.lt.s32.totalorder %s143_s26, %s143_s26 }
  0x44   :  { %p8901_p1 = scmp.lt.s32.totalorder %s8899_s20, %s8895_s1 }
  0x46   :  { %p8902_p2 = por %p8901_p1, %p8900_p0 }
  0x48   :  { %p8903_p3 = pnand %p8902_p2, %p8896_p13 }
  0x4a   :  { %8906 = shalt.err (!%p8903_p3)
}
  0x4b   :  { %145 = dma.hbm_to_vmem [thread:$0]  %s10267_s15, 16, %s143_s26, [#allocation22]  }
  0x4c   :  { %s10275_s30 = sld [smem:[#allocation31_spill]]  ;;  %s10276_s25 = sld [smem:[#allocation32_spill]] }
  0x52   :  { %s36_s22 = sshll.u32 %s10275_s30, 4  ;;  %s46_s27 = sshll.u32 %s10276_s25, 4  ;;  %s37_s22 = int_to_ptr.vmem [resolvable:$true] %s36_s22  ;;  %s47_s27 = int_to_ptr.vmem [resolvable:$true] %s46_s27 }
  0x53   :  { %s8907_s29 = scalar_lea.vmem %s37_s22, 16  ;;  %p8912_p5 = scmp.lt.s32.totalorder %s37_s22, %s37_s22 }
  0x54   :  { %p8908_p4 = scmp.ne.s32.totalorder %s37_s22, %s8907_s29  ;;  %p8913_p6 = scmp.lt.s32.totalorder %s8907_s29, %s8907_s29 }
  0x56   :  { %p8914_p7 = por %p8913_p6, %p8912_p5 }
  0x58   :  { %p8915_p8 = pnand %p8914_p7, %p8908_p4 }
  0x5a   :  { %8918 = shalt.err (!%p8915_p8)
}
  0x5b   :  { %s9061_s0 = smov [#allocation6]   ;;  %s8919_s15 = scalar_lea.vmem %s47_s27, 16 }
  0x5c   :  { %39 = dma.vmem_to_smem %s37_s22, 16, %s9061_s0, [#allocation8]  }
  0x5d   :  { %p8920_p9 = scmp.ne.s32.totalorder %s47_s27, %s8919_s15  ;;  %p8924_p10 = scmp.lt.s32.totalorder %s47_s27, %s47_s27 }
  0x5e   :  { %p8925_p11 = scmp.lt.s32.totalorder %s8919_s15, %s8919_s15 }
  0x60   :  { %p8926_p12 = por %p8925_p11, %p8924_p10 }
  0x62   :  { %p8927_p13 = pnand %p8926_p12, %p8920_p9 }
  0x64   :  { %8930 = shalt.err (!%p8927_p13)
}
  0x65   :  { %s9062_s26 = smov [#allocation9]   ;;  %s9063_s19 = smov [#allocation11]  }
  0x66   :  { %49 = dma.vmem_to_smem %s47_s27, 16, %s9062_s26, [#allocation10]  }
  0x67   :  { %s60_s1 = sshll.u32 %s9063_s19, 4  ;;  %s9064_s20 = smov [#allocation14]   ;;  %s61_s1 = int_to_ptr.vmem [resolvable:$true] %s60_s1 }
  0x68   :  { %s86_s13 = sshll.u32 %s9064_s20, 4  ;;  %s8931_s10 = scalar_lea.hbm %s10256_s4, 32  ;;  %s87_s13 = int_to_ptr.vmem [resolvable:$true] %s86_s13 }
  0x69   :  { %p8932_p0 = scmp.ne.s32.totalorder %s10256_s4, %s8931_s10  ;;  %p8935_p1 = scmp.lt.u32.totalorder %s8931_s10, %s10256_s4 }
  0x6b   :  { %p8937_p2 = pnand %p8935_p1, %p8932_p0 }
  0x6d   :  { %8940 = shalt.err (!%p8937_p2)
}
  0x6e   :  { %s8941_s25 = scalar_lea.vmem %s61_s1, 32  ;;  %p8946_p4 = scmp.lt.s32.totalorder %s61_s1, %s61_s1 }
  0x6f   :  { %p8942_p3 = scmp.ne.s32.totalorder %s61_s1, %s8941_s25  ;;  %p8947_p5 = scmp.lt.s32.totalorder %s8941_s25, %s8941_s25 }
  0x71   :  { %p8948_p6 = por %p8947_p5, %p8946_p4 }
  0x73   :  { %p8949_p7 = pnand %p8948_p6, %p8942_p3 }
  0x75   :  { %8952 = shalt.err (!%p8949_p7)
}
  0x76   :  { %63 = dma.hbm_to_vmem [thread:$0]  %s10256_s4, 32, %s61_s1, [#allocation7]  }
  0x77   :  { %s8953_s26 = scalar_lea.hbm %s10261_s9, 64 }
  0x78   :  { %p8954_p8 = scmp.ne.s32.totalorder %s10261_s9, %s8953_s26  ;;  %p8957_p9 = scmp.lt.u32.totalorder %s8953_s26, %s10261_s9 }
  0x7a   :  { %p8959_p10 = pnand %p8957_p9, %p8954_p8 }
  0x7c   :  { %8962 = shalt.err (!%p8959_p10)
}
  0x7d   :  { %s8963_s10 = scalar_lea.vmem %s87_s13, 64  ;;  %p8968_p12 = scmp.lt.s32.totalorder %s87_s13, %s87_s13 }
  0x7e   :  { %p8964_p11 = scmp.ne.s32.totalorder %s87_s13, %s8963_s10  ;;  %p8969_p13 = scmp.lt.s32.totalorder %s8963_s10, %s8963_s10 }
  0x80   :  { %p8970_p0 = por %p8969_p13, %p8968_p12 }
  0x82   :  { %p8971_p1 = pnand %p8970_p0, %p8964_p11 }
  0x84   :  { %8974 = shalt.err (!%p8971_p1)
}
  0x85   :  { %89 = dma.hbm_to_vmem [thread:$0]  %s10261_s9, 64, %s87_s13, [#allocation13]  }
  0x86   :  { %s9065_s30 = smov [#allocation17]   ;;  %s9066_s2 = smov [#allocation20]  }
  0x87   :  { %s108_s22 = sshll.u32 %s9065_s30, 4  ;;  %s129_s23 = sshll.u32 %s9066_s2, 4  ;;  %s109_s22 = int_to_ptr.vmem [resolvable:$true] %s108_s22  ;;  %s9256_s23 = int_to_ptr.vmem [resolvable:$true] %s129_s23 }
  0x88   :  { %s8975_s29 = scalar_lea.hbm %s10263_s11, 16 }
  0x89   :  { %p8976_p2 = scmp.ne.s32.totalorder %s10263_s11, %s8975_s29  ;;  %p8979_p3 = scmp.lt.u32.totalorder %s8975_s29, %s10263_s11 }
  0x8b   :  { %p8981_p4 = pnand %p8979_p3, %p8976_p2 }
  0x8d   :  { %8984 = shalt.err (!%p8981_p4)
}
  0x8e   :  { %s8985_s9 = scalar_lea.vmem %s109_s22, 16  ;;  %s8989_s13 = scalar_lea.vmem %s109_s22, 32 }
  0x8f   :  { %p8986_p5 = scmp.ne.s32.totalorder %s109_s22, %s8985_s9  ;;  %p8990_p6 = scmp.lt.s32.totalorder %s109_s22, %s109_s22 }
  0x90   :  { %p8991_p7 = scmp.lt.s32.totalorder %s8989_s13, %s8985_s9 }
  0x92   :  { %p8992_p8 = por %p8991_p7, %p8990_p6 }
  0x94   :  { %p8993_p9 = pnand %p8992_p8, %p8986_p5 }
  0x96   :  { %8996 = shalt.err (!%p8993_p9)
}
  0x97   :  { %111 = dma.hbm_to_vmem [thread:$0]  %s10263_s11, 16, %s109_s22, [#allocation16]  }
  0x98   :  { %s8997_s4 = scalar_lea.hbm %s10266_s14, 512 }
  0x99   :  { %p8998_p10 = scmp.ne.s32.totalorder %s10266_s14, %s8997_s4  ;;  %p9001_p11 = scmp.lt.u32.totalorder %s8997_s4, %s10266_s14 }
  0x9b   :  { %p9003_p12 = pnand %p9001_p11, %p8998_p10 }
  0x9d   :  { %9006 = shalt.err (!%p9003_p12)
}
  0x9e   :  { %s9007_s27 = scalar_lea.vmem %s9256_s23, 512  ;;  %p9012_p0 = scmp.lt.s32.totalorder %s9256_s23, %s9256_s23 }
  0x9f   :  { %p9008_p13 = scmp.ne.s32.totalorder %s9256_s23, %s9007_s27  ;;  %p9013_p1 = scmp.lt.s32.totalorder %s9007_s27, %s9007_s27 }
  0xa1   :  { %p9014_p2 = por %p9013_p1, %p9012_p0 }
  0xa3   :  { %p9015_p3 = pnand %p9014_p2, %p9008_p13 }
  0xa5   :  { %9018 = shalt.err (!%p9015_p3)
}
  0xa6   :  { %135 = dma.hbm_to_vmem [thread:$0]  %s10266_s14, 512, %s9256_s23, [#allocation19], %s9057_s5, %s9057_s5, %s9058_s28  }
  0xa7   :  { %s9067_s29 = smov [#allocation23]   ;;  %s9019_s19 = scalar_lea.hbm %s10269_s17, 16 }
  0xa8   :  { %s154_s0 = sshll.u32 %s9067_s29, 4  ;;  %p9020_p4 = scmp.ne.s32.totalorder %s10269_s17, %s9019_s19  ;;  %s155_s0 = int_to_ptr.vmem [resolvable:$true] %s154_s0 }
  0xa9   :  { %p9023_p5 = scmp.lt.u32.totalorder %s9019_s19, %s10269_s17 }
  0xab   :  { %p9025_p6 = pnand %p9023_p5, %p9020_p4 }
  0xad   :  { %9028 = shalt.err (!%p9025_p6)
}
  0xae   :  { %s9029_s21 = scalar_lea.vmem %s155_s0, 16  ;;  %s9033_s14 = scalar_lea.vmem %s155_s0, 32 }
  0xaf   :  { %p9030_p7 = scmp.ne.s32.totalorder %s155_s0, %s9029_s21  ;;  %p9034_p8 = scmp.lt.s32.totalorder %s155_s0, %s155_s0 }
  0xb0   :  { %p9035_p9 = scmp.lt.s32.totalorder %s9033_s14, %s9029_s21 }
  0xb2   :  { %p9036_p10 = por %p9035_p9, %p9034_p8 }
  0xb4   :  { %p9037_p11 = pnand %p9036_p10, %p9030_p7 }
  0xb6   :  { %9040 = shalt.err (!%p9037_p11)
}
  0xb7   :  { %157 = dma.hbm_to_vmem [thread:$0]  %s10269_s17, 16, %s155_s0, [#allocation22]  }
  0xb8   :  { %9041 = dma.done.wait [#allocation8], 16  }
  0xb9   :  { %9042 = vsyncadd [#allocation8], 4294967280 }
  0xba   :  { %9043 = dma.done.wait [#allocation10], 16  }
  0xbb   :  { %9044 = vsyncadd [#allocation10], 4294967280 }
  0xbc   :  { %9045 = dma.done.wait [#allocation7], 32  }
  0xbd   :  { %9046 = vsyncadd [#allocation7], 4294967264 }
  0xbe   :  { %9047 = dma.done.wait [#allocation13], 192  }
  0xbf   :  { %9048 = vsyncadd [#allocation13], 4294967104 }
  0xc0   :  { %9049 = dma.done.wait [#allocation16], 528  }
  0xc1   :  { %9050 = vsyncadd [#allocation16], 4294966768 }
  0xc2   :  { %9051 = dma.done.wait [#allocation19], 544  }
  0xc3   :  { %9052 = vsyncadd [#allocation19], 4294966752 }
  0xc4   :  { %9053 = dma.done.wait [#allocation22], 32  }
  0xc5   :  { %9054 = vsyncadd [#allocation22], 4294967264 }
  0xc6   :  { %191 = sfence }
  0xc7   :  { %v192_v0 = vld [vmem:[%s10255_s3] sm:$0xff]  ;;  %v193_v1 = vld [vmem:[%s10255_s3 + $0x8] sm:$0xff]  ;;  %v194_v2 = vld [vmem:[%s10255_s3 + $0x10] sm:$0xff]  ;;  %v9068_v3 = vmov 0.0|0.0   ;;  %vm9069_vm0 = vmmov 0   ;;  %v9070_v6 = vmov 0.0  }
  0xc8   :  { %8148 = vmatprep.subr.bf16.mxu1 %v9068_v3  ;;  %v9312_v4 = vpack.c.bf16 %v193_v1, %v192_v0  ;;  %v195_v5 = vld [vmem:[%s10255_s3 + $0x18] sm:$0xff]  ;;  %7275 = vmatprep.mubr.msk.f32.mxu1 %vm9069_vm0, %v9070_v6  ;;  %v6680_v8 = vld [vmem:[%s10255_s3 + $0x20] sm:$0xff]  ;;  %v6681_v9 = vld [vmem:[%s10255_s3 + $0x28] sm:$0xff]  ;;  %s10277_s20 = sld [smem:[#allocation33_spill]]  ;;  %vm308_vm1 = vcmask 64512   ;;  %vm438_vm2 = vcmask 261120  }
  0xc9   :  { %v9320_v7 = vpack.c.bf16 %v195_v5, %v194_v2  ;;  %v6682_v10 = vld [vmem:[%s10255_s3 + $0x30] sm:$0xff]  ;;  %v9337_v11 = vpack.c.bf16 %v6681_v9, %v6680_v8  ;;  %v6683_v12 = vld [vmem:[%s10255_s3 + $0x38] sm:$0xff]  ;;  %v201_v18 = vld [vmem:[%s10259_s7] sm:$0xff]  ;;  %s9071_s10 = smov 96   ;;  %s519_s17 = sld [smem:[#allocation6]] }
  0xca   :  { %8150 = vmatpush3.bf16.msra.mxu1 %v9312_v4  ;;  %v9343_v13 = vpack.c.bf16 %v6683_v12, %v6682_v10  ;;  %v300_v14 = vld [vmem:[#allocation12] sm:$0xff]  ;;  %v202_v19 = vld [vmem:[%s10259_s7 + $0x8] sm:$0xff]  ;;  %v9387_v25 = vld [vmem:[#allocation11] ss:$0 sm:$0xff]  ;;  %s6741_s27 = sld [smem:[#allocation6 + $0x2]]  ;;  %s6752_s11 = sld [smem:[#allocation6 + $0x3]] }
  0xcb   :  { %8151 = vmatprep.subr.bf16.mxu1 %v9068_v3  ;;  %7253 = vmatprep.subr.mxu0 %v300_v14  ;;  %v9366_v20 = vpack.c.bf16 %v202_v19, %v201_v18  ;;  %v6684_v29 = vld [vmem:[%s10259_s7 + $0x20] sm:$0xff]  ;;  %v6685_v30 = vld [vmem:[%s10259_s7 + $0x28] sm:$0xff]  ;;  %v203_v33 = vld [vmem:[%s10259_s7 + $0x10] sm:$0xff]  ;;  %s6763_s22 = sld [smem:[#allocation6 + $0x4]]  ;;  %s6774_s29 = sld [smem:[#allocation6 + $0x5]] }
  0xcc   :  { %7254 = vmatpush3.msra.mxu0 %v300_v14  ;;  %v9396_v31 = vpack.c.bf16 %v6685_v30, %v6684_v29  ;;  %v204_v34 = vld [vmem:[%s10259_s7 + $0x18] sm:$0xff]  ;;  %v6686_v35 = vld [vmem:[%s10259_s7 + $0x30] sm:$0xff]  ;;  %v6712_v41 = vld [vmem:[%s10258_s6] ss:$0 sm:$0xff]  ;;  %s9072_s6 = smov 64   ;;  %s6785_s0 = sld [smem:[#allocation6 + $0x6]] }
  0xcd   :  { %8160 = vmatprep.subr.bf16.mxu0 %v9068_v3  ;;  %v9415_v37 = vpack.c.bf16 %v204_v34, %v203_v33  ;;  %v6687_v38 = vld [vmem:[%s10259_s7 + $0x38] sm:$0xff]  ;;  %v9452_v55 = vld [vmem:[#allocation11 + $0x1] ss:$0 sm:$0xff]  ;;  %v215_v5 = vld [vmem:[%s10260_s8] sm:$0xff]  ;;  %s6796_s15 = sld [smem:[#allocation6 + $0x7]]  ;;  %s6810_s4 = sld [smem:[#allocation9 + $0x1]] }
  0xce   :  { %8153 = vmatpush3.bf16.msra.mxu1 %v9320_v7  ;;  %v292_v15 = vld [vmem:[%s10277_s20] sm:$0xff]  ;;  %v293_v16 = vld [vmem:[%s10277_s20 + $0x8] sm:$0xff]  ;;  %v294_v17 = vld [vmem:[%s10277_s20 + $0x10] sm:$0xff]  ;;  %v9421_v39 = vpack.c.bf16 %v6687_v38, %v6686_v35  ;;  %s6813_s1 = sld [smem:[#allocation9 + $0x2]]  ;;  %s6816_s30 = sld [smem:[#allocation9 + $0x3]] }
  0xcf   :  { %8154 = vmatprep.subr.bf16.mxu1 %v9068_v3  ;;  %7255 = vmatprep.mubr.msk.f32.mxu0 %vm308_vm1, %v292_v15  ;;  %v295_v21 = vld [vmem:[%s10277_s20 + $0x18] sm:$0xff]  ;;  %v296_v22 = vld [vmem:[%s10277_s20 + $0x20] sm:$0xff]  ;;  %v297_v23 = vld [vmem:[%s10277_s20 + $0x28] sm:$0xff]  ;;  %v667_v59 = vstv %s519_s17  ;;  %s6819_s2 = sld [smem:[#allocation9 + $0x4]] }
  0xd0   :  { %7256 = vmatmul.mubr.msk.f32.vlgmr.msra.gmra.mrb[0].mxu0 %vm308_vm1, %v293_v16  ;;  %v298_v24 = vld [vmem:[%s10277_s20 + $0x30] sm:$0xff]  ;;  %v299_v36 = vld [vmem:[%s10277_s20 + $0x38] sm:$0xff]  ;;  %v216_v8 = vld [vmem:[%s10260_s8 + $0x8] sm:$0xff] }
  0xd1   :  { %7276 = vmatmul.mubr.f32.vlgmr.msra.gmra.mrb[0].mxu1 %v9070_v6  ;;  %7258 = vmatprep.mubr.msk.f32.mxu0 %vm308_vm1, %v294_v17  ;;  %v6692_v9 = vld [vmem:[%s10260_s8 + $0x20] sm:$0xff]  ;;  %v9481_v10 = vpack.c.bf16 %v216_v8, %v215_v5  ;;  %v6693_v12 = vld [vmem:[%s10260_s8 + $0x28] sm:$0xff]  ;;  %v217_v14 = vld [vmem:[%s10260_s8 + $0x10] sm:$0xff] }
  0xd2   :  { %7286 = vmatprep.mubr.msk.f32.mxu1 %vm9069_vm0, %v9070_v6  ;;  %8156 = vmatpush3.bf16.msra.mxu1 %v9337_v11  ;;  %v218_v15 = vld [vmem:[%s10260_s8 + $0x18] sm:$0xff]  ;;  %v9493_v16 = vpack.c.bf16 %v6693_v12, %v6692_v9  ;;  %v6694_v17 = vld [vmem:[%s10260_s8 + $0x30] sm:$0xff]  ;;  %v6688_v34 = vld [vmem:[%s10259_s7 + $0x40] sm:$0xff] }
  0xd3   :  { %8157 = vmatprep.subr.bf16.mxu1 %v9068_v3  ;;  %8162 = vmatpush3.bf16.msra.mxu0 %v9366_v20  ;;  %v6695_v18 = vld [vmem:[%s10260_s8 + $0x38] sm:$0xff]  ;;  %v9502_v19 = vpack.c.bf16 %v218_v15, %v217_v14  ;;  %v6689_v35 = vld [vmem:[%s10259_s7 + $0x48] sm:$0xff]  ;;  %v6696_v5 = vld [vmem:[%s10260_s8 + $0x40] sm:$0xff] }
  0xd4   :  { %8163 = vmatprep.subr.bf16.mxu0 %v9068_v3  ;;  %7259 = vmatmul.mubr.msk.f32.gmra.mrb[2].mxu0 %vm308_vm1, %v295_v21  ;;  %v9506_v21 = vpack.c.bf16 %v6695_v18, %v6694_v17  ;;  %v9528_v38 = vpack.c.bf16 %v6689_v35, %v6688_v34  ;;  %v6697_v8 = vld [vmem:[%s10260_s8 + $0x48] sm:$0xff]  ;;  %v6698_v9 = vld [vmem:[%s10260_s8 + $0x50] sm:$0xff]  ;;  %v6699_v14 = vld [vmem:[%s10260_s8 + $0x58] sm:$0xff]  ;;  %s6730_s8 = sld [smem:[#allocation6 + $0x1]] }
  0xd5   :  { %7261 = vmatprep.mubr.msk.f32.mxu0 %vm308_vm1, %v296_v22  ;;  %v9571_v12 = vpack.c.bf16 %v6697_v8, %v6696_v5  ;;  %v9577_v15 = vpack.c.bf16 %v6699_v14, %v6698_v9 }
  0xd6   :  { %8159 = vmatpush3.bf16.msra.mxu1 %v9343_v13 }
  0xd7   :  { %8166 = vmatprep.subr.bf16.mxu1 %v9068_v3  ;;  %8165 = vmatpush3.bf16.msra.mxu0 %v9415_v37 }
  0xd8   :  { %7262 = vmatmul.mubr.msk.f32.gmra.mrb[4].mxu0 %vm308_vm1, %v297_v23  ;;  %8172 = vmatprep.subr.bf16.mxu0 %v9068_v3 }
  0xd9   :  { %7264 = vmatprep.mubr.msk.f32.mxu0 %vm308_vm1, %v298_v24 }
  0xdc   :  { %7265 = vmatmul.mubr.msk.f32.gmra.mrb[6].mxu0 %vm308_vm1, %v299_v36  ;;  %v6690_v36 = vld [vmem:[%s10259_s7 + $0x50] sm:$0xff] }
  0xdd   :  { %7297 = vmatprep.mubr.msk.f32.mxu0 %vm9069_vm0, %v9070_v6 }
 0x1a3   :  { %v7257_v40 = vpop.f32.mrb[0].mxu0 }
 0x1a4   :  { %v589_v26 = vpop.f32.mrb[0].mxu1  ;;  %v405_v42 = vadd.f32 %v7257_v40, %v6712_v41  ;;  %v399_v43 = vpop.f32.mrb[1].mxu0  ;;  %v6691_v40 = vld [vmem:[%s10259_s7 + $0x58] sm:$0xff] }
 0x1a5   :  { %v590_v27 = vadd.f32 %v9387_v25, %v589_v26  ;;  %v7277_v28 = vpop.f32.mrb[1].mxu1  ;;  %v400_v44 = vadd.f32 %v6712_v41, %v399_v43 }
 0x1a6   :  { %440 = vst.msk [vmem:[#allocation2 + $0x8] sm:$0xff] %vm438_vm2, %v405_v42  ;;  %457 = vrot.lane.b32.xlu1 %v405_v42, %s9071_s10 }
 0x1a7   :  { %8644 = vtanh.f32 %v590_v27  ;;  %v7260_v45 = vpop.f32.mrb[2].mxu0  ;;  %439 = vst.msk [vmem:[#allocation2] sm:$0xff] %vm438_vm2, %v400_v44  ;;  %455 = vrot.lane.b32.xlu0 %v400_v44, %s9071_s10 }
 0x1a8   :  { %v415_v46 = vadd.f32 %v7260_v45, %v6712_v41  ;;  %v409_v47 = vpop.f32.mrb[3].mxu0 }
 0x1a9   :  { %v410_v48 = vadd.f32 %v6712_v41, %v409_v47 }
 0x1aa   :  { %442 = vst.msk [vmem:[#allocation2 + $0x18] sm:$0xff] %vm438_vm2, %v415_v46  ;;  %489 = vrot.lane.b32.xlu1 %v405_v42, %s9072_s6 }
 0x1ab   :  { %441 = vst.msk [vmem:[#allocation2 + $0x10] sm:$0xff] %vm438_vm2, %v410_v48  ;;  %v7263_v49 = vpop.f32.mrb[4].mxu0  ;;  %487 = vrot.lane.b32.xlu0 %v400_v44, %s9072_s6 }
 0x1ac   :  { %v425_v50 = vadd.f32 %v7263_v49, %v6712_v41  ;;  %v419_v51 = vpop.f32.mrb[5].mxu0 }
 0x1ad   :  { %v420_v52 = vadd.f32 %v6712_v41, %v419_v51 }
 0x1ae   :  { %444 = vst.msk [vmem:[#allocation2 + $0x28] sm:$0xff] %vm438_vm2, %v425_v50  ;;  %491 = vrot.lane.b32.xlu1 %v410_v48, %s9072_s6  ;;  %v670_v23 = vld [vmem:[#allocation2] sm:$0xff] }
 0x1af   :  { %443 = vst.msk [vmem:[#allocation2 + $0x20] sm:$0xff] %vm438_vm2, %v420_v52  ;;  %459 = vrot.lane.b32.xlu0 %v410_v48, %s9071_s10  ;;  %v7266_v63 = vpop.f32.mrb[6].mxu0 }
 0x1b0   :  { %v435_v0 = vadd.f32 %v7266_v63, %v6712_v41  ;;  %v429_v1 = vpop.f32.mrb[7].mxu0 }
 0x1b1   :  { %v8645_v32 = vpop.eup %8644  ;;  %v430_v2 = vadd.f32 %v6712_v41, %v429_v1  ;;  %v9534_v41 = vpack.c.bf16 %v6691_v40, %v6690_v36 }
 0x1b2   :  { %7287 = vmatmul.mubr.msk.f32.vlgmr.msra.gmra.mrb[2].mxu1 %vm438_vm2, %v8645_v32  ;;  %493 = vrot.lane.b32.xlu1 %v415_v46, %s9072_s6  ;;  %446 = vst.msk [vmem:[#allocation2 + $0x38] sm:$0xff] %vm438_vm2, %v435_v0 }
 0x1b3   :  { %8168 = vmatpush3.bf16.msra.mxu1 %v9396_v31  ;;  %7308 = vmatprep.mubr.msk.f32.mxu1 %vm9069_vm0, %v9070_v6  ;;  %445 = vst.msk [vmem:[#allocation2 + $0x30] sm:$0xff] %vm438_vm2, %v430_v2 }
 0x1b4   :  { %8169 = vmatprep.subr.bf16.mxu1 %v9068_v3  ;;  %461 = vrot.lane.b32.xlu0 %v415_v46, %s9071_s10 }
 0x1b6   :  { %495 = vrot.lane.b32.xlu1 %v420_v52, %s9072_s6 }
 0x1b7   :  { %8171 = vmatpush3.bf16.msra.mxu1 %v9421_v39 }
 0x1b8   :  { %8178 = vmatprep.subr.bf16.mxu1 %v9068_v3  ;;  %463 = vrot.lane.b32.xlu0 %v420_v52, %s9071_s10 }
 0x1ba   :  { %497 = vrot.lane.b32.xlu1 %v425_v50, %s9072_s6 }
 0x1bc   :  { %465 = vrot.lane.b32.xlu0 %v425_v50, %s9071_s10 }
 0x1be   :  { %499 = vrot.lane.b32.xlu1 %v430_v2, %s9072_s6 }
 0x1c0   :  { %467 = vrot.lane.b32.xlu0 %v430_v2, %s9071_s10 }
 0x1c2   :  { %501 = vrot.lane.b32.xlu1 %v435_v0, %s9072_s6 }
 0x1c4   :  { %469 = vrot.lane.b32.xlu0 %v435_v0, %s9071_s10 }
 0x218   :  { %v458_v53 = vpop.permute.xlu1 %457 }
 0x219   :  { %480 = vst.msk [vmem:[#allocation3 + $0x8] sm:$0xff] %vm438_vm2, %v458_v53  ;;  %v456_v54 = vpop.permute.xlu0 %455 }
 0x21a   :  { %479 = vst.msk [vmem:[#allocation3] sm:$0xff] %vm438_vm2, %v456_v54  ;;  %v9551_v54 = vld [vmem:[#allocation14 + $0x1] ss:$0 sm:$0xff] }
 0x21c   :  { %v490_v56 = vpop.permute.xlu1 %489 }
 0x21d   :  { %512 = vst.msk [vmem:[#allocation4 + $0x8] sm:$0xff] %vm438_vm2, %v490_v56  ;;  %v488_v57 = vpop.permute.xlu0 %487 }
 0x21e   :  { %511 = vst.msk [vmem:[#allocation4] sm:$0xff] %vm438_vm2, %v488_v57 }
 0x220   :  { %v492_v42 = vpop.permute.xlu1 %491 }
 0x221   :  { %v745_v22 = vld [vmem:[#allocation3] sm:$0xff]  ;;  %v460_v43 = vpop.permute.xlu0 %459  ;;  %513 = vst.msk [vmem:[#allocation4 + $0x10] sm:$0xff] %vm438_vm2, %v492_v42 }
 0x222   :  { %481 = vst.msk [vmem:[#allocation3 + $0x10] sm:$0xff] %vm438_vm2, %v460_v43 }
 0x224   :  { %v494_v44 = vpop.permute.xlu1 %493 }
 0x225   :  { %514 = vst.msk [vmem:[#allocation4 + $0x18] sm:$0xff] %vm438_vm2, %v494_v44  ;;  %v976_v17 = vld [vmem:[#allocation4] sm:$0xff] }
 0x226   :  { %v462_v45 = vpop.permute.xlu0 %461 }
 0x227   :  { %482 = vst.msk [vmem:[#allocation3 + $0x18] sm:$0xff] %vm438_vm2, %v462_v45 }
 0x228   :  { %v496_v46 = vpop.permute.xlu1 %495 }
 0x229   :  { %515 = vst.msk [vmem:[#allocation4 + $0x20] sm:$0xff] %vm438_vm2, %v496_v46 }
 0x22a   :  { %v464_v47 = vpop.permute.xlu0 %463 }
 0x22b   :  { %483 = vst.msk [vmem:[#allocation3 + $0x20] sm:$0xff] %vm438_vm2, %v464_v47 }
 0x22c   :  { %v498_v48 = vpop.permute.xlu1 %497 }
 0x22d   :  { %516 = vst.msk [vmem:[#allocation4 + $0x28] sm:$0xff] %vm438_vm2, %v498_v48 }
 0x22e   :  { %v466_v49 = vpop.permute.xlu0 %465 }
 0x22f   :  { %484 = vst.msk [vmem:[#allocation3 + $0x28] sm:$0xff] %vm438_vm2, %v466_v49 }
 0x230   :  { %v500_v50 = vpop.permute.xlu1 %499 }
 0x231   :  { %517 = vst.msk [vmem:[#allocation4 + $0x30] sm:$0xff] %vm438_vm2, %v500_v50  ;;  %v1277_v50 = vstv %s6730_s8 }
 0x232   :  { %v468_v51 = vpop.permute.xlu0 %467 }
 0x233   :  { %485 = vst.msk [vmem:[#allocation3 + $0x30] sm:$0xff] %vm438_vm2, %v468_v51 }
 0x234   :  { %v502_v52 = vpop.permute.xlu1 %501 }
 0x235   :  { %518 = vst.msk [vmem:[#allocation4 + $0x38] sm:$0xff] %vm438_vm2, %v502_v52 }
 0x236   :  { %v470_v53 = vpop.permute.xlu0 %469 }
 0x237   :  { %486 = vst.msk [vmem:[#allocation3 + $0x38] sm:$0xff] %vm438_vm2, %v470_v53 }
 0x285   :  { %v663_v58 = vpop.f32.mrb[2].mxu1 }
 0x286   :  { %v664_v60 = vadd.f32 %v9452_v55, %v663_v58  ;;  %v7288_v61 = vpop.f32.mrb[3].mxu1 }
 0x288   :  { %v9457_v62 = vmul.f32 %v667_v59, %v664_v60 }
 0x28a   :  { %7298 = vmatmul.mubr.msk.f32.vlgmr.msra.gmra.mrb[8].mxu0 %vm438_vm2, %v9457_v62  ;;  %7309 = vmatmul.mubr.msk.f32.vlgmr.msra.gmra.mrb[4].mxu1 %vm438_vm2, %v9457_v62 }
 0x28b   :  { %7319 = vmatprep.mubr.msk.f32.mxu0 %vm9069_vm0, %v9070_v6  ;;  %7330 = vmatprep.mubr.msk.f32.mxu1 %vm9069_vm0, %v9070_v6 }
 0x28c   :  { %8174 = vmatpush3.bf16.msra.mxu0 %v9481_v10  ;;  %8180 = vmatpush3.bf16.msra.mxu1 %v9493_v16 }
 0x28d   :  { %8175 = vmatprep.subr.bf16.mxu0 %v9068_v3  ;;  %8181 = vmatprep.subr.bf16.mxu1 %v9068_v3 }
 0x290   :  { %8177 = vmatpush3.bf16.msra.mxu0 %v9502_v19  ;;  %8183 = vmatpush3.bf16.msra.mxu1 %v9506_v21 }
 0x291   :  { %8184 = vmatprep.subr.bf16.mxu0 %v9068_v3  ;;  %8190 = vmatprep.subr.bf16.mxu1 %v9068_v3 }
 0x35d   :  { %v740_v24 = vpop.f32.mrb[8].mxu0  ;;  %v812_v26 = vpop.f32.mrb[4].mxu1 }
 0x35e   :  { %v741_v27 = vadd.f32 %v740_v24, %v670_v23  ;;  %v813_v28 = vadd.f32 %v812_v26, %v745_v22  ;;  %v7299_v29 = vpop.f32.mrb[9].mxu0  ;;  %v7310_v30 = vpop.f32.mrb[5].mxu1  ;;  %v9589_v26 = vld [vmem:[#allocation14] ss:$0 sm:$0xff] }
 0x360   :  { %8646 = vtanh.f32 %v741_v27 }
 0x361   :  { %8648 = vtanh.f32 %v813_v28 }
 0x36a   :  { %v8647_v32 = vpop.eup %8646 }
 0x36b   :  { %v8649_v33 = vpop.eup %8648  ;;  %7320 = vmatmul.mubr.msk.f32.vlgmr.msra.gmra.mrb[10].mxu0 %vm438_vm2, %v8647_v32  ;;  %v9592_v32 = vld [vmem:[#allocation14 + $0x2] ss:$0 sm:$0xff] }
 0x36c   :  { %7331 = vmatmul.mubr.msk.f32.vlgmr.msra.gmra.mrb[6].mxu1 %vm438_vm2, %v8649_v33  ;;  %7341 = vmatprep.mubr.msk.f32.mxu0 %vm9069_vm0, %v9070_v6 }
 0x36d   :  { %7352 = vmatprep.mubr.msk.f32.mxu1 %vm9069_vm0, %v9070_v6  ;;  %8186 = vmatpush3.bf16.msra.mxu0 %v9528_v38 }
 0x36e   :  { %8187 = vmatprep.subr.bf16.mxu0 %v9068_v3  ;;  %8192 = vmatpush3.bf16.msra.mxu1 %v9571_v12 }
 0x36f   :  { %8193 = vmatprep.subr.bf16.mxu1 %v9068_v3 }
 0x371   :  { %8189 = vmatpush3.bf16.msra.mxu0 %v9534_v41 }
 0x372   :  { %8196 = vmatprep.subr.bf16.mxu0 %v9068_v3  ;;  %8195 = vmatpush3.bf16.msra.mxu1 %v9577_v15 }
 0x373   :  { %8202 = vmatprep.subr.bf16.mxu1 %v9068_v3 }
 0x43e   :  { %v886_v56 = vpop.f32.mrb[10].mxu0 }
 0x43f   :  { %v965_v57 = vpop.f32.mrb[6].mxu1  ;;  %v7321_v58 = vpop.f32.mrb[11].mxu0  ;;  %v887_v27 = vadd.f32 %v9589_v26, %v886_v56 }
 0x440   :  { %v966_v59 = vadd.f32 %v9551_v54, %v965_v57  ;;  %v7332_v60 = vpop.f32.mrb[7].mxu1  ;;  %v1281_v57 = vld [vmem:[#allocation2 + $0x8] sm:$0xff] }
 0x441   :  { %v6725_v28 = vmul.f32 -1.442695, %v887_v27 }
 0x442   :  { %v6727_v61 = vmul.f32 -1.442695, %v966_v59  ;;  %v1357_v59 = vld [vmem:[#allocation3 + $0x8] sm:$0xff] }
 0x444   :  { %8650 = vpow2.f32 %v6727_v61 }
 0x44e   :  { %v8651_v63 = vpop.eup %8650 }
 0x44f   :  { %v972_v0 = vadd.f32 1.0, %v8651_v63 }
 0x451   :  { %8652 = vrcp.f32 %v972_v0 }
 0x45b   :  { %v8653_v1 = vpop.eup %8652 }
 0x45c   :  { %v975_v2 = vmul.f32 %v8653_v1, %v9457_v62 }
 0x45e   :  { %7342 = vmatmul.mubr.msk.f32.vlgmr.msra.gmra.mrb[12].mxu0 %vm438_vm2, %v975_v2 }
 0x45f   :  { %8198 = vmatpush3.bf16.msra.mxu0 %v9312_v4  ;;  %7363 = vmatprep.mubr.msk.f32.mxu0 %vm9069_vm0, %v9070_v6 }
 0x460   :  { %8199 = vmatprep.subr.bf16.mxu0 %v9068_v3 }
 0x463   :  { %8201 = vmatpush3.bf16.msra.mxu0 %v9320_v7 }
 0x464   :  { %8208 = vmatprep.subr.bf16.mxu0 %v9068_v3 }
 0x531   :  { %v1046_v18 = vpop.f32.mrb[12].mxu0 }
 0x532   :  { %v1047_v22 = vadd.f32 %v1046_v18, %v976_v17  ;;  %v7343_v23 = vpop.f32.mrb[13].mxu0 }
 0x534   :  { %8654 = vtanh.f32 %v1047_v22 }
 0x535   :  { %8656 = vpow2.f32 %v6725_v28 }
 0x53e   :  { %v8655_v24 = vpop.eup %8654 }
 0x53f   :  { %7353 = vmatmul.mubr.msk.f32.vlgmr.msra.gmra.mrb[8].mxu1 %vm438_vm2, %v8655_v24  ;;  %v8657_v29 = vpop.eup %8656 }
 0x540   :  { %8204 = vmatpush3.bf16.msra.mxu1 %v9337_v11  ;;  %7374 = vmatprep.mubr.msk.f32.mxu1 %vm9069_vm0, %v9070_v6  ;;  %v893_v30 = vadd.f32 1.0, %v8657_v29  ;;  %v1589_v29 = vld [vmem:[#allocation4 + $0x8] sm:$0xff] }
 0x541   :  { %8205 = vmatprep.subr.bf16.mxu1 %v9068_v3 }
 0x542   :  { %8658 = vrcp.f32 %v893_v30 }
 0x544   :  { %8207 = vmatpush3.bf16.msra.mxu1 %v9343_v13 }
 0x545   :  { %8214 = vmatprep.subr.bf16.mxu1 %v9068_v3 }
 0x54c   :  { %v8659_v36 = vpop.eup %8658 }
 0x54d   :  { %v1125_v40 = vsub.f32 1.0, %v8659_v36  ;;  %v1127_v44 = vmul.f32 %v8659_v36, %v9457_v62 }
 0x612   :  { %v1120_v33 = vpop.f32.mrb[8].mxu1 }
 0x613   :  { %v1121_v34 = vadd.f32 %v9592_v32, %v1120_v33  ;;  %v7354_v35 = vpop.f32.mrb[9].mxu1 }
 0x615   :  { %8660 = vtanh.f32 %v1121_v34 }
 0x61f   :  { %v8661_v42 = vpop.eup %8660 }
 0x620   :  { %v1126_v43 = vmul.f32 %v8661_v42, %v1125_v40 }
 0x622   :  { %v1128_v45 = vadd.f32 %v1127_v44, %v1126_v43 }
 0x624   :  { %7364 = vmatmul.mubr.msk.f32.vlgmr.msra.gmra.mrb[14].mxu0 %vm438_vm2, %v1128_v45 }
 0x625   :  { %8210 = vmatpush3.bf16.msra.mxu0 %v9366_v20  ;;  %7385 = vmatprep.mubr.msk.f32.mxu0 %vm9069_vm0, %v9070_v6 }
 0x626   :  { %8211 = vmatprep.subr.bf16.mxu0 %v9068_v3 }
 0x629   :  { %8213 = vmatpush3.bf16.msra.mxu0 %v9415_v37 }
 0x62a   :  { %8220 = vmatprep.subr.bf16.mxu0 %v9068_v3 }
 0x6f7   :  { %v1199_v46 = vpop.f32.mrb[14].mxu0 }
 0x6f8   :  { %v1200_v47 = vadd.f32 %v9387_v25, %v1199_v46  ;;  %v7365_v48 = vpop.f32.mrb[15].mxu0 }
 0x6fa   :  { %8662 = vtanh.f32 %v1200_v47 }
 0x704   :  { %v8663_v62 = vpop.eup %8662 }
 0x705   :  { %7375 = vmatmul.mubr.msk.f32.vlgmr.msra.gmra.mrb[10].mxu1 %vm438_vm2, %v8663_v62 }
 0x706   :  { %8216 = vmatpush3.bf16.msra.mxu1 %v9396_v31  ;;  %7396 = vmatprep.mubr.msk.f32.mxu1 %vm9069_vm0, %v9070_v6 }
 0x707   :  { %8217 = vmatprep.subr.bf16.mxu1 %v9068_v3 }
 0x70a   :  { %8219 = vmatpush3.bf16.msra.mxu1 %v9421_v39 }
 0x70b   :  { %8226 = vmatprep.subr.bf16.mxu1 %v9068_v3 }
 0x7d8   :  { %v1273_v49 = vpop.f32.mrb[10].mxu1 }
 0x7d9   :  { %v1274_v51 = vadd.f32 %v9452_v55, %v1273_v49  ;;  %v7376_v52 = vpop.f32.mrb[11].mxu1 }
 0x7db   :  { %v1278_v53 = vmul.f32 %v1277_v50, %v1274_v51 }
 0x7dd   :  { %v9612_v56 = vadd.f32 %v1278_v53, %v1128_v45 }
 0x7df   :  { %7386 = vmatmul.mubr.msk.f32.vlgmr.msra.gmra.mrb[16].mxu0 %vm438_vm2, %v9612_v56  ;;  %7397 = vmatmul.mubr.msk.f32.vlgmr.msra.gmra.mrb[12].mxu1 %vm438_vm2, %v9612_v56 }
 0x7e0   :  { %8222 = vmatpush3.bf16.msra.mxu0 %v9481_v10  ;;  %8228 = vmatpush3.bf16.msra.mxu1 %v9493_v16 }
 0x7e1   :  { %8223 = vmatprep.subr.bf16.mxu0 %v9068_v3  ;;  %8229 = vmatprep.subr.bf16.mxu1 %v9068_v3 }
 0x7e2   :  { %7407 = vmatprep.mubr.msk.f32.mxu0 %vm9069_vm0, %v9070_v6  ;;  %7418 = vmatprep.mubr.msk.f32.mxu1 %vm9069_vm0, %v9070_v6 }
 0x7e4   :  { %8225 = vmatpush3.bf16.msra.mxu0 %v9502_v19  ;;  %8231 = vmatpush3.bf16.msra.mxu1 %v9506_v21 }
 0x7e5   :  { %8232 = vmatprep.subr.bf16.mxu0 %v9068_v3  ;;  %8238 = vmatprep.subr.bf16.mxu1 %v9068_v3 }
 0x8b2   :  { %v1351_v58 = vpop.f32.mrb[16].mxu0  ;;  %v1424_v60 = vpop.f32.mrb[12].mxu1 }
 0x8b3   :  { %v1352_v61 = vadd.f32 %v1351_v58, %v1281_v57  ;;  %v1425_v63 = vadd.f32 %v1424_v60, %v1357_v59  ;;  %v7387_v0 = vpop.f32.mrb[17].mxu0  ;;  %v7398_v1 = vpop.f32.mrb[13].mxu1  ;;  %v1890_v59 = vstv %s6741_s27 }
 0x8b4   :  { %v1894_v1 = vld [vmem:[#allocation2 + $0x10] sm:$0xff] }
 0x8b5   :  { %8664 = vtanh.f32 %v1352_v61 }
 0x8b6   :  { %8666 = vtanh.f32 %v1425_v63 }
 0x8bf   :  { %v8665_v2 = vpop.eup %8664 }
 0x8c0   :  { %v8667_v5 = vpop.eup %8666  ;;  %7408 = vmatmul.mubr.msk.f32.vlgmr.msra.gmra.mrb[18].mxu0 %vm438_vm2, %v8665_v2 }
 0x8c1   :  { %7419 = vmatmul.mubr.msk.f32.vlgmr.msra.gmra.mrb[14].mxu1 %vm438_vm2, %v8667_v5  ;;  %8234 = vmatpush3.bf16.msra.mxu0 %v9528_v38  ;;  %v1970_v5 = vld [vmem:[#allocation3 + $0x10] sm:$0xff] }
 0x8c2   :  { %8235 = vmatprep.subr.bf16.mxu0 %v9068_v3  ;;  %7429 = vmatprep.mubr.msk.f32.mxu0 %vm9069_vm0, %v9070_v6 }
 0x8c3   :  { %8240 = vmatpush3.bf16.msra.mxu1 %v9571_v12  ;;  %7440 = vmatprep.mubr.msk.f32.mxu1 %vm9069_vm0, %v9070_v6 }
 0x8c4   :  { %8241 = vmatprep.subr.bf16.mxu1 %v9068_v3 }
 0x8c5   :  { %8237 = vmatpush3.bf16.msra.mxu0 %v9534_v41 }
 0x8c6   :  { %8244 = vmatprep.subr.bf16.mxu0 %v9068_v3 }
 0x8c7   :  { %8243 = vmatpush3.bf16.msra.mxu1 %v9577_v15 }
 0x8c8   :  { %8250 = vmatprep.subr.bf16.mxu1 %v9068_v3 }
 0x993   :  { %v1498_v8 = vpop.f32.mrb[18].mxu0 }
 0x994   :  { %v1577_v9 = vpop.f32.mrb[14].mxu1  ;;  %v7409_v14 = vpop.f32.mrb[19].mxu0  ;;  %v1499_v36 = vadd.f32 %v9589_v26, %v1498_v8 }
 0x995   :  { %v1578_v17 = vadd.f32 %v9551_v54, %v1577_v9  ;;  %v7420_v18 = vpop.f32.mrb[15].mxu1 }
 0x996   :  { %v6736_v40 = vmul.f32 -1.442695, %v1499_v36 }
 0x997   :  { %v6738_v22 = vmul.f32 -1.442695, %v1578_v17 }
 0x999   :  { %8668 = vpow2.f32 %v6738_v22 }
 0x9a3   :  { %v8669_v23 = vpop.eup %8668 }
 0x9a4   :  { %v1584_v24 = vadd.f32 1.0, %v8669_v23 }
 0x9a6   :  { %8670 = vrcp.f32 %v1584_v24 }
 0x9b0   :  { %v8671_v27 = vpop.eup %8670 }
 0x9b1   :  { %v1587_v28 = vmul.f32 %v8671_v27, %v9612_v56 }
 0x9b3   :  { %7430 = vmatmul.mubr.msk.f32.vlgmr.msra.gmra.mrb[20].mxu0 %vm438_vm2, %v1587_v28 }
 0x9b4   :  { %8246 = vmatpush3.bf16.msra.mxu0 %v9312_v4  ;;  %7451 = vmatprep.mubr.msk.f32.mxu0 %vm9069_vm0, %v9070_v6 }
 0x9b5   :  { %8247 = vmatprep.subr.bf16.mxu0 %v9068_v3 }
 0x9b8   :  { %8249 = vmatpush3.bf16.msra.mxu0 %v9320_v7 }
 0x9b9   :  { %8256 = vmatprep.subr.bf16.mxu0 %v9068_v3 }
 0xa86   :  { %v1659_v30 = vpop.f32.mrb[20].mxu0 }
 0xa87   :  { %v1660_v33 = vadd.f32 %v1659_v30, %v1589_v29  ;;  %v7431_v34 = vpop.f32.mrb[21].mxu0 }
 0xa89   :  { %8672 = vtanh.f32 %v1660_v33 }
 0xa8a   :  { %8674 = vpow2.f32 %v6736_v40 }
 0xa93   :  { %v8673_v35 = vpop.eup %8672 }
 0xa94   :  { %7441 = vmatmul.mubr.msk.f32.vlgmr.msra.gmra.mrb[16].mxu1 %vm438_vm2, %v8673_v35  ;;  %v8675_v42 = vpop.eup %8674 }
 0xa95   :  { %8252 = vmatpush3.bf16.msra.mxu1 %v9337_v11  ;;  %7462 = vmatprep.mubr.msk.f32.mxu1 %vm9069_vm0, %v9070_v6  ;;  %v1505_v43 = vadd.f32 1.0, %v8675_v42  ;;  %v2202_v42 = vld [vmem:[#allocation4 + $0x10] sm:$0xff] }
 0xa96   :  { %8253 = vmatprep.subr.bf16.mxu1 %v9068_v3 }
 0xa97   :  { %8676 = vrcp.f32 %v1505_v43 }
 0xa99   :  { %8255 = vmatpush3.bf16.msra.mxu1 %v9343_v13 }
 0xa9a   :  { %8262 = vmatprep.subr.bf16.mxu1 %v9068_v3 }
 0xaa1   :  { %v8677_v47 = vpop.eup %8676 }
 0xaa2   :  { %v1738_v48 = vsub.f32 1.0, %v8677_v47  ;;  %v1740_v50 = vmul.f32 %v8677_v47, %v9612_v56 }
 0xb67   :  { %v1733_v44 = vpop.f32.mrb[16].mxu1 }
 0xb68   :  { %v1734_v45 = vadd.f32 %v9592_v32, %v1733_v44  ;;  %v7442_v46 = vpop.f32.mrb[17].mxu1 }
 0xb6a   :  { %8678 = vtanh.f32 %v1734_v45 }
 0xb74   :  { %v8679_v62 = vpop.eup %8678 }
 0xb75   :  { %v1739_v49 = vmul.f32 %v8679_v62, %v1738_v48 }
 0xb77   :  { %v1741_v51 = vadd.f32 %v1740_v50, %v1739_v49 }
 0xb79   :  { %7452 = vmatmul.mubr.msk.f32.vlgmr.msra.gmra.mrb[22].mxu0 %vm438_vm2, %v1741_v51 }
 0xb7a   :  { %8258 = vmatpush3.bf16.msra.mxu0 %v9366_v20  ;;  %7473 = vmatprep.mubr.msk.f32.mxu0 %vm9069_vm0, %v9070_v6 }
 0xb7b   :  { %8259 = vmatprep.subr.bf16.mxu0 %v9068_v3 }
 0xb7e   :  { %8261 = vmatpush3.bf16.msra.mxu0 %v9415_v37 }
 0xb7f   :  { %8268 = vmatprep.subr.bf16.mxu0 %v9068_v3 }
 0xc4c   :  { %v1812_v52 = vpop.f32.mrb[22].mxu0 }
 0xc4d   :  { %v1813_v53 = vadd.f32 %v9387_v25, %v1812_v52  ;;  %v7453_v57 = vpop.f32.mrb[23].mxu0 }
 0xc4f   :  { %8680 = vtanh.f32 %v1813_v53 }
 0xc59   :  { %v8681_v56 = vpop.eup %8680 }
 0xc5a   :  { %7463 = vmatmul.mubr.msk.f32.vlgmr.msra.gmra.mrb[18].mxu1 %vm438_vm2, %v8681_v56 }
 0xc5b   :  { %8264 = vmatpush3.bf16.msra.mxu1 %v9396_v31  ;;  %7484 = vmatprep.mubr.msk.f32.mxu1 %vm9069_vm0, %v9070_v6 }
 0xc5c   :  { %8265 = vmatprep.subr.bf16.mxu1 %v9068_v3 }
 0xc5f   :  { %8267 = vmatpush3.bf16.msra.mxu1 %v9421_v39 }
 0xc60   :  { %8274 = vmatprep.subr.bf16.mxu1 %v9068_v3 }
 0xd2d   :  { %v1886_v58 = vpop.f32.mrb[18].mxu1 }
 0xd2e   :  { %v1887_v60 = vadd.f32 %v9452_v55, %v1886_v58  ;;  %v7464_v61 = vpop.f32.mrb[19].mxu1 }
 0xd30   :  { %v1891_v63 = vmul.f32 %v1890_v59, %v1887_v60 }
 0xd32   :  { %v9679_v0 = vadd.f32 %v1891_v63, %v1741_v51 }
 0xd34   :  { %7474 = vmatmul.mubr.msk.f32.vlgmr.msra.gmra.mrb[24].mxu0 %vm438_vm2, %v9679_v0  ;;  %7485 = vmatmul.mubr.msk.f32.vlgmr.msra.gmra.mrb[20].mxu1 %vm438_vm2, %v9679_v0 }
 0xd35   :  { %8270 = vmatpush3.bf16.msra.mxu0 %v9481_v10  ;;  %8276 = vmatpush3.bf16.msra.mxu1 %v9493_v16 }
 0xd36   :  { %8271 = vmatprep.subr.bf16.mxu0 %v9068_v3  ;;  %8277 = vmatprep.subr.bf16.mxu1 %v9068_v3 }
 0xd37   :  { %7495 = vmatprep.mubr.msk.f32.mxu0 %vm9069_vm0, %v9070_v6  ;;  %7506 = vmatprep.mubr.msk.f32.mxu1 %vm9069_vm0, %v9070_v6 }
 0xd39   :  { %8273 = vmatpush3.bf16.msra.mxu0 %v9502_v19  ;;  %8279 = vmatpush3.bf16.msra.mxu1 %v9506_v21 }
 0xd3a   :  { %8280 = vmatprep.subr.bf16.mxu0 %v9068_v3  ;;  %8286 = vmatprep.subr.bf16.mxu1 %v9068_v3 }
 0xe07   :  { %v1964_v2 = vpop.f32.mrb[24].mxu0  ;;  %v2037_v8 = vpop.f32.mrb[20].mxu1 }
 0xe08   :  { %v1965_v9 = vadd.f32 %v1964_v2, %v1894_v1  ;;  %v2038_v14 = vadd.f32 %v2037_v8, %v1970_v5  ;;  %v7475_v17 = vpop.f32.mrb[25].mxu0  ;;  %v7486_v18 = vpop.f32.mrb[21].mxu1  ;;  %v2503_v5 = vstv %s6752_s11 }
 0xe09   :  { %v2507_v17 = vld [vmem:[#allocation2 + $0x18] sm:$0xff] }
 0xe0a   :  { %8682 = vtanh.f32 %v1965_v9 }
 0xe0b   :  { %8684 = vtanh.f32 %v2038_v14 }
 0xe14   :  { %v8683_v22 = vpop.eup %8682 }
 0xe15   :  { %v8685_v23 = vpop.eup %8684  ;;  %7496 = vmatmul.mubr.msk.f32.vlgmr.msra.gmra.mrb[26].mxu0 %vm438_vm2, %v8683_v22  ;;  %v2583_v22 = vld [vmem:[#allocation3 + $0x18] sm:$0xff] }
 0xe16   :  { %7507 = vmatmul.mubr.msk.f32.vlgmr.msra.gmra.mrb[22].mxu1 %vm438_vm2, %v8685_v23  ;;  %8282 = vmatpush3.bf16.msra.mxu0 %v9528_v38 }
 0xe17   :  { %8283 = vmatprep.subr.bf16.mxu0 %v9068_v3  ;;  %7517 = vmatprep.mubr.msk.f32.mxu0 %vm9069_vm0, %v9070_v6 }
 0xe18   :  { %8288 = vmatpush3.bf16.msra.mxu1 %v9571_v12  ;;  %7528 = vmatprep.mubr.msk.f32.mxu1 %vm9069_vm0, %v9070_v6 }
 0xe19   :  { %8289 = vmatprep.subr.bf16.mxu1 %v9068_v3 }
 0xe1a   :  { %8285 = vmatpush3.bf16.msra.mxu0 %v9534_v41 }
 0xe1b   :  { %8292 = vmatprep.subr.bf16.mxu0 %v9068_v3 }
 0xe1c   :  { %8291 = vmatpush3.bf16.msra.mxu1 %v9577_v15 }
 0xe1d   :  { %8298 = vmatprep.subr.bf16.mxu1 %v9068_v3 }
 0xee8   :  { %v2111_v24 = vpop.f32.mrb[26].mxu0 }
 0xee9   :  { %v2190_v27 = vpop.f32.mrb[22].mxu1  ;;  %v7497_v28 = vpop.f32.mrb[27].mxu0  ;;  %v2112_v47 = vadd.f32 %v9589_v26, %v2111_v24 }
 0xeea   :  { %v2191_v29 = vadd.f32 %v9551_v54, %v2190_v27  ;;  %v7508_v30 = vpop.f32.mrb[23].mxu1 }
 0xeeb   :  { %v6747_v48 = vmul.f32 -1.442695, %v2112_v47 }
 0xeec   :  { %v6749_v33 = vmul.f32 -1.442695, %v2191_v29 }
 0xeee   :  { %8686 = vpow2.f32 %v6749_v33 }
 0xef8   :  { %v8687_v34 = vpop.eup %8686 }
 0xef9   :  { %v2197_v35 = vadd.f32 1.0, %v8687_v34 }
 0xefb   :  { %8688 = vrcp.f32 %v2197_v35 }
 0xf05   :  { %v8689_v36 = vpop.eup %8688 }
 0xf06   :  { %v2200_v40 = vmul.f32 %v8689_v36, %v9679_v0 }
 0xf08   :  { %7518 = vmatmul.mubr.msk.f32.vlgmr.msra.gmra.mrb[28].mxu0 %vm438_vm2, %v2200_v40 }
 0xf09   :  { %8294 = vmatpush3.bf16.msra.mxu0 %v9312_v4  ;;  %7539 = vmatprep.mubr.msk.f32.mxu0 %vm9069_vm0, %v9070_v6 }
 0xf0a   :  { %8295 = vmatprep.subr.bf16.mxu0 %v9068_v3 }
 0xf0d   :  { %8297 = vmatpush3.bf16.msra.mxu0 %v9320_v7 }
 0xf0e   :  { %8304 = vmatprep.subr.bf16.mxu0 %v9068_v3 }
 0xfdb   :  { %v2272_v43 = vpop.f32.mrb[28].mxu0 }
 0xfdc   :  { %v2273_v44 = vadd.f32 %v2272_v43, %v2202_v42  ;;  %v7519_v45 = vpop.f32.mrb[29].mxu0 }
 0xfde   :  { %8690 = vtanh.f32 %v2273_v44 }
 0xfdf   :  { %8692 = vpow2.f32 %v6747_v48  ;;  %v2815_v48 = vld [vmem:[#allocation4 + $0x18] sm:$0xff] }
 0xfe8   :  { %v8691_v46 = vpop.eup %8690 }
 0xfe9   :  { %7529 = vmatmul.mubr.msk.f32.vlgmr.msra.gmra.mrb[24].mxu1 %vm438_vm2, %v8691_v46  ;;  %v8693_v62 = vpop.eup %8692 }
 0xfea   :  { %8300 = vmatpush3.bf16.msra.mxu1 %v9337_v11  ;;  %7550 = vmatprep.mubr.msk.f32.mxu1 %vm9069_vm0, %v9070_v6  ;;  %v2118_v49 = vadd.f32 1.0, %v8693_v62 }
 0xfeb   :  { %8301 = vmatprep.subr.bf16.mxu1 %v9068_v3 }
 0xfec   :  { %8694 = vrcp.f32 %v2118_v49 }
 0xfee   :  { %8303 = vmatpush3.bf16.msra.mxu1 %v9343_v13 }
 0xfef   :  { %8310 = vmatprep.subr.bf16.mxu1 %v9068_v3 }
 0xff6   :  { %v8695_v53 = vpop.eup %8694 }
 0xff7   :  { %v2351_v57 = vsub.f32 1.0, %v8695_v53  ;;  %v2353_v59 = vmul.f32 %v8695_v53, %v9679_v0 }
0x10bc   :  { %v2346_v50 = vpop.f32.mrb[24].mxu1 }
0x10bd   :  { %v2347_v51 = vadd.f32 %v9592_v32, %v2346_v50  ;;  %v7530_v52 = vpop.f32.mrb[25].mxu1 }
0x10bf   :  { %8696 = vtanh.f32 %v2347_v51 }
0x10c9   :  { %v8697_v56 = vpop.eup %8696 }
0x10ca   :  { %v2352_v58 = vmul.f32 %v8697_v56, %v2351_v57 }
0x10cc   :  { %v2354_v60 = vadd.f32 %v2353_v59, %v2352_v58 }
0x10ce   :  { %7540 = vmatmul.mubr.msk.f32.vlgmr.msra.gmra.mrb[30].mxu0 %vm438_vm2, %v2354_v60 }
0x10cf   :  { %8306 = vmatpush3.bf16.msra.mxu0 %v9366_v20  ;;  %7561 = vmatprep.mubr.msk.f32.mxu0 %vm9069_vm0, %v9070_v6 }
0x10d0   :  { %8307 = vmatprep.subr.bf16.mxu0 %v9068_v3 }
0x10d3   :  { %8309 = vmatpush3.bf16.msra.mxu0 %v9415_v37 }
0x10d4   :  { %8316 = vmatprep.subr.bf16.mxu0 %v9068_v3 }
0x11a1   :  { %v2425_v61 = vpop.f32.mrb[30].mxu0 }
0x11a2   :  { %v2426_v63 = vadd.f32 %v9387_v25, %v2425_v61  ;;  %v7541_v1 = vpop.f32.mrb[31].mxu0 }
0x11a4   :  { %8698 = vtanh.f32 %v2426_v63 }
0x11ae   :  { %v8699_v0 = vpop.eup %8698 }
0x11af   :  { %7551 = vmatmul.mubr.msk.f32.vlgmr.msra.gmra.mrb[26].mxu1 %vm438_vm2, %v8699_v0 }
0x11b0   :  { %8312 = vmatpush3.bf16.msra.mxu1 %v9396_v31  ;;  %7572 = vmatprep.mubr.msk.f32.mxu1 %vm9069_vm0, %v9070_v6 }
0x11b1   :  { %8313 = vmatprep.subr.bf16.mxu1 %v9068_v3 }
0x11b4   :  { %8315 = vmatpush3.bf16.msra.mxu1 %v9421_v39 }
0x11b5   :  { %8322 = vmatprep.subr.bf16.mxu1 %v9068_v3 }
0x1282   :  { %v2499_v2 = vpop.f32.mrb[26].mxu1 }
0x1283   :  { %v2500_v25 = vadd.f32 %v9452_v55, %v2499_v2  ;;  %v7552_v8 = vpop.f32.mrb[27].mxu1 }
0x1284   :  { %v9804_v8 = vld [vmem:[#allocation11] ss:$0 sm:$0xff] }
0x1285   :  { %v2504_v9 = vmul.f32 %v2503_v5, %v2500_v25 }
0x1287   :  { %v9746_v14 = vadd.f32 %v2504_v9, %v2354_v60 }
0x1289   :  { %7562 = vmatmul.mubr.msk.f32.vlgmr.msra.gmra.mrb[32].mxu0 %vm438_vm2, %v9746_v14  ;;  %7573 = vmatmul.mubr.msk.f32.vlgmr.msra.gmra.mrb[28].mxu1 %vm438_vm2, %v9746_v14 }
0x128a   :  { %8318 = vmatpush3.bf16.msra.mxu0 %v9481_v10  ;;  %8324 = vmatpush3.bf16.msra.mxu1 %v9493_v16 }
0x128b   :  { %8319 = vmatprep.subr.bf16.mxu0 %v9068_v3  ;;  %8325 = vmatprep.subr.bf16.mxu1 %v9068_v3 }
0x128c   :  { %7583 = vmatprep.mubr.msk.f32.mxu0 %vm9069_vm0, %v9070_v6  ;;  %7594 = vmatprep.mubr.msk.f32.mxu1 %vm9069_vm0, %v9070_v6 }
0x128e   :  { %8321 = vmatpush3.bf16.msra.mxu0 %v9502_v19  ;;  %8327 = vmatpush3.bf16.msra.mxu1 %v9506_v21 }
0x128f   :  { %8328 = vmatprep.subr.bf16.mxu0 %v9068_v3  ;;  %8334 = vmatprep.subr.bf16.mxu1 %v9068_v3 }
0x135c   :  { %v2577_v18 = vpop.f32.mrb[32].mxu0  ;;  %v2650_v23 = vpop.f32.mrb[28].mxu1 }
0x135d   :  { %v2578_v24 = vadd.f32 %v2577_v18, %v2507_v17  ;;  %v2651_v27 = vadd.f32 %v2650_v23, %v2583_v22  ;;  %v7563_v28 = vpop.f32.mrb[33].mxu0  ;;  %v7574_v29 = vpop.f32.mrb[29].mxu1  ;;  %v3116_v22 = vstv %s6763_s22 }
0x135f   :  { %8700 = vtanh.f32 %v2578_v24 }
0x1360   :  { %8702 = vtanh.f32 %v2651_v27 }
0x1369   :  { %v8701_v30 = vpop.eup %8700 }
0x136a   :  { %v8703_v33 = vpop.eup %8702  ;;  %7584 = vmatmul.mubr.msk.f32.vlgmr.msra.gmra.mrb[34].mxu0 %vm438_vm2, %v8701_v30  ;;  %v3196_v30 = vld [vmem:[#allocation3 + $0x20] sm:$0xff] }
0x136b   :  { %7595 = vmatmul.mubr.msk.f32.vlgmr.msra.gmra.mrb[30].mxu1 %vm438_vm2, %v8703_v33  ;;  %8330 = vmatpush3.bf16.msra.mxu0 %v9528_v38 }
0x136c   :  { %8331 = vmatprep.subr.bf16.mxu0 %v9068_v3  ;;  %7605 = vmatprep.mubr.msk.f32.mxu0 %vm9069_vm0, %v9070_v6 }
0x136d   :  { %8336 = vmatpush3.bf16.msra.mxu1 %v9571_v12  ;;  %7616 = vmatprep.mubr.msk.f32.mxu1 %vm9069_vm0, %v9070_v6 }
0x136e   :  { %8337 = vmatprep.subr.bf16.mxu1 %v9068_v3 }
0x136f   :  { %8333 = vmatpush3.bf16.msra.mxu0 %v9534_v41 }
0x1370   :  { %8340 = vmatprep.subr.bf16.mxu0 %v9068_v3 }
0x1371   :  { %8339 = vmatpush3.bf16.msra.mxu1 %v9577_v15 }
0x1372   :  { %8346 = vmatprep.subr.bf16.mxu1 %v9068_v3 }
0x143d   :  { %v2724_v34 = vpop.f32.mrb[34].mxu0 }
0x143e   :  { %v2803_v35 = vpop.f32.mrb[30].mxu1  ;;  %v7585_v36 = vpop.f32.mrb[35].mxu0  ;;  %v2725_v52 = vadd.f32 %v9589_v26, %v2724_v34 }
0x143f   :  { %v2804_v40 = vadd.f32 %v9551_v54, %v2803_v35  ;;  %v7596_v42 = vpop.f32.mrb[31].mxu1 }
0x1440   :  { %v6758_v53 = vmul.f32 -1.442695, %v2725_v52 }
0x1441   :  { %v6760_v43 = vmul.f32 -1.442695, %v2804_v40 }
0x1443   :  { %8704 = vpow2.f32 %v6760_v43 }
0x144d   :  { %v8705_v44 = vpop.eup %8704 }
0x144e   :  { %v2810_v45 = vadd.f32 1.0, %v8705_v44 }
0x1450   :  { %8706 = vrcp.f32 %v2810_v45 }
0x145a   :  { %v8707_v46 = vpop.eup %8706 }
0x145b   :  { %v2813_v47 = vmul.f32 %v8707_v46, %v9746_v14 }
0x145d   :  { %7606 = vmatmul.mubr.msk.f32.vlgmr.msra.gmra.mrb[36].mxu0 %vm438_vm2, %v2813_v47 }
0x145e   :  { %8342 = vmatpush3.bf16.msra.mxu0 %v9312_v4  ;;  %7627 = vmatprep.mubr.msk.f32.mxu0 %vm9069_vm0, %v9070_v6 }
0x145f   :  { %8343 = vmatprep.subr.bf16.mxu0 %v9068_v3 }
0x1462   :  { %8345 = vmatpush3.bf16.msra.mxu0 %v9320_v7 }
0x1463   :  { %8352 = vmatprep.subr.bf16.mxu0 %v9068_v3 }
0x1530   :  { %v2885_v62 = vpop.f32.mrb[36].mxu0 }
0x1531   :  { %v2886_v49 = vadd.f32 %v2885_v62, %v2815_v48  ;;  %v7607_v50 = vpop.f32.mrb[37].mxu0 }
0x1533   :  { %8708 = vtanh.f32 %v2886_v49 }
0x1534   :  { %8710 = vpow2.f32 %v6758_v53 }
0x153d   :  { %v8709_v51 = vpop.eup %8708 }
0x153e   :  { %7617 = vmatmul.mubr.msk.f32.vlgmr.msra.gmra.mrb[32].mxu1 %vm438_vm2, %v8709_v51  ;;  %v8711_v57 = vpop.eup %8710 }
0x153f   :  { %8348 = vmatpush3.bf16.msra.mxu1 %v9337_v11  ;;  %7638 = vmatprep.mubr.msk.f32.mxu1 %vm9069_vm0, %v9070_v6  ;;  %v2731_v56 = vadd.f32 1.0, %v8711_v57 }
0x1540   :  { %8349 = vmatprep.subr.bf16.mxu1 %v9068_v3 }
0x1541   :  { %8712 = vrcp.f32 %v2731_v56 }
0x1543   :  { %8351 = vmatpush3.bf16.msra.mxu1 %v9343_v13 }
0x1544   :  { %8358 = vmatprep.subr.bf16.mxu1 %v9068_v3 }
0x154b   :  { %v8713_v61 = vpop.eup %8712 }
0x154c   :  { %v2964_v63 = vsub.f32 1.0, %v8713_v61  ;;  %v2966_v2 = vmul.f32 %v8713_v61, %v9746_v14 }
0x1611   :  { %v2959_v58 = vpop.f32.mrb[32].mxu1 }
0x1612   :  { %v2960_v59 = vadd.f32 %v9592_v32, %v2959_v58  ;;  %v7618_v60 = vpop.f32.mrb[33].mxu1 }
0x1614   :  { %8714 = vtanh.f32 %v2960_v59 }
0x161e   :  { %v8715_v1 = vpop.eup %8714 }
0x161f   :  { %v2965_v0 = vmul.f32 %v8715_v1, %v2964_v63 }
0x1621   :  { %v2967_v5 = vadd.f32 %v2966_v2, %v2965_v0 }
0x1623   :  { %7628 = vmatmul.mubr.msk.f32.vlgmr.msra.gmra.mrb[38].mxu0 %vm438_vm2, %v2967_v5 }
0x1624   :  { %8354 = vmatpush3.bf16.msra.mxu0 %v9366_v20  ;;  %7649 = vmatprep.mubr.msk.f32.mxu0 %vm9069_vm0, %v9070_v6 }
0x1625   :  { %8355 = vmatprep.subr.bf16.mxu0 %v9068_v3 }
0x1628   :  { %8357 = vmatpush3.bf16.msra.mxu0 %v9415_v37 }
0x1629   :  { %8364 = vmatprep.subr.bf16.mxu0 %v9068_v3 }
0x16f6   :  { %v3038_v25 = vpop.f32.mrb[38].mxu0 }
0x16f7   :  { %v3039_v9 = vadd.f32 %v9804_v8, %v3038_v25  ;;  %v7629_v14 = vpop.f32.mrb[39].mxu0 }
0x16f9   :  { %8716 = vtanh.f32 %v3039_v9 }
0x1703   :  { %v8717_v17 = vpop.eup %8716 }
0x1704   :  { %7639 = vmatmul.mubr.msk.f32.vlgmr.msra.gmra.mrb[34].mxu1 %vm438_vm2, %v8717_v17 }
0x1705   :  { %8360 = vmatpush3.bf16.msra.mxu1 %v9396_v31  ;;  %7660 = vmatprep.mubr.msk.f32.mxu1 %vm9069_vm0, %v9070_v6 }
0x1706   :  { %8361 = vmatprep.subr.bf16.mxu1 %v9068_v3 }
0x1709   :  { %8363 = vmatpush3.bf16.msra.mxu1 %v9421_v39 }
0x170a   :  { %8370 = vmatprep.subr.bf16.mxu1 %v9068_v3 }
0x17d7   :  { %v3112_v18 = vpop.f32.mrb[34].mxu1 }
0x17d8   :  { %v3113_v23 = vadd.f32 %v9452_v55, %v3112_v18  ;;  %v7640_v24 = vpop.f32.mrb[35].mxu1  ;;  %v3120_v55 = vld [vmem:[#allocation2 + $0x20] sm:$0xff] }
0x17da   :  { %v3117_v27 = vmul.f32 %v3116_v22, %v3113_v23 }
0x17dc   :  { %v9815_v28 = vadd.f32 %v3117_v27, %v2967_v5  ;;  %v3729_v27 = vstv %s6774_s29 }
0x17de   :  { %7650 = vmatmul.mubr.msk.f32.vlgmr.msra.gmra.mrb[40].mxu0 %vm438_vm2, %v9815_v28  ;;  %7661 = vmatmul.mubr.msk.f32.vlgmr.msra.gmra.mrb[36].mxu1 %vm438_vm2, %v9815_v28 }
0x17df   :  { %8366 = vmatpush3.bf16.msra.mxu0 %v9481_v10  ;;  %8372 = vmatpush3.bf16.msra.mxu1 %v9493_v16 }
0x17e0   :  { %8367 = vmatprep.subr.bf16.mxu0 %v9068_v3  ;;  %8373 = vmatprep.subr.bf16.mxu1 %v9068_v3 }
0x17e1   :  { %7671 = vmatprep.mubr.msk.f32.mxu0 %vm9069_vm0, %v9070_v6  ;;  %7682 = vmatprep.mubr.msk.f32.mxu1 %vm9069_vm0, %v9070_v6 }
0x17e3   :  { %8369 = vmatpush3.bf16.msra.mxu0 %v9502_v19  ;;  %8375 = vmatpush3.bf16.msra.mxu1 %v9506_v21 }
0x17e4   :  { %8376 = vmatprep.subr.bf16.mxu0 %v9068_v3  ;;  %8382 = vmatprep.subr.bf16.mxu1 %v9068_v3 }
0x18b1   :  { %v3190_v29 = vpop.f32.mrb[40].mxu0  ;;  %v3263_v33 = vpop.f32.mrb[36].mxu1 }
0x18b2   :  { %v3191_v34 = vadd.f32 %v3190_v29, %v3120_v55  ;;  %v3264_v35 = vadd.f32 %v3263_v33, %v3196_v30  ;;  %v7651_v36 = vpop.f32.mrb[41].mxu0  ;;  %v7662_v40 = vpop.f32.mrb[37].mxu1 }
0x18b3   :  { %v3809_v36 = vld [vmem:[#allocation3 + $0x28] sm:$0xff] }
0x18b4   :  { %8718 = vtanh.f32 %v3191_v34  ;;  %v3733_v34 = vld [vmem:[#allocation2 + $0x28] sm:$0xff] }
0x18b5   :  { %8720 = vtanh.f32 %v3264_v35 }
0x18be   :  { %v8719_v42 = vpop.eup %8718 }
0x18bf   :  { %v8721_v43 = vpop.eup %8720  ;;  %7672 = vmatmul.mubr.msk.f32.vlgmr.msra.gmra.mrb[42].mxu0 %vm438_vm2, %v8719_v42 }
0x18c0   :  { %7683 = vmatmul.mubr.msk.f32.vlgmr.msra.gmra.mrb[38].mxu1 %vm438_vm2, %v8721_v43  ;;  %8378 = vmatpush3.bf16.msra.mxu0 %v9528_v38 }
0x18c1   :  { %8379 = vmatprep.subr.bf16.mxu0 %v9068_v3  ;;  %7693 = vmatprep.mubr.msk.f32.mxu0 %vm9069_vm0, %v9070_v6 }
0x18c2   :  { %8384 = vmatpush3.bf16.msra.mxu1 %v9571_v12  ;;  %7704 = vmatprep.mubr.msk.f32.mxu1 %vm9069_vm0, %v9070_v6 }
0x18c3   :  { %8385 = vmatprep.subr.bf16.mxu1 %v9068_v3 }
0x18c4   :  { %8381 = vmatpush3.bf16.msra.mxu0 %v9534_v41 }
0x18c5   :  { %8388 = vmatprep.subr.bf16.mxu0 %v9068_v3 }
0x18c6   :  { %8387 = vmatpush3.bf16.msra.mxu1 %v9577_v15 }
0x18c7   :  { %8394 = vmatprep.subr.bf16.mxu1 %v9068_v3 }
0x1992   :  { %v3337_v44 = vpop.f32.mrb[42].mxu0 }
0x1993   :  { %v3416_v45 = vpop.f32.mrb[38].mxu1  ;;  %v7673_v46 = vpop.f32.mrb[43].mxu0  ;;  %v3338_v59 = vadd.f32 %v9589_v26, %v3337_v44 }
0x1994   :  { %v3417_v47 = vadd.f32 %v9551_v54, %v3416_v45  ;;  %v7684_v48 = vpop.f32.mrb[39].mxu1  ;;  %v3428_v54 = vld [vmem:[#allocation4 + $0x20] sm:$0xff] }
0x1995   :  { %v6769_v60 = vmul.f32 -1.442695, %v3338_v59  ;;  %v4041_v59 = vld [vmem:[#allocation4 + $0x28] sm:$0xff] }
0x1996   :  { %v6771_v62 = vmul.f32 -1.442695, %v3417_v47 }
0x1998   :  { %8722 = vpow2.f32 %v6771_v62 }
0x19a2   :  { %v8723_v49 = vpop.eup %8722 }
0x19a3   :  { %v3423_v50 = vadd.f32 1.0, %v8723_v49 }
0x19a5   :  { %8724 = vrcp.f32 %v3423_v50  ;;  %v9916_v50 = vld [vmem:[#allocation14 + $0x1] ss:$0 sm:$0xff] }
0x19af   :  { %v8725_v51 = vpop.eup %8724 }
0x19b0   :  { %v3426_v52 = vmul.f32 %v8725_v51, %v9815_v28 }
0x19b2   :  { %7694 = vmatmul.mubr.msk.f32.vlgmr.msra.gmra.mrb[44].mxu0 %vm438_vm2, %v3426_v52 }
0x19b3   :  { %8390 = vmatpush3.bf16.msra.mxu0 %v9312_v4  ;;  %7715 = vmatprep.mubr.msk.f32.mxu0 %vm9069_vm0, %v9070_v6 }
0x19b4   :  { %8391 = vmatprep.subr.bf16.mxu0 %v9068_v3 }
0x19b7   :  { %8393 = vmatpush3.bf16.msra.mxu0 %v9320_v7 }
0x19b8   :  { %8400 = vmatprep.subr.bf16.mxu0 %v9068_v3 }
0x1a85   :  { %v3498_v53 = vpop.f32.mrb[44].mxu0 }
0x1a86   :  { %v3499_v57 = vadd.f32 %v3498_v53, %v3428_v54  ;;  %v7695_v56 = vpop.f32.mrb[45].mxu0 }
0x1a88   :  { %8726 = vtanh.f32 %v3499_v57 }
0x1a89   :  { %8728 = vpow2.f32 %v6769_v60 }
0x1a92   :  { %v8727_v58 = vpop.eup %8726 }
0x1a93   :  { %7705 = vmatmul.mubr.msk.f32.vlgmr.msra.gmra.mrb[40].mxu1 %vm438_vm2, %v8727_v58  ;;  %v8729_v61 = vpop.eup %8728 }
0x1a94   :  { %8396 = vmatpush3.bf16.msra.mxu1 %v9337_v11  ;;  %7726 = vmatprep.mubr.msk.f32.mxu1 %vm9069_vm0, %v9070_v6  ;;  %v3344_v63 = vadd.f32 1.0, %v8729_v61 }
0x1a95   :  { %8397 = vmatprep.subr.bf16.mxu1 %v9068_v3 }
0x1a96   :  { %8730 = vrcp.f32 %v3344_v63 }
0x1a98   :  { %8399 = vmatpush3.bf16.msra.mxu1 %v9343_v13 }
0x1a99   :  { %8406 = vmatprep.subr.bf16.mxu1 %v9068_v3 }
0x1aa0   :  { %v8731_v5 = vpop.eup %8730 }
0x1aa1   :  { %v3577_v25 = vsub.f32 1.0, %v8731_v5  ;;  %v3579_v17 = vmul.f32 %v8731_v5, %v9815_v28  ;;  %v9881_v28 = vld [vmem:[#allocation11 + $0x1] ss:$0 sm:$0xff] }
0x1b66   :  { %v3572_v1 = vpop.f32.mrb[40].mxu1 }
0x1b67   :  { %v3573_v0 = vadd.f32 %v9592_v32, %v3572_v1  ;;  %v7706_v2 = vpop.f32.mrb[41].mxu1 }
0x1b69   :  { %8732 = vtanh.f32 %v3573_v0  ;;  %v9934_v0 = vld [vmem:[#allocation14] ss:$0 sm:$0xff] }
0x1b73   :  { %v8733_v9 = vpop.eup %8732 }
0x1b74   :  { %v3578_v14 = vmul.f32 %v8733_v9, %v3577_v25 }
0x1b76   :  { %v3580_v18 = vadd.f32 %v3579_v17, %v3578_v14  ;;  %v9937_v17 = vld [vmem:[#allocation14 + $0x2] ss:$0 sm:$0xff] }
0x1b78   :  { %7716 = vmatmul.mubr.msk.f32.vlgmr.msra.gmra.mrb[46].mxu0 %vm438_vm2, %v3580_v18 }
0x1b79   :  { %8402 = vmatpush3.bf16.msra.mxu0 %v9366_v20  ;;  %7737 = vmatprep.mubr.msk.f32.mxu0 %vm9069_vm0, %v9070_v6 }
0x1b7a   :  { %8403 = vmatprep.subr.bf16.mxu0 %v9068_v3 }
0x1b7d   :  { %8405 = vmatpush3.bf16.msra.mxu0 %v9415_v37 }
0x1b7e   :  { %8412 = vmatprep.subr.bf16.mxu0 %v9068_v3 }
0x1c4b   :  { %v3651_v26 = vpop.f32.mrb[46].mxu0 }
0x1c4c   :  { %v3652_v32 = vadd.f32 %v9804_v8, %v3651_v26  ;;  %v7717_v22 = vpop.f32.mrb[47].mxu0 }
0x1c4e   :  { %8734 = vtanh.f32 %v3652_v32 }
0x1c58   :  { %v8735_v23 = vpop.eup %8734 }
0x1c59   :  { %7727 = vmatmul.mubr.msk.f32.vlgmr.msra.gmra.mrb[42].mxu1 %vm438_vm2, %v8735_v23 }
0x1c5a   :  { %8408 = vmatpush3.bf16.msra.mxu1 %v9396_v31  ;;  %7748 = vmatprep.mubr.msk.f32.mxu1 %vm9069_vm0, %v9070_v6 }
0x1c5b   :  { %8409 = vmatprep.subr.bf16.mxu1 %v9068_v3 }
0x1c5e   :  { %8411 = vmatpush3.bf16.msra.mxu1 %v9421_v39 }
0x1c5f   :  { %8418 = vmatprep.subr.bf16.mxu1 %v9068_v3 }
0x1d2c   :  { %v3725_v24 = vpop.f32.mrb[42].mxu1 }
0x1d2d   :  { %v3726_v55 = vadd.f32 %v9881_v28, %v3725_v24  ;;  %v7728_v29 = vpop.f32.mrb[43].mxu1 }
0x1d2f   :  { %v3730_v30 = vmul.f32 %v3729_v27, %v3726_v55 }
0x1d31   :  { %v9884_v33 = vadd.f32 %v3730_v30, %v3580_v18 }
0x1d33   :  { %7738 = vmatmul.mubr.msk.f32.vlgmr.msra.gmra.mrb[48].mxu0 %vm438_vm2, %v9884_v33  ;;  %7749 = vmatmul.mubr.msk.f32.vlgmr.msra.gmra.mrb[44].mxu1 %vm438_vm2, %v9884_v33 }
0x1d34   :  { %8414 = vmatpush3.bf16.msra.mxu0 %v9481_v10  ;;  %8420 = vmatpush3.bf16.msra.mxu1 %v9493_v16 }
0x1d35   :  { %8415 = vmatprep.subr.bf16.mxu0 %v9068_v3  ;;  %8421 = vmatprep.subr.bf16.mxu1 %v9068_v3 }
0x1d36   :  { %7759 = vmatprep.mubr.msk.f32.mxu0 %vm9069_vm0, %v9070_v6  ;;  %7770 = vmatprep.mubr.msk.f32.mxu1 %vm9069_vm0, %v9070_v6 }
0x1d38   :  { %8417 = vmatpush3.bf16.msra.mxu0 %v9502_v19  ;;  %8423 = vmatpush3.bf16.msra.mxu1 %v9506_v21 }
0x1d39   :  { %8424 = vmatprep.subr.bf16.mxu0 %v9068_v3  ;;  %8430 = vmatprep.subr.bf16.mxu1 %v9068_v3 }
0x1e06   :  { %v3803_v35 = vpop.f32.mrb[48].mxu0  ;;  %v3876_v40 = vpop.f32.mrb[44].mxu1 }
0x1e07   :  { %v3804_v42 = vadd.f32 %v3803_v35, %v3733_v34  ;;  %v3877_v43 = vadd.f32 %v3876_v40, %v3809_v36  ;;  %v7739_v44 = vpop.f32.mrb[49].mxu0  ;;  %v7750_v45 = vpop.f32.mrb[45].mxu1  ;;  %v4342_v36 = vstv %s6785_s0 }
0x1e08   :  { %v4346_v45 = vld [vmem:[#allocation2 + $0x30] sm:$0xff] }
0x1e09   :  { %8736 = vtanh.f32 %v3804_v42 }
0x1e0a   :  { %8738 = vtanh.f32 %v3877_v43 }
0x1e13   :  { %v8737_v46 = vpop.eup %8736 }
0x1e14   :  { %v8739_v47 = vpop.eup %8738  ;;  %7760 = vmatmul.mubr.msk.f32.vlgmr.msra.gmra.mrb[50].mxu0 %vm438_vm2, %v8737_v46 }
0x1e15   :  { %7771 = vmatmul.mubr.msk.f32.vlgmr.msra.gmra.mrb[46].mxu1 %vm438_vm2, %v8739_v47  ;;  %8426 = vmatpush3.bf16.msra.mxu0 %v9528_v38  ;;  %v4422_v47 = vld [vmem:[#allocation3 + $0x30] sm:$0xff] }
0x1e16   :  { %8427 = vmatprep.subr.bf16.mxu0 %v9068_v3  ;;  %7781 = vmatprep.mubr.msk.f32.mxu0 %vm9069_vm0, %v9070_v6 }
0x1e17   :  { %8432 = vmatpush3.bf16.msra.mxu1 %v9571_v12  ;;  %7792 = vmatprep.mubr.msk.f32.mxu1 %vm9069_vm0, %v9070_v6 }
0x1e18   :  { %8433 = vmatprep.subr.bf16.mxu1 %v9068_v3 }
0x1e19   :  { %8429 = vmatpush3.bf16.msra.mxu0 %v9534_v41 }
0x1e1a   :  { %8436 = vmatprep.subr.bf16.mxu0 %v9068_v3 }
0x1e1b   :  { %8435 = vmatpush3.bf16.msra.mxu1 %v9577_v15 }
0x1e1c   :  { %8442 = vmatprep.subr.bf16.mxu1 %v9068_v3 }
0x1ee7   :  { %v3950_v48 = vpop.f32.mrb[50].mxu0 }
0x1ee8   :  { %v4029_v62 = vpop.f32.mrb[46].mxu1  ;;  %v7761_v49 = vpop.f32.mrb[51].mxu0  ;;  %v3951_v2 = vadd.f32 %v9934_v0, %v3950_v48 }
0x1ee9   :  { %v4030_v51 = vadd.f32 %v9916_v50, %v4029_v62  ;;  %v7772_v52 = vpop.f32.mrb[47].mxu1 }
0x1eea   :  { %v6780_v5 = vmul.f32 -1.442695, %v3951_v2 }
0x1eeb   :  { %v6782_v54 = vmul.f32 -1.442695, %v4030_v51 }
0x1eed   :  { %8740 = vpow2.f32 %v6782_v54 }
0x1ef7   :  { %v8741_v53 = vpop.eup %8740 }
0x1ef8   :  { %v4036_v57 = vadd.f32 1.0, %v8741_v53 }
0x1efa   :  { %8742 = vrcp.f32 %v4036_v57 }
0x1f04   :  { %v8743_v56 = vpop.eup %8742 }
0x1f05   :  { %v4039_v58 = vmul.f32 %v8743_v56, %v9884_v33 }
0x1f07   :  { %7782 = vmatmul.mubr.msk.f32.vlgmr.msra.gmra.mrb[52].mxu0 %vm438_vm2, %v4039_v58 }
0x1f08   :  { %8438 = vmatpush3.bf16.msra.mxu0 %v9312_v4  ;;  %7803 = vmatprep.mubr.msk.f32.mxu0 %vm9069_vm0, %v9070_v6 }
0x1f09   :  { %8439 = vmatprep.subr.bf16.mxu0 %v9068_v3 }
0x1f0c   :  { %8441 = vmatpush3.bf16.msra.mxu0 %v9320_v7 }
0x1f0d   :  { %8448 = vmatprep.subr.bf16.mxu0 %v9068_v3 }
0x1fda   :  { %v4111_v60 = vpop.f32.mrb[52].mxu0 }
0x1fdb   :  { %v4112_v61 = vadd.f32 %v4111_v60, %v4041_v59  ;;  %v7783_v63 = vpop.f32.mrb[53].mxu0 }
0x1fdd   :  { %8744 = vtanh.f32 %v4112_v61 }
0x1fde   :  { %8746 = vpow2.f32 %v6780_v5 }
0x1fe7   :  { %v8745_v1 = vpop.eup %8744 }
0x1fe8   :  { %7793 = vmatmul.mubr.msk.f32.vlgmr.msra.gmra.mrb[48].mxu1 %vm438_vm2, %v8745_v1  ;;  %v8747_v25 = vpop.eup %8746 }
0x1fe9   :  { %8444 = vmatpush3.bf16.msra.mxu1 %v9337_v11  ;;  %7814 = vmatprep.mubr.msk.f32.mxu1 %vm9069_vm0, %v9070_v6  ;;  %v3957_v9 = vadd.f32 1.0, %v8747_v25  ;;  %v4654_v25 = vld [vmem:[#allocation4 + $0x30] sm:$0xff] }
0x1fea   :  { %8445 = vmatprep.subr.bf16.mxu1 %v9068_v3 }
0x1feb   :  { %8748 = vrcp.f32 %v3957_v9 }
0x1fed   :  { %8447 = vmatpush3.bf16.msra.mxu1 %v9343_v13 }
0x1fee   :  { %8454 = vmatprep.subr.bf16.mxu1 %v9068_v3 }
0x1ff5   :  { %v8749_v32 = vpop.eup %8748 }
0x1ff6   :  { %v4190_v22 = vsub.f32 1.0, %v8749_v32  ;;  %v4192_v27 = vmul.f32 %v8749_v32, %v9884_v33 }
0x20bb   :  { %v4185_v14 = vpop.f32.mrb[48].mxu1 }
0x20bc   :  { %v4186_v18 = vadd.f32 %v9937_v17, %v4185_v14  ;;  %v7794_v26 = vpop.f32.mrb[49].mxu1 }
0x20be   :  { %8750 = vtanh.f32 %v4186_v18 }
0x20c8   :  { %v8751_v23 = vpop.eup %8750 }
0x20c9   :  { %v4191_v24 = vmul.f32 %v8751_v23, %v4190_v22 }
0x20cb   :  { %v4193_v55 = vadd.f32 %v4192_v27, %v4191_v24 }
0x20cd   :  { %7804 = vmatmul.mubr.msk.f32.vlgmr.msra.gmra.mrb[54].mxu0 %vm438_vm2, %v4193_v55 }
0x20ce   :  { %8450 = vmatpush3.bf16.msra.mxu0 %v9366_v20  ;;  %7825 = vmatprep.mubr.msk.f32.mxu0 %vm9069_vm0, %v9070_v6 }
0x20cf   :  { %8451 = vmatprep.subr.bf16.mxu0 %v9068_v3 }
0x20d2   :  { %8453 = vmatpush3.bf16.msra.mxu0 %v9415_v37 }
0x20d3   :  { %8460 = vmatprep.subr.bf16.mxu0 %v9068_v3 }
0x21a0   :  { %v4264_v29 = vpop.f32.mrb[54].mxu0 }
0x21a1   :  { %v4265_v30 = vadd.f32 %v9804_v8, %v4264_v29  ;;  %v7805_v34 = vpop.f32.mrb[55].mxu0 }
0x21a3   :  { %8752 = vtanh.f32 %v4265_v30 }
0x21ad   :  { %v8753_v33 = vpop.eup %8752 }
0x21ae   :  { %7815 = vmatmul.mubr.msk.f32.vlgmr.msra.gmra.mrb[50].mxu1 %vm438_vm2, %v8753_v33 }
0x21af   :  { %8456 = vmatpush3.bf16.msra.mxu1 %v9396_v31  ;;  %7836 = vmatprep.mubr.msk.f32.mxu1 %vm9069_vm0, %v9070_v6 }
0x21b0   :  { %8457 = vmatprep.subr.bf16.mxu1 %v9068_v3 }
0x21b3   :  { %8459 = vmatpush3.bf16.msra.mxu1 %v9421_v39 }
0x21b4   :  { %8466 = vmatprep.subr.bf16.mxu1 %v9068_v3 }
0x2281   :  { %v4338_v35 = vpop.f32.mrb[50].mxu1 }
0x2282   :  { %v4339_v40 = vadd.f32 %v9881_v28, %v4338_v35  ;;  %v7816_v42 = vpop.f32.mrb[51].mxu1 }
0x2284   :  { %v4343_v43 = vmul.f32 %v4342_v36, %v4339_v40 }
0x2286   :  { %v9957_v44 = vadd.f32 %v4343_v43, %v4193_v55 }
0x2288   :  { %7826 = vmatmul.mubr.msk.f32.vlgmr.msra.gmra.mrb[56].mxu0 %vm438_vm2, %v9957_v44  ;;  %7837 = vmatmul.mubr.msk.f32.vlgmr.msra.gmra.mrb[52].mxu1 %vm438_vm2, %v9957_v44 }
0x2289   :  { %8462 = vmatpush3.bf16.msra.mxu0 %v9481_v10  ;;  %8468 = vmatpush3.bf16.msra.mxu1 %v9493_v16 }
0x228a   :  { %8463 = vmatprep.subr.bf16.mxu0 %v9068_v3  ;;  %8469 = vmatprep.subr.bf16.mxu1 %v9068_v3 }
0x228b   :  { %7847 = vmatprep.mubr.msk.f32.mxu0 %vm9069_vm0, %v9070_v6  ;;  %7858 = vmatprep.mubr.msk.f32.mxu1 %vm9069_vm0, %v9070_v6 }
0x228d   :  { %8465 = vmatpush3.bf16.msra.mxu0 %v9502_v19  ;;  %8471 = vmatpush3.bf16.msra.mxu1 %v9506_v21 }
0x228e   :  { %8472 = vmatprep.subr.bf16.mxu0 %v9068_v3  ;;  %8478 = vmatprep.subr.bf16.mxu1 %v9068_v3 }
0x235b   :  { %v4416_v46 = vpop.f32.mrb[56].mxu0  ;;  %v4489_v48 = vpop.f32.mrb[52].mxu1 }
0x235c   :  { %v4417_v62 = vadd.f32 %v4416_v46, %v4346_v45  ;;  %v4490_v49 = vadd.f32 %v4489_v48, %v4422_v47  ;;  %v7827_v51 = vpop.f32.mrb[57].mxu0  ;;  %v7838_v52 = vpop.f32.mrb[53].mxu1 }
0x235e   :  { %8754 = vtanh.f32 %v4417_v62 }
0x235f   :  { %8756 = vtanh.f32 %v4490_v49 }
0x2368   :  { %v8755_v54 = vpop.eup %8754 }
0x2369   :  { %v8757_v53 = vpop.eup %8756  ;;  %7848 = vmatmul.mubr.msk.f32.vlgmr.msra.gmra.mrb[58].mxu0 %vm438_vm2, %v8755_v54 }
0x236a   :  { %7859 = vmatmul.mubr.msk.f32.vlgmr.msra.gmra.mrb[54].mxu1 %vm438_vm2, %v8757_v53  ;;  %8474 = vmatpush3.bf16.msra.mxu0 %v9528_v38 }
0x236b   :  { %8475 = vmatprep.subr.bf16.mxu0 %v9068_v3  ;;  %7869 = vmatprep.mubr.msk.f32.mxu0 %vm9069_vm0, %v9070_v6 }
0x236c   :  { %8480 = vmatpush3.bf16.msra.mxu1 %v9571_v12  ;;  %7880 = vmatprep.mubr.msk.f32.mxu1 %vm9069_vm0, %v9070_v6 }
0x236d   :  { %8481 = vmatprep.subr.bf16.mxu1 %v9068_v3 }
0x236e   :  { %8477 = vmatpush3.bf16.msra.mxu0 %v9534_v41 }
0x236f   :  { %8484 = vmatprep.subr.bf16.mxu0 %v9068_v3 }
0x2370   :  { %8483 = vmatpush3.bf16.msra.mxu1 %v9577_v15 }
0x2371   :  { %8490 = vmatprep.subr.bf16.mxu1 %v9068_v3 }
0x243c   :  { %v4563_v57 = vpop.f32.mrb[58].mxu0 }
0x243d   :  { %v4642_v56 = vpop.f32.mrb[54].mxu1  ;;  %v7849_v58 = vpop.f32.mrb[59].mxu0 }
0x243e   :  { %v4643_v59 = vadd.f32 %v9916_v50, %v4642_v56  ;;  %v7860_v60 = vpop.f32.mrb[55].mxu1 }
0x243f   :  { %v230_v60 = vld [vmem:[#allocation15 + $0x8] sm:$0xff] }
0x2440   :  { %v6793_v61 = vmul.f32 -1.442695, %v4643_v59  ;;  %v229_v59 = vld [vmem:[#allocation15] sm:$0xff] }
0x2442   :  { %8758 = vpow2.f32 %v6793_v61  ;;  %v8533_v61 = vpack.c.bf16 %v230_v60, %v229_v59  ;;  %v5947_v60 = vstv %s6813_s1 }
0x244c   :  { %v8759_v63 = vpop.eup %8758 }
0x244d   :  { %v4649_v1 = vadd.f32 1.0, %v8759_v63  ;;  %v231_v63 = vld [vmem:[#allocation15 + $0x10] sm:$0xff] }
0x244f   :  { %8760 = vrcp.f32 %v4649_v1  ;;  %v232_v1 = vld [vmem:[#allocation15 + $0x18] sm:$0xff] }
0x2459   :  { %v8761_v2 = vpop.eup %8760 }
0x245a   :  { %v4652_v5 = vmul.f32 %v8761_v2, %v9957_v44  ;;  %v8536_v2 = vpack.c.bf16 %v232_v1, %v231_v63 }
0x245c   :  { %7870 = vmatmul.mubr.msk.f32.vlgmr.msra.gmra.mrb[60].mxu0 %vm438_vm2, %v4652_v5 }
0x245d   :  { %8486 = vmatpush3.bf16.msra.mxu0 %v9312_v4  ;;  %7891 = vmatprep.mubr.msk.f32.mxu0 %vm9069_vm0, %v9070_v6  ;;  %v4564_v4 = vadd.f32 %v9934_v0, %v4563_v57 }
0x245e   :  { %8487 = vmatprep.subr.bf16.mxu0 %v9068_v3 }
0x2461   :  { %8489 = vmatpush3.bf16.msra.mxu0 %v9320_v7  ;;  %v6791_v7 = vmul.f32 -1.442695, %v4564_v4 }
0x2462   :  { %8496 = vmatprep.subr.bf16.mxu0 %v9068_v3 }
0x252f   :  { %v4724_v9 = vpop.f32.mrb[60].mxu0 }
0x2530   :  { %v4725_v14 = vadd.f32 %v4724_v9, %v4654_v25  ;;  %v7871_v18 = vpop.f32.mrb[61].mxu0 }
0x2532   :  { %8762 = vtanh.f32 %v4725_v14 }
0x2533   :  { %8764 = vpow2.f32 %v6791_v7 }
0x253c   :  { %v8763_v26 = vpop.eup %8762 }
0x253d   :  { %7881 = vmatmul.mubr.msk.f32.vlgmr.msra.gmra.mrb[56].mxu1 %vm438_vm2, %v8763_v26  ;;  %v8765_v32 = vpop.eup %8764 }
0x253e   :  { %8492 = vmatpush3.bf16.msra.mxu1 %v9337_v11  ;;  %7902 = vmatprep.mubr.msk.f32.mxu1 %vm9069_vm0, %v9070_v6  ;;  %v4570_v22 = vadd.f32 1.0, %v8765_v32 }
0x253f   :  { %8493 = vmatprep.subr.bf16.mxu1 %v9068_v3 }
0x2540   :  { %8766 = vrcp.f32 %v4570_v22 }
0x2542   :  { %8495 = vmatpush3.bf16.msra.mxu1 %v9343_v13 }
0x2543   :  { %8502 = vmatprep.subr.bf16.mxu1 %v9068_v3 }
0x254a   :  { %v8767_v27 = vpop.eup %8766 }
0x254b   :  { %v4803_v55 = vsub.f32 1.0, %v8767_v27  ;;  %v4805_v13 = vmul.f32 %v8767_v27, %v9957_v44  ;;  %v235_v27 = vld [vmem:[%s10264_s12 + $0x10] sm:$0xff] }
0x2610   :  { %v4798_v23 = vpop.f32.mrb[56].mxu1 }
0x2611   :  { %v4799_v24 = vadd.f32 %v9937_v17, %v4798_v23  ;;  %v7882_v11 = vpop.f32.mrb[57].mxu1 }
0x2613   :  { %8768 = vtanh.f32 %v4799_v24 }
0x261d   :  { %v8769_v29 = vpop.eup %8768 }
0x261e   :  { %v4804_v30 = vmul.f32 %v8769_v29, %v4803_v55  ;;  %v236_v29 = vld [vmem:[%s10264_s12 + $0x18] sm:$0xff] }
0x2620   :  { %v4806_v34 = vadd.f32 %v4805_v13, %v4804_v30  ;;  %v10087_v30 = vpack.c.bf16 %v236_v29, %v235_v27  ;;  %v6709_v13 = vld [vmem:[#allocation17] ss:$0 sm:$0xff]  ;;  %v243_v27 = vld [vmem:[#allocation20 + $0x8] sm:$0xff] }
0x2622   :  { %7892 = vmatmul.mubr.msk.f32.vlgmr.msra.gmra.mrb[62].mxu0 %vm438_vm2, %v4806_v34 }
0x2623   :  { %8498 = vmatpush3.bf16.msra.mxu0 %v9366_v20  ;;  %7913 = vmatprep.mubr.msk.f32.mxu0 %vm9069_vm0, %v9070_v6 }
0x2624   :  { %8499 = vmatprep.subr.bf16.mxu0 %v9068_v3 }
0x2627   :  { %8501 = vmatpush3.bf16.msra.mxu0 %v9415_v37  ;;  %v4955_v37 = vstv %s6796_s15 }
0x2628   :  { %8508 = vmatprep.subr.bf16.mxu0 %v9068_v3 }
0x26f5   :  { %v4877_v33 = vpop.f32.mrb[62].mxu0 }
0x26f6   :  { %v4878_v35 = vadd.f32 %v9804_v8, %v4877_v33  ;;  %v7893_v36 = vpop.f32.mrb[63].mxu0 }
0x26f8   :  { %8770 = vtanh.f32 %v4878_v35 }
0x2702   :  { %v8771_v40 = vpop.eup %8770 }
0x2703   :  { %7903 = vmatmul.mubr.msk.f32.vlgmr.msra.gmra.mrb[58].mxu1 %vm438_vm2, %v8771_v40  ;;  %v6700_v40 = vld [vmem:[%s10264_s12 + $0x20] sm:$0xff] }
0x2704   :  { %8504 = vmatpush3.bf16.msra.mxu1 %v9396_v31  ;;  %7924 = vmatprep.mubr.msk.f32.mxu1 %vm9069_vm0, %v9070_v6  ;;  %v4959_v31 = vld [vmem:[#allocation2 + $0x38] sm:$0xff] }
0x2705   :  { %8505 = vmatprep.subr.bf16.mxu1 %v9068_v3 }
0x2708   :  { %8507 = vmatpush3.bf16.msra.mxu1 %v9421_v39 }
0x2709   :  { %8514 = vmatprep.subr.bf16.mxu1 %v9068_v3 }
0x27d6   :  { %v4951_v20 = vpop.f32.mrb[58].mxu1 }
0x27d7   :  { %v4952_v8 = vadd.f32 %v9881_v28, %v4951_v20  ;;  %v7904_v42 = vpop.f32.mrb[59].mxu1  ;;  %v6701_v20 = vld [vmem:[%s10264_s12 + $0x28] sm:$0xff] }
0x27d8   :  { %v6703_v42 = vld [vmem:[%s10264_s12 + $0x38] sm:$0xff] }
0x27d9   :  { %v4956_v43 = vmul.f32 %v4955_v37, %v4952_v8  ;;  %v6702_v37 = vld [vmem:[%s10264_s12 + $0x30] sm:$0xff]  ;;  %v10108_v8 = vpack.c.bf16 %v6701_v20, %v6700_v40 }
0x27db   :  { %v10024_v44 = vadd.f32 %v4956_v43, %v4806_v34  ;;  %v10114_v43 = vpack.c.bf16 %v6703_v42, %v6702_v37 }
0x27dd   :  { %7914 = vmatmul.mubr.msk.f32.vlgmr.msra.gmra.mrb[64].mxu0 %vm438_vm2, %v10024_v44  ;;  %7925 = vmatmul.mubr.msk.f32.vlgmr.msra.gmra.mrb[60].mxu1 %vm438_vm2, %v10024_v44 }
0x27de   :  { %8510 = vmatpush3.bf16.msra.mxu0 %v9481_v10  ;;  %8516 = vmatpush3.bf16.msra.mxu1 %v9493_v16  ;;  %v5035_v10 = vld [vmem:[#allocation3 + $0x38] sm:$0xff] }
0x27df   :  { %8511 = vmatprep.subr.bf16.mxu0 %v9068_v3  ;;  %8517 = vmatprep.subr.bf16.mxu1 %v9068_v3 }
0x27e0   :  { %7935 = vmatprep.mubr.msk.f32.mxu0 %vm9069_vm0, %v9070_v6  ;;  %7946 = vmatprep.mubr.msk.f32.mxu1 %vm9069_vm0, %v9070_v6 }
0x27e2   :  { %8513 = vmatpush3.bf16.msra.mxu0 %v9502_v19  ;;  %8519 = vmatpush3.bf16.msra.mxu1 %v9506_v21 }
0x27e3   :  { %8520 = vmatprep.subr.bf16.mxu0 %v9068_v3  ;;  %8526 = vmatprep.subr.bf16.mxu1 %v9068_v3 }
0x28b0   :  { %v5029_v39 = vpop.f32.mrb[64].mxu0  ;;  %v5102_v16 = vpop.f32.mrb[60].mxu1 }
0x28b1   :  { %v5030_v28 = vadd.f32 %v5029_v39, %v4959_v31  ;;  %v5103_v45 = vadd.f32 %v5102_v16, %v5035_v10  ;;  %v7915_v46 = vpop.f32.mrb[65].mxu0  ;;  %v7926_v47 = vpop.f32.mrb[61].mxu1 }
0x28b3   :  { %8772 = vtanh.f32 %v5030_v28  ;;  %v10129_v28 = vld [vmem:[#allocation18 + $0x1] ss:$0 sm:$0xff] }
0x28b4   :  { %8774 = vtanh.f32 %v5103_v45 }
0x28bd   :  { %v8773_v48 = vpop.eup %8772 }
0x28be   :  { %v8775_v62 = vpop.eup %8774  ;;  %7936 = vmatmul.mubr.msk.f32.vlgmr.msra.gmra.mrb[66].mxu0 %vm438_vm2, %v8773_v48 }
0x28bf   :  { %7947 = vmatmul.mubr.msk.f32.vlgmr.msra.gmra.mrb[62].mxu1 %vm438_vm2, %v8775_v62  ;;  %8522 = vmatpush3.bf16.msra.mxu0 %v9528_v38 }
0x28c0   :  { %8523 = vmatprep.subr.bf16.mxu0 %v9068_v3  ;;  %7957 = vmatprep.mubr.msk.f32.mxu0 %vm9069_vm0, %v9070_v6 }
0x28c1   :  { %8528 = vmatpush3.bf16.msra.mxu1 %v9571_v12  ;;  %7968 = vmatprep.mubr.msk.f32.mxu1 %vm9069_vm0, %v9070_v6 }
0x28c2   :  { %8529 = vmatprep.subr.bf16.mxu1 %v9068_v3 }
0x28c3   :  { %8525 = vmatpush3.bf16.msra.mxu0 %v9534_v41 }
0x28c4   :  { %8532 = vmatprep.subr.bf16.mxu0 %v9068_v3 }
0x28c5   :  { %8531 = vmatpush3.bf16.msra.mxu1 %v9577_v15  ;;  %v5267_v15 = vld [vmem:[#allocation4 + $0x38] sm:$0xff] }
0x28c6   :  { %8538 = vmatprep.subr.bf16.mxu1 %v9068_v3 }
0x2991   :  { %v5176_v19 = vpop.f32.mrb[66].mxu0 }
0x2992   :  { %v5255_v21 = vpop.f32.mrb[62].mxu1  ;;  %v7937_v38 = vpop.f32.mrb[67].mxu0  ;;  %v5177_v5 = vadd.f32 %v9934_v0, %v5176_v19  ;;  %v233_v0 = vld [vmem:[%s10264_s12] sm:$0xff] }
0x2993   :  { %v5256_v49 = vadd.f32 %v9916_v50, %v5255_v21  ;;  %v7948_v51 = vpop.f32.mrb[63].mxu1 }
0x2994   :  { %v6802_v25 = vmul.f32 -1.442695, %v5177_v5 }
0x2995   :  { %v6804_v12 = vmul.f32 -1.442695, %v5256_v49 }
0x2997   :  { %8776 = vpow2.f32 %v6804_v12 }
0x29a1   :  { %v8777_v52 = vpop.eup %8776 }
0x29a2   :  { %v5262_v54 = vadd.f32 1.0, %v8777_v52  ;;  %v5794_v52 = vstv %s6810_s4 }
0x29a4   :  { %8778 = vrcp.f32 %v5262_v54 }
0x29ae   :  { %v8779_v53 = vpop.eup %8778 }
0x29af   :  { %v5265_v41 = vmul.f32 %v8779_v53, %v10024_v44 }
0x29b1   :  { %7958 = vmatmul.mubr.msk.f32.vlgmr.msra.gmra.mrb[68].mxu0 %vm438_vm2, %v5265_v41 }
0x29b2   :  { %7979 = vmatprep.mubr.msk.f32.mxu0 %vm9069_vm0, %v9070_v6  ;;  %8534 = vmatpush3.bf16.msra.mxu0 %v8533_v61 }
0x29b3   :  { %8535 = vmatprep.subr.bf16.mxu0 %v9068_v3 }
0x29b6   :  { %8537 = vmatpush3.bf16.msra.mxu0 %v8536_v2 }
0x29b7   :  { %8544 = vmatprep.subr.bf16.mxu0 %v9068_v3 }
0x2a84   :  { %v5337_v57 = vpop.f32.mrb[68].mxu0 }
0x2a85   :  { %v5338_v56 = vadd.f32 %v5337_v57, %v5267_v15  ;;  %v7959_v58 = vpop.f32.mrb[69].mxu0 }
0x2a87   :  { %8780 = vtanh.f32 %v5338_v56 }
0x2a88   :  { %8782 = vpow2.f32 %v6802_v25 }
0x2a91   :  { %v8781_v50 = vpop.eup %8780 }
0x2a92   :  { %7969 = vmatmul.mubr.msk.f32.vlgmr.msra.gmra.mrb[64].mxu1 %vm438_vm2, %v8781_v50  ;;  %v8783_v9 = vpop.eup %8782 }
0x2a93   :  { %7990 = vmatprep.mubr.msk.f32.mxu1 %vm9069_vm0, %v9070_v6  ;;  %v5183_v14 = vadd.f32 1.0, %v8783_v9 }
0x2a95   :  { %8784 = vrcp.f32 %v5183_v14 }
0x2a9f   :  { %v8785_v7 = vpop.eup %8784 }
0x2aa0   :  { %v5416_v32 = vsub.f32 1.0, %v8785_v7  ;;  %v5418_v24 = vmul.f32 %v8785_v7, %v10024_v44  ;;  %v10119_v44 = vld [vmem:[#allocation18] ss:$0 sm:$0xff] }
0x2b65   :  { %v5411_v18 = vpop.f32.mrb[64].mxu1 }
0x2b66   :  { %v5412_v26 = vadd.f32 %v9937_v17, %v5411_v18  ;;  %v7970_v4 = vpop.f32.mrb[65].mxu1  ;;  %v234_v17 = vld [vmem:[%s10264_s12 + $0x8] sm:$0xff]  ;;  %s5494_s12 = sld [smem:[#allocation9]] }
0x2b67   :  { %v10081_v55 = vpack.c.bf16 %v234_v17, %v233_v0  ;;  %v242_v17 = vld [vmem:[#allocation20] sm:$0xff] }
0x2b68   :  { %8786 = vtanh.f32 %v5412_v26  ;;  %v6100_v26 = vstv %s6816_s30 }
0x2b69   :  { %8540 = vmatpush3.bf16.msra.mxu1 %v10081_v55 }
0x2b6a   :  { %8541 = vmatprep.subr.bf16.mxu1 %v9068_v3 }
0x2b6c   :  { %v5642_v46 = vstv %s5494_s12 }
0x2b6d   :  { %8543 = vmatpush3.bf16.msra.mxu1 %v10087_v30 }
0x2b6e   :  { %8550 = vmatprep.subr.bf16.mxu1 %v9068_v3 }
0x2b72   :  { %v8787_v22 = vpop.eup %8786 }
0x2b73   :  { %v5417_v23 = vmul.f32 %v8787_v22, %v5416_v32 }
0x2b75   :  { %v5419_v11 = vadd.f32 %v5418_v24, %v5417_v23 }
0x2b77   :  { %7980 = vmatmul.mubr.msk.f32.vlgmr.msra.gmra.mrb[70].mxu0 %vm438_vm2, %v5419_v11 }
0x2b78   :  { %8001 = vmatprep.mubr.msk.f32.mxu0 %vm9069_vm0, %v9070_v6  ;;  %8546 = vmatpush3.bf16.msra.mxu0 %v10108_v8 }
0x2b79   :  { %8547 = vmatprep.subr.bf16.mxu0 %v9068_v3 }
0x2b7c   :  { %8549 = vmatpush3.bf16.msra.mxu0 %v10114_v43 }
0x2b7d   :  { %8556 = vmatprep.subr.bf16.mxu0 %v9068_v3 }
0x2c4a   :  { %v5489_v34 = vpop.f32.mrb[70].mxu0 }
0x2c4b   :  { %v5490_v33 = vadd.f32 %v6709_v13, %v5489_v34  ;;  %v7981_v35 = vpop.f32.mrb[71].mxu0 }
0x2c4c   :  { %v245_v35 = vld [vmem:[#allocation20 + $0x18] sm:$0xff] }
0x2c4d   :  { %8788 = vtanh.f32 %v5490_v33  ;;  %v244_v33 = vld [vmem:[#allocation20 + $0x10] sm:$0xff] }
0x2c4e   :  { %v8614_v20 = vpack.c.bf16 %v245_v35, %v244_v33 }
0x2c57   :  { %v8789_v36 = vpop.eup %8788 }
0x2c58   :  { %7991 = vmatmul.mubr.msk.f32.vlgmr.msra.gmra.mrb[66].mxu1 %vm438_vm2, %v8789_v36 }
0x2c59   :  { %8552 = vmatpush3.bf16.msra.mxu1 %v10081_v55  ;;  %8012 = vmatprep.mubr.msk.f32.mxu1 %vm9069_vm0, %v9070_v6 }
0x2c5a   :  { %8553 = vmatprep.subr.bf16.mxu1 %v9068_v3 }
0x2c5d   :  { %8555 = vmatpush3.bf16.msra.mxu1 %v10087_v30 }
0x2c5e   :  { %8562 = vmatprep.subr.bf16.mxu1 %v9068_v3 }
0x2d2b   :  { %v5564_v31 = vpop.f32.mrb[66].mxu1 }
0x2d2c   :  { %v5565_v39 = vadd.f32 %v10119_v44, %v5564_v31  ;;  %v7992_v10 = vpop.f32.mrb[67].mxu1  ;;  %v247_v31 = vld [vmem:[%s10268_s16 + $0x8] sm:$0xff] }
0x2d2e   :  { %8790 = vtanh.f32 %v5565_v39 }
0x2d38   :  { %v8791_v16 = vpop.eup %8790 }
0x2d39   :  { %8002 = vmatmul.mubr.msk.f32.vlgmr.msra.gmra.mrb[72].mxu0 %vm438_vm2, %v8791_v16 }
0x2d3a   :  { %8558 = vmatpush3.bf16.msra.mxu0 %v10108_v8  ;;  %8023 = vmatprep.mubr.msk.f32.mxu0 %vm9069_vm0, %v9070_v6 }
0x2d3b   :  { %8559 = vmatprep.subr.bf16.mxu0 %v9068_v3 }
0x2d3e   :  { %8561 = vmatpush3.bf16.msra.mxu0 %v10114_v43 }
0x2d3f   :  { %8568 = vmatprep.subr.bf16.mxu0 %v9068_v3 }
0x2e0c   :  { %v5638_v45 = vpop.f32.mrb[72].mxu0 }
0x2e0d   :  { %v5639_v47 = vadd.f32 %v10129_v28, %v5638_v45  ;;  %v8003_v48 = vpop.f32.mrb[73].mxu0 }
0x2e0f   :  { %v5643_v62 = vmul.f32 %v5642_v46, %v5639_v47  ;;  %v6825_v46 = vld [vmem:[#allocation21] ss:$0 sm:$0xff] }
0x2e11   :  { %v5644_v19 = vadd.f32 %v8789_v36, %v5643_v62 }
0x2e13   :  { %5645 = vst.msk [vmem:[#allocation5] sm:$0xff] %vm438_vm2, %v5644_v19  ;;  %8013 = vmatmul.mubr.msk.f32.vlgmr.msra.gmra.mrb[68].mxu1 %vm438_vm2, %v5644_v19 }
0x2e14   :  { %8564 = vmatpush3.bf16.msra.mxu1 %v10081_v55  ;;  %8034 = vmatprep.mubr.msk.f32.mxu1 %vm9069_vm0, %v9070_v6 }
0x2e15   :  { %8565 = vmatprep.subr.bf16.mxu1 %v9068_v3 }
0x2e18   :  { %8567 = vmatpush3.bf16.msra.mxu1 %v10087_v30 }
0x2e19   :  { %8574 = vmatprep.subr.bf16.mxu1 %v9068_v3 }
0x2ee6   :  { %v5716_v21 = vpop.f32.mrb[68].mxu1 }
0x2ee7   :  { %v5717_v38 = vadd.f32 %v10119_v44, %v5716_v21  ;;  %v8014_v49 = vpop.f32.mrb[69].mxu1  ;;  %v249_v21 = vld [vmem:[%s10268_s16 + $0x18] sm:$0xff] }
0x2ee9   :  { %8792 = vtanh.f32 %v5717_v38 }
0x2ef3   :  { %v8793_v51 = vpop.eup %8792 }
0x2ef4   :  { %8024 = vmatmul.mubr.msk.f32.vlgmr.msra.gmra.mrb[74].mxu0 %vm438_vm2, %v8793_v51 }
0x2ef5   :  { %8570 = vmatpush3.bf16.msra.mxu0 %v10108_v8  ;;  %8045 = vmatprep.mubr.msk.f32.mxu0 %vm9069_vm0, %v9070_v6 }
0x2ef6   :  { %8571 = vmatprep.subr.bf16.mxu0 %v9068_v3 }
0x2ef9   :  { %8573 = vmatpush3.bf16.msra.mxu0 %v10114_v43 }
0x2efa   :  { %8580 = vmatprep.subr.bf16.mxu0 %v9068_v3 }
0x2fc7   :  { %v5790_v12 = vpop.f32.mrb[74].mxu0 }
0x2fc8   :  { %v5791_v54 = vadd.f32 %v10129_v28, %v5790_v12  ;;  %v8025_v53 = vpop.f32.mrb[75].mxu0 }
0x2fca   :  { %v5795_v41 = vmul.f32 %v5794_v52, %v5791_v54 }
0x2fcc   :  { %v5796_v15 = vadd.f32 %v5795_v41, %v5644_v19  ;;  %v248_v19 = vld [vmem:[%s10268_s16 + $0x10] sm:$0xff] }
0x2fcd   :  { %v8622_v51 = vpack.c.bf16 %v249_v21, %v248_v19 }
0x2fce   :  { %5798 = vst.msk [vmem:[#allocation5 + $0x8] sm:$0xff] %vm438_vm2, %v5796_v15  ;;  %8035 = vmatmul.mubr.msk.f32.vlgmr.msra.gmra.mrb[70].mxu1 %vm438_vm2, %v5796_v15 }
0x2fcf   :  { %8576 = vmatpush3.bf16.msra.mxu1 %v10081_v55  ;;  %8056 = vmatprep.mubr.msk.f32.mxu1 %vm9069_vm0, %v9070_v6 }
0x2fd0   :  { %8577 = vmatprep.subr.bf16.mxu1 %v9068_v3 }
0x2fd3   :  { %8579 = vmatpush3.bf16.msra.mxu1 %v10087_v30 }
0x2fd4   :  { %8586 = vmatprep.subr.bf16.mxu1 %v9068_v3 }
0x30a1   :  { %v5869_v57 = vpop.f32.mrb[70].mxu1 }
0x30a2   :  { %v5870_v56 = vadd.f32 %v10119_v44, %v5869_v57  ;;  %v8036_v58 = vpop.f32.mrb[71].mxu1 }
0x30a4   :  { %8794 = vtanh.f32 %v5870_v56 }
0x30ae   :  { %v8795_v50 = vpop.eup %8794 }
0x30af   :  { %8046 = vmatmul.mubr.msk.f32.vlgmr.msra.gmra.mrb[76].mxu0 %vm438_vm2, %v8795_v50 }
0x30b0   :  { %8582 = vmatpush3.bf16.msra.mxu0 %v10108_v8  ;;  %8067 = vmatprep.mubr.msk.f32.mxu0 %vm9069_vm0, %v9070_v6 }
0x30b1   :  { %8583 = vmatprep.subr.bf16.mxu0 %v9068_v3 }
0x30b4   :  { %8585 = vmatpush3.bf16.msra.mxu0 %v10114_v43 }
0x30b5   :  { %8592 = vmatprep.subr.bf16.mxu0 %v9068_v3 }
0x3182   :  { %v5943_v59 = vpop.f32.mrb[76].mxu0 }
0x3183   :  { %v5944_v61 = vadd.f32 %v10129_v28, %v5943_v59  ;;  %v8047_v63 = vpop.f32.mrb[77].mxu0 }
0x3184   :  { %v6832_v63 = vld [vmem:[#allocation23] ss:$0 sm:$0xff] }
0x3185   :  { %v5948_v1 = vmul.f32 %v5947_v60, %v5944_v61 }
0x3187   :  { %v5949_v2 = vadd.f32 %v5948_v1, %v5796_v15 }
0x3189   :  { %5951 = vst.msk [vmem:[#allocation5 + $0x10] sm:$0xff] %vm438_vm2, %v5949_v2  ;;  %8057 = vmatmul.mubr.msk.f32.vlgmr.msra.gmra.mrb[72].mxu1 %vm438_vm2, %v5949_v2 }
0x318a   :  { %8588 = vmatpush3.bf16.msra.mxu1 %v10081_v55  ;;  %8078 = vmatprep.mubr.msk.f32.mxu1 %vm9069_vm0, %v9070_v6 }
0x318b   :  { %8589 = vmatprep.subr.bf16.mxu1 %v9068_v3 }
0x318e   :  { %8591 = vmatpush3.bf16.msra.mxu1 %v10087_v30 }
0x318f   :  { %8598 = vmatprep.subr.bf16.mxu1 %v9068_v3 }
0x3190   :  { %v6413_v37 = vld [vmem:[#allocation5 + $0x10] sm:$0xff] }
0x325c   :  { %v6022_v5 = vpop.f32.mrb[72].mxu1 }
0x325d   :  { %v6023_v25 = vadd.f32 %v10119_v44, %v6022_v5  ;;  %v8058_v9 = vpop.f32.mrb[73].mxu1 }
0x325f   :  { %8796 = vtanh.f32 %v6023_v25 }
0x3269   :  { %v8797_v14 = vpop.eup %8796 }
0x326a   :  { %8068 = vmatmul.mubr.msk.f32.vlgmr.msra.gmra.mrb[78].mxu0 %vm438_vm2, %v8797_v14 }
0x326b   :  { %8594 = vmatpush3.bf16.msra.mxu0 %v10108_v8  ;;  %8089 = vmatprep.mubr.msk.f32.mxu0 %vm9069_vm0, %v9070_v6 }
0x326c   :  { %8595 = vmatprep.subr.bf16.mxu0 %v9068_v3 }
0x326f   :  { %8597 = vmatpush3.bf16.msra.mxu0 %v10114_v43 }
0x3270   :  { %8604 = vmatprep.subr.bf16.mxu0 %v9068_v3 }
0x333d   :  { %v6096_v18 = vpop.f32.mrb[78].mxu0 }
0x333e   :  { %v6097_v4 = vadd.f32 %v10129_v28, %v6096_v18  ;;  %v8069_v7 = vpop.f32.mrb[79].mxu0 }
0x3340   :  { %v6101_v32 = vmul.f32 %v6100_v26, %v6097_v4 }
0x3342   :  { %v6102_v22 = vadd.f32 %v6101_v32, %v5949_v2 }
0x3344   :  { %6104 = vst.msk [vmem:[#allocation5 + $0x18] sm:$0xff] %vm438_vm2, %v6102_v22  ;;  %8079 = vmatmul.mubr.msk.f32.vlgmr.msra.gmra.mrb[74].mxu1 %vm438_vm2, %v6102_v22 }
0x3345   :  { %8600 = vmatpush3.bf16.msra.mxu1 %v10081_v55  ;;  %8100 = vmatprep.mubr.msk.f32.mxu1 %vm9069_vm0, %v9070_v6  ;;  %v8610_v55 = vpack.c.bf16 %v243_v27, %v242_v17 }
0x3346   :  { %8601 = vmatprep.subr.bf16.mxu1 %v9068_v3 }
0x3349   :  { %8603 = vmatpush3.bf16.msra.mxu1 %v10087_v30  ;;  %v6253_v30 = vstv %s6819_s2 }
0x334a   :  { %8611 = vmatprep.subr.bf16.mxu1 %v8610_v55 }
0x3417   :  { %v6175_v23 = vpop.f32.mrb[74].mxu1 }
0x3418   :  { %v6176_v24 = vadd.f32 %v10119_v44, %v6175_v23  ;;  %v8080_v11 = vpop.f32.mrb[75].mxu1 }
0x341a   :  { %8798 = vtanh.f32 %v6176_v24 }
0x3424   :  { %v8799_v0 = vpop.eup %8798 }
0x3425   :  { %8090 = vmatmul.mubr.msk.f32.vlgmr.msra.gmra.mrb[80].mxu0 %vm438_vm2, %v8799_v0 }
0x3426   :  { %8606 = vmatpush3.bf16.msra.mxu0 %v10108_v8  ;;  %8111 = vmatprep.mubr.msk.f32.mxu0 %vm9069_vm0, %v9070_v6  ;;  %v6412_v6 = vld [vmem:[#allocation5 + $0x8] sm:$0xff]  ;;  %v6414_v8 = vld [vmem:[#allocation5 + $0x18] sm:$0xff] }
0x3427   :  { %8607 = vmatprep.subr.bf16.mxu0 %v9068_v3  ;;  %v6411_v3 = vld [vmem:[#allocation5] sm:$0xff] }
0x342a   :  { %8609 = vmatpush3.bf16.msra.mxu0 %v10114_v43  ;;  %v246_v43 = vld [vmem:[%s10268_s16] sm:$0xff]  ;;  %s6822_s16 = sld [smem:[#allocation9 + $0x5]] }
0x342b   :  { %v8618_v39 = vpack.c.bf16 %v247_v31, %v246_v43 }
0x342d   :  { %8619 = vmatprep.subr.bf16.mxu0 %v8618_v39 }
0x3430   :  { %v6406_v58 = vstv %s6822_s16 }
0x34f8   :  { %v6249_v29 = vpop.f32.mrb[80].mxu0 }
0x34f9   :  { %v6250_v13 = vadd.f32 %v10129_v28, %v6249_v29  ;;  %v8091_v34 = vpop.f32.mrb[81].mxu0 }
0x34fb   :  { %v6254_v36 = vmul.f32 %v6253_v30, %v6250_v13 }
0x34fd   :  { %v6255_v40 = vadd.f32 %v6254_v36, %v6102_v22 }
0x34ff   :  { %6257 = vst.msk [vmem:[#allocation5 + $0x20] sm:$0xff] %vm438_vm2, %v6255_v40  ;;  %8101 = vmatmul.mubr.msk.f32.vlgmr.msra.gmra.mrb[76].mxu1 %vm438_vm2, %v6255_v40 }
0x3500   :  { %8613 = vmatpush3.bf16.msra.mxu1 %v8610_v55  ;;  %8122 = vmatprep.mubr.msk.f32.mxu1 %vm438_vm2, %v6411_v3 }
0x3501   :  { %8615 = vmatprep.subr.bf16.mxu1 %v8614_v20 }
0x3504   :  { %8617 = vmatpush3.bf16.msra.mxu1 %v8614_v20 }
0x3506   :  { %v6415_v42 = vld [vmem:[#allocation5 + $0x20] sm:$0xff] }
0x3507   :  { %8123 = vmatmul.mubr.msk.f32.vlgmr.msra.gmra.mrb[78].mxu1 %vm438_vm2, %v6412_v6 }
0x3508   :  { %8125 = vmatprep.mubr.msk.f32.mxu1 %vm438_vm2, %v6413_v37 }
0x350b   :  { %8126 = vmatmul.mubr.msk.f32.gmra.mrb[80].mxu1 %vm438_vm2, %v6414_v8 }
0x350c   :  { %8128 = vmatprep.mubr.msk.f32.mxu1 %vm438_vm2, %v6415_v42 }
0x35d2   :  { %v6328_v10 = vpop.f32.mrb[76].mxu1 }
0x35d3   :  { %v6329_v16 = vadd.f32 %v10119_v44, %v6328_v10  ;;  %v8102_v45 = vpop.f32.mrb[77].mxu1 }
0x35d5   :  { %8800 = vtanh.f32 %v6329_v16 }
0x35da   :  { %v8124_v47 = vpop.f32.mrb[78].mxu1 }
0x35db   :  { %v6514_v48 = vadd.f32 %v8124_v47, %v6825_v46  ;;  %v6508_v62 = vpop.f32.mrb[79].mxu1 }
0x35dc   :  { %v6509_v38 = vadd.f32 %v6825_v46, %v6508_v62 }
0x35de   :  { %8802 = vtanh.f32 %v6509_v38  ;;  %v8127_v49 = vpop.f32.mrb[80].mxu1 }
0x35df   :  { %v8801_v12 = vpop.eup %8800  ;;  %8804 = vtanh.f32 %v6514_v48  ;;  %v6524_v44 = vadd.f32 %v8127_v49, %v6825_v46  ;;  %v6518_v52 = vpop.f32.mrb[81].mxu1 }
0x35e0   :  { %v6519_v54 = vadd.f32 %v6825_v46, %v6518_v52  ;;  %8112 = vmatmul.mubr.msk.f32.vlgmr.msra.gmra.mrb[82].mxu0 %vm438_vm2, %v8801_v12 }
0x35e1   :  { %8621 = vmatpush3.bf16.msra.mxu0 %v8618_v39 }
0x35e2   :  { %8806 = vtanh.f32 %v6519_v54  ;;  %8623 = vmatprep.subr.bf16.mxu0 %v8622_v51 }
0x35e3   :  { %8808 = vtanh.f32 %v6524_v44 }
0x35e5   :  { %8625 = vmatpush3.bf16.msra.mxu0 %v8622_v51 }
0x35e8   :  { %v8803_v53 = vpop.eup %8802 }
0x35e9   :  { %v8805_v41 = vpop.eup %8804  ;;  %8139 = vmatprep.mubr.msk.f32.mxu0 %vm438_vm2, %v8803_v53 }
0x35ea   :  { %8140 = vmatmul.mubr.msk.f32.vlgmr.msra.gmra.mrb[84].mxu0 %vm438_vm2, %v8805_v41 }
0x35ec   :  { %v8807_v15 = vpop.eup %8806 }
0x35ed   :  { %v8809_v57 = vpop.eup %8808  ;;  %8142 = vmatprep.mubr.msk.f32.mxu0 %vm438_vm2, %v8807_v15 }
0x35ee   :  { %8143 = vmatmul.mubr.msk.f32.gmra.mrb[86].mxu0 %vm438_vm2, %v8809_v57 }
0x36b3   :  { %v6402_v56 = vpop.f32.mrb[82].mxu0 }
0x36b4   :  { %v6403_v50 = vadd.f32 %v10129_v28, %v6402_v56  ;;  %v8113_v59 = vpop.f32.mrb[83].mxu0 }
0x36b6   :  { %v6407_v60 = vmul.f32 %v6406_v58, %v6403_v50 }
0x36b8   :  { %v6408_v61 = vadd.f32 %v6407_v60, %v6255_v40 }
0x36ba   :  { %6410 = vst.msk [vmem:[#allocation5 + $0x28] sm:$0xff] %vm438_vm2, %v6408_v61 }
0x36bd   :  { %v8141_v1 = vpop.f32.mrb[84].mxu0 }
0x36be   :  { %v6640_v2 = vadd.f32 %v8141_v1, %v6832_v63  ;;  %v6634_v5 = vpop.f32.mrb[85].mxu0 }
0x36bf   :  { %v6635_v25 = vadd.f32 %v6832_v63, %v6634_v5 }
0x36c0   :  { %6664 = vst.msk [vmem:[%s10270_s18 + $0x8] sm:$0xff] %vm308_vm1, %v6640_v2 }
0x36c1   :  { %6663 = vst.msk [vmem:[%s10270_s18] sm:$0xff] %vm308_vm1, %v6635_v25  ;;  %v8144_v28 = vpop.f32.mrb[86].mxu0  ;;  %v6416_v9 = vld [vmem:[#allocation5 + $0x28] sm:$0xff] }
0x36c2   :  { %v6650_v14 = vadd.f32 %v8144_v28, %v6832_v63  ;;  %v6644_v18 = vpop.f32.mrb[87].mxu0  ;;  %8129 = vmatmul.mubr.msk.f32.gmra.mrb[82].mxu1 %vm438_vm2, %v6416_v9 }
0x36c3   :  { %v6645_v26 = vadd.f32 %v6832_v63, %v6644_v18 }
0x36c4   :  { %6666 = vst.msk [vmem:[%s10270_s18 + $0x18] sm:$0xff] %vm308_vm1, %v6650_v14 }
0x36c5   :  { %6665 = vst.msk [vmem:[%s10270_s18 + $0x10] sm:$0xff] %vm308_vm1, %v6645_v26 }
0x3795   :  { %v8130_v4 = vpop.f32.mrb[82].mxu1 }
0x3796   :  { %v6534_v7 = vadd.f32 %v8130_v4, %v6825_v46  ;;  %v6528_v32 = vpop.f32.mrb[83].mxu1 }
0x3797   :  { %v6529_v22 = vadd.f32 %v6825_v46, %v6528_v32 }
0x3799   :  { %8810 = vtanh.f32 %v6529_v22 }
0x379a   :  { %8812 = vtanh.f32 %v6534_v7 }
0x37a3   :  { %v8811_v23 = vpop.eup %8810 }
0x37a4   :  { %v8813_v24 = vpop.eup %8812  ;;  %8145 = vmatprep.mubr.msk.f32.mxu0 %vm438_vm2, %v8811_v23 }
0x37a5   :  { %8146 = vmatmul.mubr.msk.f32.gmra.mrb[88].mxu0 %vm438_vm2, %v8813_v24 }
0x3878   :  { %v8147_v11 = vpop.f32.mrb[88].mxu0 }
0x3879   :  { %v6660_v0 = vadd.f32 %v8147_v11, %v6832_v63  ;;  %v6654_v17 = vpop.f32.mrb[89].mxu0 }
0x387a   :  { %v6655_v27 = vadd.f32 %v6832_v63, %v6654_v17 }
0x387b   :  { %6668 = vst.msk [vmem:[%s10270_s18 + $0x28] sm:$0xff] %vm308_vm1, %v6660_v0 }
0x387c   :  { %6667 = vst.msk [vmem:[%s10270_s18 + $0x20] sm:$0xff] %vm308_vm1, %v6655_v27 }
0x387d   :  { %6673 = vsyncpa [#allocation7], 1 }
0x387e   :  { %6674 = vsyncpa [#allocation13], 1 }
0x387f   :  { %6675 = vsyncpa [#allocation16], 1 }
0x3880   :  { %6676 = vsyncpa [#allocation19], 1 }
0x3881   :  { %6677 = vsyncpa [#allocation22], 1 }
0x3882   :  { %6678 = vsyncpa [#allocation8], 1 }
0x3883   :  { %6679 = vsyncpa [#allocation10], 1 }

</bundles_post_ra>
